<compile_context>
chip_gen: v7x
topology: tpu7x:2x2x1
jax: 0.10.0
libtpu: 0.0.40
codegen_flags: <defaults>
</compile_context>

<pallas_src>
import jax
import jax.numpy as jnp
from jax import lax
from jax.experimental import pallas as pl
from jax.experimental.pallas import tpu as pltpu


def make_rdb_kernel(H, W, C):
    WC = W * C
    PWC = (W + 4) * C          # [extra margin | halo | W pixels | halo | margin] * C
    R0 = 8                     # interior starts at a sublane-aligned row
    LEFT = 2 * C               # interior lane offset

    def kernel(x_ref, w1_ref, b1_ref, wd_ref, bd_ref, o_ref, buf_ref):
        # x_ref : (1, H, W*C)          lane-dense input block
        # w1_ref: (9*(2C-1), W*C)      conv1 diagonal weights, row = tap*(2C-1)+k
        # b1_ref: (1, W*C)             conv1 bias (tiled over W)
        # wd_ref: (4*9, W*C)           depthwise weights, row = conv*9 + tap
        # bd_ref: (4, W*C)             depthwise biases (tiled over W)
        # buf_ref: (R0+H+1, (W+4)*C)   padded running sum s = x + out1 + ...

        # --- border-only zero fill (interior is fully overwritten below) ---
        buf_ref[pl.ds(R0 - 1, 1), :] = jnp.zeros((1, PWC), jnp.float32)   # top halo
        buf_ref[pl.ds(R0 + H, 1), :] = jnp.zeros((1, PWC), jnp.float32)   # bottom halo
        zc = jnp.zeros((H, LEFT), jnp.float32)
        buf_ref[pl.ds(R0, H), pl.ds(0, LEFT)] = zc                         # left cols
        buf_ref[pl.ds(R0, H), pl.ds(LEFT + WC, LEFT)] = zc                 # right cols

        x = x_ref[0].astype(jnp.float32)                       # (H, W*C)
        buf_ref[pl.ds(R0, H), pl.ds(LEFT, WC)] = x             # s = x

        # --- conv1: dense 3x3 via (2C-1) channel-diagonals per tap (VPU FMAs) ---
        acc = jnp.broadcast_to(b1_ref[...], (H, WC))
        row = 0
        for t in range(9):
            ky, kx = divmod(t, 3)
            for k in range(2 * C - 1):
                d = k - (C - 1)                                 # d = c_out - c_in
                acc = acc + (buf_ref[pl.ds(R0 + ky - 1, H),
                                     pl.ds((kx + 1) * C - d, WC)]
                             * w1_ref[pl.ds(row, 1), :])
                row += 1
        buf_ref[pl.ds(R0, H), pl.ds(LEFT, WC)] += jnp.maximum(acc, 0.0)   # s += out1

        # --- conv2..conv5: depthwise 3x3, accumulator in vregs, 1 write/conv ---
        def dw(i):
            a = jnp.broadcast_to(bd_ref[pl.ds(i, 1), :], (H, WC))
            for t in range(9):
                ky, kx = divmod(t, 3)
                a = a + (buf_ref[pl.ds(R0 + ky - 1, H),
                                 pl.ds((kx + 1) * C, WC)]
                         * wd_ref[pl.ds(i * 9 + t, 1), :])
            return a

        for i in range(3):                                      # conv2..conv4
            buf_ref[pl.ds(R0, H), pl.ds(LEFT, WC)] += jnp.maximum(dw(i), 0.0)
        out5 = dw(3)                                            # conv5: no ReLU
        o_ref[0] = (out5 * 0.2 + x).astype(o_ref.dtype)

    return kernel


def residual_dense_block(x_nchw, w1, b1, wd, bd):
    """x_nchw: (N,C,H,W); w1: (C,C,3,3) OIHW; b1: (C,); wd: (4,C,1,3,3); bd: (4,C)."""
    N, C, H, W = x_nchw.shape
    WC = W * C
    R0 = 8
    f32 = jnp.float32

    # Lane-dense activations: (N, H, W*C), channel fastest within the lane axis.
    x = jnp.transpose(x_nchw, (0, 2, 3, 1)).reshape(N, H, WC)

    # --- pre-pack weights to lane-dense rows (once, in the wrapper) ---
    d_vals = jnp.arange(-(C - 1), C)                           # (2C-1,)
    co = jnp.arange(C)
    ci = co[None, :] - d_vals[:, None]                         # (2C-1, C): ci = co - d
    valid = (ci >= 0) & (ci < C)
    w1_r = w1.astype(f32).reshape(C, C, 9)                     # [co, ci, tap]
    gath = w1_r[co[None, :], jnp.clip(ci, 0, C - 1), :]        # (2C-1, C, 9)
    gath = jnp.where(valid[:, :, None], gath, 0.0)
    w1k = jnp.tile(jnp.transpose(gath, (2, 0, 1)), (1, 1, W))  # (9, 2C-1, W*C)
    w1k = w1k.reshape(9 * (2 * C - 1), WC)
    b1k = jnp.tile(b1.astype(f32), W).reshape(1, WC)
    wdk = jnp.tile(jnp.transpose(wd.astype(f32).reshape(4, C, 9), (0, 2, 1)),
                   (1, 1, W)).reshape(36, WC)                  # (4*9, W*C)
    bdk = jnp.tile(bd.astype(f32), (1, W))                     # (4, W*C)

    flops = N * (2 * H * W * 9 * C * C          # conv1
                 + 4 * 2 * H * W * 9 * C        # four depthwise convs
                 + 12 * H * W * C)              # sums / relu / residual (rough)
    weight_elems = w1k.size + b1k.size + wdk.size + bdk.size
    bytes_accessed = int(2 * N * H * W * C * x.dtype.itemsize + 4 * weight_elems)

    # VMEM budget: scratch + double-buffered in/out blocks + resident weights,
    # clamped against the actual device capacity (64 MiB on v7x, 128 on v5e/v6e).
    itb = jnp.dtype(x.dtype).itemsize
    need = ((R0 + H + 1) * (W + 4) * C * 4
            + 2 * 2 * H * WC * itb
            + 2 * 4 * weight_elems)
    try:
        cap = pltpu.get_tpu_info().vmem_capacity_bytes
    except Exception:
        cap = 64 * 1024 * 1024
    vmem_limit = int(min(max(2 * need, 32 * 1024 * 1024), cap // 2))

    kernel = make_rdb_kernel(H, W, C)
    out = pl.pallas_call(
        kernel,
        out_shape=jax.ShapeDtypeStruct((N, H, WC), x.dtype),
        grid_spec=pltpu.PrefetchScalarGridSpec(
            num_scalar_prefetch=0,
            grid=(N,),
            in_specs=[
                pl.BlockSpec((1, H, WC), lambda n: (n, 0, 0)),
                pl.BlockSpec((9 * (2 * C - 1), WC), lambda n: (0, 0)),
                pl.BlockSpec((1, WC), lambda n: (0, 0)),
                pl.BlockSpec((36, WC), lambda n: (0, 0)),
                pl.BlockSpec((4, WC), lambda n: (0, 0)),
            ],
            out_specs=pl.BlockSpec((1, H, WC), lambda n: (n, 0, 0)),
            scratch_shapes=[
                pltpu.VMEM((R0 + H + 1, (W + 4) * C), jnp.float32),
            ],
        ),
        compiler_params=pltpu.CompilerParams(
            dimension_semantics=("parallel",),          # batch elements independent
            vmem_limit_bytes=vmem_limit,
        ),
        cost_estimate=pl.CostEstimate(
            flops=flops, transcendentals=0, bytes_accessed=bytes_accessed),
    )(x, w1k, b1k, wdk, bdk)

    out = out.reshape(N, H, W, C)
    return jnp.transpose(out, (0, 3, 1, 2))                    # back to NCHW


def reference(x, w1, b1, wd, bd):
    """Pure-JAX NCHW reference matching the PyTorch forward exactly."""
    dn = ("NCHW", "OIHW", "NCHW")
    C = x.shape[1]

    def conv(inp, w, b, groups=1):
        y = lax.conv_general_dilated(inp, w, (1, 1), ((1, 1), (1, 1)),
                                     dimension_numbers=dn,
                                     feature_group_count=groups)
        return y + b[None, :, None, None]

    out1 = jax.nn.relu(conv(x, w1, b1))
    out2 = jax.nn.relu(conv(x + out1, wd[0], bd[0], groups=C))
    out3 = jax.nn.relu(conv(x + out1 + out2, wd[1], bd[1], groups=C))
    out4 = jax.nn.relu(conv(x + out1 + out2 + out3, wd[2], bd[2], groups=C))
    out5 = conv(x + out1 + out2 + out3 + out4, wd[3], bd[3], groups=C)
    return out5 * 0.2 + x


if __name__ == "__main__":
    N, C, H, W = 2, 4, 16, 16
    key = jax.random.PRNGKey(0)
    ks = jax.random.split(key, 5)

    # Deterministic synthetic parameters (PyTorch shapes; synthetic init).
    x = jax.random.normal(ks[0], (N, C, H, W), jnp.float32)
    w1 = jax.random.normal(ks[1], (C, C, 3, 3), jnp.float32) * 0.1       # conv1 weight
    b1 = jax.random.normal(ks[2], (C,), jnp.float32) * 0.1               # conv1 bias
    wd = jax.random.normal(ks[3], (4, C, 1, 3, 3), jnp.float32) * 0.1    # conv2..5 (dw)
    bd = jax.random.normal(ks[4], (4, C), jnp.float32) * 0.1             # conv2..5 bias

    out = residual_dense_block(x, w1, b1, wd, bd)
    out = jax.block_until_ready(out)

    ref = reference(x, w1, b1, wd, bd)
    err = float(jnp.max(jnp.abs(out - ref)))
    assert jnp.allclose(out, ref, atol=1e-4, rtol=1e-4), f"max abs err {err}"
    print("KERNEL_OK")
</pallas_src>

<mosaic_0001>
module attributes {stable_mosaic.version = 11 : i64} {
  func.func @kernel(%arg0: i32, %arg1: memref<1x16x64xf32, #tpu.memory_space<vmem>>, %arg2: memref<63x64xf32, #tpu.memory_space<vmem>>, %arg3: memref<1x64xf32, #tpu.memory_space<vmem>>, %arg4: memref<36x64xf32, #tpu.memory_space<vmem>>, %arg5: memref<4x64xf32, #tpu.memory_space<vmem>>, %arg6: memref<1x16x64xf32, #tpu.memory_space<vmem>>, %arg7: memref<25x80xf32, #tpu.memory_space<vmem>>) attributes {dimension_semantics = [#tpu.dimension_semantics<parallel>], iteration_bounds = array<i64: 2>, scalar_prefetch = 0 : i64, scratch_operands = 1 : i64, tpu.core_type = #tpu.core_type<tc>, window_params = [{transform_indices = @transform_0, window_bounds = array<i64: 1, 16, 64>}, {pipeline_mode = #tpu.pipeline_mode<synchronous>, transform_indices = @transform_1, window_bounds = array<i64: 63, 64>}, {pipeline_mode = #tpu.pipeline_mode<synchronous>, transform_indices = @transform_2, window_bounds = array<i64: 1, 64>}, {pipeline_mode = #tpu.pipeline_mode<synchronous>, transform_indices = @transform_3, window_bounds = array<i64: 36, 64>}, {pipeline_mode = #tpu.pipeline_mode<synchronous>, transform_indices = @transform_4, window_bounds = array<i64: 4, 64>}, {transform_indices = @transform_5, window_bounds = array<i64: 1, 16, 64>}]} {
    %cst = arith.constant 0.000000e+00 : f32
    %0 = vector.broadcast %cst : f32 to vector<1x80xf32>
    %c7 = arith.constant 7 : index
    %c0 = arith.constant 0 : index
    %1 = vector.load %arg7[%c7, %c0] : memref<25x80xf32, #tpu.memory_space<vmem>>, vector<1x80xf32>
    tpu.vector_store %arg7[%c7, %c0], %0 {strides = array<i32>} : memref<25x80xf32, #tpu.memory_space<vmem>>, vector<1x80xf32>,
    %cst_0 = arith.constant 0.000000e+00 : f32
    %2 = vector.broadcast %cst_0 : f32 to vector<1x80xf32>
    %c24 = arith.constant 24 : index
    %c0_1 = arith.constant 0 : index
    %3 = vector.load %arg7[%c24, %c0_1] : memref<25x80xf32, #tpu.memory_space<vmem>>, vector<1x80xf32>
    tpu.vector_store %arg7[%c24, %c0_1], %2 {strides = array<i32>} : memref<25x80xf32, #tpu.memory_space<vmem>>, vector<1x80xf32>,
    %cst_2 = arith.constant 0.000000e+00 : f32
    %4 = vector.broadcast %cst_2 : f32 to vector<16x8xf32>
    %c8 = arith.constant 8 : index
    %c0_3 = arith.constant 0 : index
    %5 = vector.load %arg7[%c8, %c0_3] : memref<25x80xf32, #tpu.memory_space<vmem>>, vector<16x8xf32>
    tpu.vector_store %arg7[%c8, %c0_3], %4 {strides = array<i32>} : memref<25x80xf32, #tpu.memory_space<vmem>>, vector<16x8xf32>,
    %c8_4 = arith.constant 8 : index
    %c72 = arith.constant 72 : index
    %6 = vector.load %arg7[%c8_4, %c72] : memref<25x80xf32, #tpu.memory_space<vmem>>, vector<16x8xf32>
    tpu.vector_store %arg7[%c8_4, %c72], %4 {strides = array<i32>} : memref<25x80xf32, #tpu.memory_space<vmem>>, vector<16x8xf32>,
    %c0_5 = arith.constant 0 : index
    %c0_6 = arith.constant 0 : index
    %c0_7 = arith.constant 0 : index
    %7 = vector.load %arg1[%c0_5, %c0_6, %c0_7] : memref<1x16x64xf32, #tpu.memory_space<vmem>>, vector<1x16x64xf32>
    %8 = vector.shape_cast %7 : vector<1x16x64xf32> to vector<16x64xf32>
    %c8_8 = arith.constant 8 : index
    %c8_9 = arith.constant 8 : index
    %9 = vector.load %arg7[%c8_8, %c8_9] : memref<25x80xf32, #tpu.memory_space<vmem>>, vector<16x64xf32>
    tpu.vector_store %arg7[%c8_8, %c8_9], %8 {strides = array<i32>} : memref<25x80xf32, #tpu.memory_space<vmem>>, vector<16x64xf32>,
    %c0_10 = arith.constant 0 : index
    %c0_11 = arith.constant 0 : index
    %10 = vector.load %arg3[%c0_10, %c0_11] : memref<1x64xf32, #tpu.memory_space<vmem>>, vector<1x64xf32>
    %11 = vector.shape_cast %10 : vector<1x64xf32> to vector<1x64xf32>
    %12 = vector.broadcast %11 : vector<1x64xf32> to vector<16x64xf32>
    %c7_12 = arith.constant 7 : index
    %c7_13 = arith.constant 7 : index
    %13 = vector.load %arg7[%c7_12, %c7_13] : memref<25x80xf32, #tpu.memory_space<vmem>>, vector<16x64xf32>
    %c0_14 = arith.constant 0 : index
    %c0_15 = arith.constant 0 : index
    %14 = vector.load %arg2[%c0_14, %c0_15] : memref<63x64xf32, #tpu.memory_space<vmem>>, vector<1x64xf32>
    %15 = vector.broadcast %14 : vector<1x64xf32> to vector<16x64xf32>
    %16 = arith.mulf %13, %15 : vector<16x64xf32>
    %17 = arith.addf %12, %16 : vector<16x64xf32>
    %c7_16 = arith.constant 7 : index
    %c6 = arith.constant 6 : index
    %18 = vector.load %arg7[%c7_16, %c6] : memref<25x80xf32, #tpu.memory_space<vmem>>, vector<16x64xf32>
    %c1 = arith.constant 1 : index
    %c0_17 = arith.constant 0 : index
    %19 = vector.load %arg2[%c1, %c0_17] : memref<63x64xf32, #tpu.memory_space<vmem>>, vector<1x64xf32>
    %20 = vector.broadcast %19 : vector<1x64xf32> to vector<16x64xf32>
    %21 = arith.mulf %18, %20 : vector<16x64xf32>
    %22 = arith.addf %17, %21 : vector<16x64xf32>
    %c7_18 = arith.constant 7 : index
    %c5 = arith.constant 5 : index
    %23 = vector.load %arg7[%c7_18, %c5] : memref<25x80xf32, #tpu.memory_space<vmem>>, vector<16x64xf32>
    %c2 = arith.constant 2 : index
    %c0_19 = arith.constant 0 : index
    %24 = vector.load %arg2[%c2, %c0_19] : memref<63x64xf32, #tpu.memory_space<vmem>>, vector<1x64xf32>
    %25 = vector.broadcast %24 : vector<1x64xf32> to vector<16x64xf32>
    %26 = arith.mulf %23, %25 : vector<16x64xf32>
    %27 = arith.addf %22, %26 : vector<16x64xf32>
    %c7_20 = arith.constant 7 : index
    %c4 = arith.constant 4 : index
    %28 = vector.load %arg7[%c7_20, %c4] : memref<25x80xf32, #tpu.memory_space<vmem>>, vector<16x64xf32>
    %c3 = arith.constant 3 : index
    %c0_21 = arith.constant 0 : index
    %29 = vector.load %arg2[%c3, %c0_21] : memref<63x64xf32, #tpu.memory_space<vmem>>, vector<1x64xf32>
    %30 = vector.broadcast %29 : vector<1x64xf32> to vector<16x64xf32>
    %31 = arith.mulf %28, %30 : vector<16x64xf32>
    %32 = arith.addf %27, %31 : vector<16x64xf32>
    %c7_22 = arith.constant 7 : index
    %c3_23 = arith.constant 3 : index
    %33 = vector.load %arg7[%c7_22, %c3_23] : memref<25x80xf32, #tpu.memory_space<vmem>>, vector<16x64xf32>
    %c4_24 = arith.constant 4 : index
    %c0_25 = arith.constant 0 : index
    %34 = vector.load %arg2[%c4_24, %c0_25] : memref<63x64xf32, #tpu.memory_space<vmem>>, vector<1x64xf32>
    %35 = vector.broadcast %34 : vector<1x64xf32> to vector<16x64xf32>
    %36 = arith.mulf %33, %35 : vector<16x64xf32>
    %37 = arith.addf %32, %36 : vector<16x64xf32>
    %c7_26 = arith.constant 7 : index
    %c2_27 = arith.constant 2 : index
    %38 = vector.load %arg7[%c7_26, %c2_27] : memref<25x80xf32, #tpu.memory_space<vmem>>, vector<16x64xf32>
    %c5_28 = arith.constant 5 : index
    %c0_29 = arith.constant 0 : index
    %39 = vector.load %arg2[%c5_28, %c0_29] : memref<63x64xf32, #tpu.memory_space<vmem>>, vector<1x64xf32>
    %40 = vector.broadcast %39 : vector<1x64xf32> to vector<16x64xf32>
    %41 = arith.mulf %38, %40 : vector<16x64xf32>
    %42 = arith.addf %37, %41 : vector<16x64xf32>
    %c7_30 = arith.constant 7 : index
    %c1_31 = arith.constant 1 : index
    %43 = vector.load %arg7[%c7_30, %c1_31] : memref<25x80xf32, #tpu.memory_space<vmem>>, vector<16x64xf32>
    %c6_32 = arith.constant 6 : index
    %c0_33 = arith.constant 0 : index
    %44 = vector.load %arg2[%c6_32, %c0_33] : memref<63x64xf32, #tpu.memory_space<vmem>>, vector<1x64xf32>
    %45 = vector.broadcast %44 : vector<1x64xf32> to vector<16x64xf32>
    %46 = arith.mulf %43, %45 : vector<16x64xf32>
    %47 = arith.addf %42, %46 : vector<16x64xf32>
    %c7_34 = arith.constant 7 : index
    %c11 = arith.constant 11 : index
    %48 = vector.load %arg7[%c7_34, %c11] : memref<25x80xf32, #tpu.memory_space<vmem>>, vector<16x64xf32>
    %c7_35 = arith.constant 7 : index
    %c0_36 = arith.constant 0 : index
    %49 = vector.load %arg2[%c7_35, %c0_36] : memref<63x64xf32, #tpu.memory_space<vmem>>, vector<1x64xf32>
    %50 = vector.broadcast %49 : vector<1x64xf32> to vector<16x64xf32>
    %51 = arith.mulf %48, %50 : vector<16x64xf32>
    %52 = arith.addf %47, %51 : vector<16x64xf32>
    %c7_37 = arith.constant 7 : index
    %c10 = arith.constant 10 : index
    %53 = vector.load %arg7[%c7_37, %c10] : memref<25x80xf32, #tpu.memory_space<vmem>>, vector<16x64xf32>
    %c8_38 = arith.constant 8 : index
    %c0_39 = arith.constant 0 : index
    %54 = vector.load %arg2[%c8_38, %c0_39] : memref<63x64xf32, #tpu.memory_space<vmem>>, vector<1x64xf32>
    %55 = vector.broadcast %54 : vector<1x64xf32> to vector<16x64xf32>
    %56 = arith.mulf %53, %55 : vector<16x64xf32>
    %57 = arith.addf %52, %56 : vector<16x64xf32>
    %c7_40 = arith.constant 7 : index
    %c9 = arith.constant 9 : index
    %58 = vector.load %arg7[%c7_40, %c9] : memref<25x80xf32, #tpu.memory_space<vmem>>, vector<16x64xf32>
    %c9_41 = arith.constant 9 : index
    %c0_42 = arith.constant 0 : index
    %59 = vector.load %arg2[%c9_41, %c0_42] : memref<63x64xf32, #tpu.memory_space<vmem>>, vector<1x64xf32>
    %60 = vector.broadcast %59 : vector<1x64xf32> to vector<16x64xf32>
    %61 = arith.mulf %58, %60 : vector<16x64xf32>
    %62 = arith.addf %57, %61 : vector<16x64xf32>
    %c7_43 = arith.constant 7 : index
    %c8_44 = arith.constant 8 : index
    %63 = vector.load %arg7[%c7_43, %c8_44] : memref<25x80xf32, #tpu.memory_space<vmem>>, vector<16x64xf32>
    %c10_45 = arith.constant 10 : index
    %c0_46 = arith.constant 0 : index
    %64 = vector.load %arg2[%c10_45, %c0_46] : memref<63x64xf32, #tpu.memory_space<vmem>>, vector<1x64xf32>
    %65 = vector.broadcast %64 : vector<1x64xf32> to vector<16x64xf32>
    %66 = arith.mulf %63, %65 : vector<16x64xf32>
    %67 = arith.addf %62, %66 : vector<16x64xf32>
    %c7_47 = arith.constant 7 : index
    %c7_48 = arith.constant 7 : index
    %68 = vector.load %arg7[%c7_47, %c7_48] : memref<25x80xf32, #tpu.memory_space<vmem>>, vector<16x64xf32>
    %c11_49 = arith.constant 11 : index
    %c0_50 = arith.constant 0 : index
    %69 = vector.load %arg2[%c11_49, %c0_50] : memref<63x64xf32, #tpu.memory_space<vmem>>, vector<1x64xf32>
    %70 = vector.broadcast %69 : vector<1x64xf32> to vector<16x64xf32>
    %71 = arith.mulf %68, %70 : vector<16x64xf32>
    %72 = arith.addf %67, %71 : vector<16x64xf32>
    %c7_51 = arith.constant 7 : index
    %c6_52 = arith.constant 6 : index
    %73 = vector.load %arg7[%c7_51, %c6_52] : memref<25x80xf32, #tpu.memory_space<vmem>>, vector<16x64xf32>
    %c12 = arith.constant 12 : index
    %c0_53 = arith.constant 0 : index
    %74 = vector.load %arg2[%c12, %c0_53] : memref<63x64xf32, #tpu.memory_space<vmem>>, vector<1x64xf32>
    %75 = vector.broadcast %74 : vector<1x64xf32> to vector<16x64xf32>
    %76 = arith.mulf %73, %75 : vector<16x64xf32>
    %77 = arith.addf %72, %76 : vector<16x64xf32>
    %c7_54 = arith.constant 7 : index
    %c5_55 = arith.constant 5 : index
    %78 = vector.load %arg7[%c7_54, %c5_55] : memref<25x80xf32, #tpu.memory_space<vmem>>, vector<16x64xf32>
    %c13 = arith.constant 13 : index
    %c0_56 = arith.constant 0 : index
    %79 = vector.load %arg2[%c13, %c0_56] : memref<63x64xf32, #tpu.memory_space<vmem>>, vector<1x64xf32>
    %80 = vector.broadcast %79 : vector<1x64xf32> to vector<16x64xf32>
    %81 = arith.mulf %78, %80 : vector<16x64xf32>
    %82 = arith.addf %77, %81 : vector<16x64xf32>
    %c7_57 = arith.constant 7 : index
    %c15 = arith.constant 15 : index
    %83 = vector.load %arg7[%c7_57, %c15] : memref<25x80xf32, #tpu.memory_space<vmem>>, vector<16x64xf32>
    %c14 = arith.constant 14 : index
    %c0_58 = arith.constant 0 : index
    %84 = vector.load %arg2[%c14, %c0_58] : memref<63x64xf32, #tpu.memory_space<vmem>>, vector<1x64xf32>
    %85 = vector.broadcast %84 : vector<1x64xf32> to vector<16x64xf32>
    %86 = arith.mulf %83, %85 : vector<16x64xf32>
    %87 = arith.addf %82, %86 : vector<16x64xf32>
    %c7_59 = arith.constant 7 : index
    %c14_60 = arith.constant 14 : index
    %88 = vector.load %arg7[%c7_59, %c14_60] : memref<25x80xf32, #tpu.memory_space<vmem>>, vector<16x64xf32>
    %c15_61 = arith.constant 15 : index
    %c0_62 = arith.constant 0 : index
    %89 = vector.load %arg2[%c15_61, %c0_62] : memref<63x64xf32, #tpu.memory_space<vmem>>, vector<1x64xf32>
    %90 = vector.broadcast %89 : vector<1x64xf32> to vector<16x64xf32>
    %91 = arith.mulf %88, %90 : vector<16x64xf32>
    %92 = arith.addf %87, %91 : vector<16x64xf32>
    %c7_63 = arith.constant 7 : index
    %c13_64 = arith.constant 13 : index
    %93 = vector.load %arg7[%c7_63, %c13_64] : memref<25x80xf32, #tpu.memory_space<vmem>>, vector<16x64xf32>
    %c16 = arith.constant 16 : index
    %c0_65 = arith.constant 0 : index
    %94 = vector.load %arg2[%c16, %c0_65] : memref<63x64xf32, #tpu.memory_space<vmem>>, vector<1x64xf32>
    %95 = vector.broadcast %94 : vector<1x64xf32> to vector<16x64xf32>
    %96 = arith.mulf %93, %95 : vector<16x64xf32>
    %97 = arith.addf %92, %96 : vector<16x64xf32>
    %c7_66 = arith.constant 7 : index
    %c12_67 = arith.constant 12 : index
    %98 = vector.load %arg7[%c7_66, %c12_67] : memref<25x80xf32, #tpu.memory_space<vmem>>, vector<16x64xf32>
    %c17 = arith.constant 17 : index
    %c0_68 = arith.constant 0 : index
    %99 = vector.load %arg2[%c17, %c0_68] : memref<63x64xf32, #tpu.memory_space<vmem>>, vector<1x64xf32>
    %100 = vector.broadcast %99 : vector<1x64xf32> to vector<16x64xf32>
    %101 = arith.mulf %98, %100 : vector<16x64xf32>
    %102 = arith.addf %97, %101 : vector<16x64xf32>
    %c7_69 = arith.constant 7 : index
    %c11_70 = arith.constant 11 : index
    %103 = vector.load %arg7[%c7_69, %c11_70] : memref<25x80xf32, #tpu.memory_space<vmem>>, vector<16x64xf32>
    %c18 = arith.constant 18 : index
    %c0_71 = arith.constant 0 : index
    %104 = vector.load %arg2[%c18, %c0_71] : memref<63x64xf32, #tpu.memory_space<vmem>>, vector<1x64xf32>
    %105 = vector.broadcast %104 : vector<1x64xf32> to vector<16x64xf32>
    %106 = arith.mulf %103, %105 : vector<16x64xf32>
    %107 = arith.addf %102, %106 : vector<16x64xf32>
    %c7_72 = arith.constant 7 : index
    %c10_73 = arith.constant 10 : index
    %108 = vector.load %arg7[%c7_72, %c10_73] : memref<25x80xf32, #tpu.memory_space<vmem>>, vector<16x64xf32>
    %c19 = arith.constant 19 : index
    %c0_74 = arith.constant 0 : index
    %109 = vector.load %arg2[%c19, %c0_74] : memref<63x64xf32, #tpu.memory_space<vmem>>, vector<1x64xf32>
    %110 = vector.broadcast %109 : vector<1x64xf32> to vector<16x64xf32>
    %111 = arith.mulf %108, %110 : vector<16x64xf32>
    %112 = arith.addf %107, %111 : vector<16x64xf32>
    %c7_75 = arith.constant 7 : index
    %c9_76 = arith.constant 9 : index
    %113 = vector.load %arg7[%c7_75, %c9_76] : memref<25x80xf32, #tpu.memory_space<vmem>>, vector<16x64xf32>
    %c20 = arith.constant 20 : index
    %c0_77 = arith.constant 0 : index
    %114 = vector.load %arg2[%c20, %c0_77] : memref<63x64xf32, #tpu.memory_space<vmem>>, vector<1x64xf32>
    %115 = vector.broadcast %114 : vector<1x64xf32> to vector<16x64xf32>
    %116 = arith.mulf %113, %115 : vector<16x64xf32>
    %117 = arith.addf %112, %116 : vector<16x64xf32>
    %c8_78 = arith.constant 8 : index
    %c7_79 = arith.constant 7 : index
    %118 = vector.load %arg7[%c8_78, %c7_79] : memref<25x80xf32, #tpu.memory_space<vmem>>, vector<16x64xf32>
    %c21 = arith.constant 21 : index
    %c0_80 = arith.constant 0 : index
    %119 = vector.load %arg2[%c21, %c0_80] : memref<63x64xf32, #tpu.memory_space<vmem>>, vector<1x64xf32>
    %120 = vector.broadcast %119 : vector<1x64xf32> to vector<16x64xf32>
    %121 = arith.mulf %118, %120 : vector<16x64xf32>
    %122 = arith.addf %117, %121 : vector<16x64xf32>
    %c8_81 = arith.constant 8 : index
    %c6_82 = arith.constant 6 : index
    %123 = vector.load %arg7[%c8_81, %c6_82] : memref<25x80xf32, #tpu.memory_space<vmem>>, vector<16x64xf32>
    %c22 = arith.constant 22 : index
    %c0_83 = arith.constant 0 : index
    %124 = vector.load %arg2[%c22, %c0_83] : memref<63x64xf32, #tpu.memory_space<vmem>>, vector<1x64xf32>
    %125 = vector.broadcast %124 : vector<1x64xf32> to vector<16x64xf32>
    %126 = arith.mulf %123, %125 : vector<16x64xf32>
    %127 = arith.addf %122, %126 : vector<16x64xf32>
    %c8_84 = arith.constant 8 : index
    %c5_85 = arith.constant 5 : index
    %128 = vector.load %arg7[%c8_84, %c5_85] : memref<25x80xf32, #tpu.memory_space<vmem>>, vector<16x64xf32>
    %c23 = arith.constant 23 : index
    %c0_86 = arith.constant 0 : index
    %129 = vector.load %arg2[%c23, %c0_86] : memref<63x64xf32, #tpu.memory_space<vmem>>, vector<1x64xf32>
    %130 = vector.broadcast %129 : vector<1x64xf32> to vector<16x64xf32>
    %131 = arith.mulf %128, %130 : vector<16x64xf32>
    %132 = arith.addf %127, %131 : vector<16x64xf32>
    %c8_87 = arith.constant 8 : index
    %c4_88 = arith.constant 4 : index
    %133 = vector.load %arg7[%c8_87, %c4_88] : memref<25x80xf32, #tpu.memory_space<vmem>>, vector<16x64xf32>
    %c24_89 = arith.constant 24 : index
    %c0_90 = arith.constant 0 : index
    %134 = vector.load %arg2[%c24_89, %c0_90] : memref<63x64xf32, #tpu.memory_space<vmem>>, vector<1x64xf32>
    %135 = vector.broadcast %134 : vector<1x64xf32> to vector<16x64xf32>
    %136 = arith.mulf %133, %135 : vector<16x64xf32>
    %137 = arith.addf %132, %136 : vector<16x64xf32>
    %c8_91 = arith.constant 8 : index
    %c3_92 = arith.constant 3 : index
    %138 = vector.load %arg7[%c8_91, %c3_92] : memref<25x80xf32, #tpu.memory_space<vmem>>, vector<16x64xf32>
    %c25 = arith.constant 25 : index
    %c0_93 = arith.constant 0 : index
    %139 = vector.load %arg2[%c25, %c0_93] : memref<63x64xf32, #tpu.memory_space<vmem>>, vector<1x64xf32>
    %140 = vector.broadcast %139 : vector<1x64xf32> to vector<16x64xf32>
    %141 = arith.mulf %138, %140 : vector<16x64xf32>
    %142 = arith.addf %137, %141 : vector<16x64xf32>
    %c8_94 = arith.constant 8 : index
    %c2_95 = arith.constant 2 : index
    %143 = vector.load %arg7[%c8_94, %c2_95] : memref<25x80xf32, #tpu.memory_space<vmem>>, vector<16x64xf32>
    %c26 = arith.constant 26 : index
    %c0_96 = arith.constant 0 : index
    %144 = vector.load %arg2[%c26, %c0_96] : memref<63x64xf32, #tpu.memory_space<vmem>>, vector<1x64xf32>
    %145 = vector.broadcast %144 : vector<1x64xf32> to vector<16x64xf32>
    %146 = arith.mulf %143, %145 : vector<16x64xf32>
    %147 = arith.addf %142, %146 : vector<16x64xf32>
    %c8_97 = arith.constant 8 : index
    %c1_98 = arith.constant 1 : index
    %148 = vector.load %arg7[%c8_97, %c1_98] : memref<25x80xf32, #tpu.memory_space<vmem>>, vector<16x64xf32>
    %c27 = arith.constant 27 : index
    %c0_99 = arith.constant 0 : index
    %149 = vector.load %arg2[%c27, %c0_99] : memref<63x64xf32, #tpu.memory_space<vmem>>, vector<1x64xf32>
    %150 = vector.broadcast %149 : vector<1x64xf32> to vector<16x64xf32>
    %151 = arith.mulf %148, %150 : vector<16x64xf32>
    %152 = arith.addf %147, %151 : vector<16x64xf32>
    %c8_100 = arith.constant 8 : index
    %c11_101 = arith.constant 11 : index
    %153 = vector.load %arg7[%c8_100, %c11_101] : memref<25x80xf32, #tpu.memory_space<vmem>>, vector<16x64xf32>
    %c28 = arith.constant 28 : index
    %c0_102 = arith.constant 0 : index
    %154 = vector.load %arg2[%c28, %c0_102] : memref<63x64xf32, #tpu.memory_space<vmem>>, vector<1x64xf32>
    %155 = vector.broadcast %154 : vector<1x64xf32> to vector<16x64xf32>
    %156 = arith.mulf %153, %155 : vector<16x64xf32>
    %157 = arith.addf %152, %156 : vector<16x64xf32>
    %c8_103 = arith.constant 8 : index
    %c10_104 = arith.constant 10 : index
    %158 = vector.load %arg7[%c8_103, %c10_104] : memref<25x80xf32, #tpu.memory_space<vmem>>, vector<16x64xf32>
    %c29 = arith.constant 29 : index
    %c0_105 = arith.constant 0 : index
    %159 = vector.load %arg2[%c29, %c0_105] : memref<63x64xf32, #tpu.memory_space<vmem>>, vector<1x64xf32>
    %160 = vector.broadcast %159 : vector<1x64xf32> to vector<16x64xf32>
    %161 = arith.mulf %158, %160 : vector<16x64xf32>
    %162 = arith.addf %157, %161 : vector<16x64xf32>
    %c8_106 = arith.constant 8 : index
    %c9_107 = arith.constant 9 : index
    %163 = vector.load %arg7[%c8_106, %c9_107] : memref<25x80xf32, #tpu.memory_space<vmem>>, vector<16x64xf32>
    %c30 = arith.constant 30 : index
    %c0_108 = arith.constant 0 : index
    %164 = vector.load %arg2[%c30, %c0_108] : memref<63x64xf32, #tpu.memory_space<vmem>>, vector<1x64xf32>
    %165 = vector.broadcast %164 : vector<1x64xf32> to vector<16x64xf32>
    %166 = arith.mulf %163, %165 : vector<16x64xf32>
    %167 = arith.addf %162, %166 : vector<16x64xf32>
    %c8_109 = arith.constant 8 : index
    %c8_110 = arith.constant 8 : index
    %168 = vector.load %arg7[%c8_109, %c8_110] : memref<25x80xf32, #tpu.memory_space<vmem>>, vector<16x64xf32>
    %c31 = arith.constant 31 : index
    %c0_111 = arith.constant 0 : index
    %169 = vector.load %arg2[%c31, %c0_111] : memref<63x64xf32, #tpu.memory_space<vmem>>, vector<1x64xf32>
    %170 = vector.broadcast %169 : vector<1x64xf32> to vector<16x64xf32>
    %171 = arith.mulf %168, %170 : vector<16x64xf32>
    %172 = arith.addf %167, %171 : vector<16x64xf32>
    %c8_112 = arith.constant 8 : index
    %c7_113 = arith.constant 7 : index
    %173 = vector.load %arg7[%c8_112, %c7_113] : memref<25x80xf32, #tpu.memory_space<vmem>>, vector<16x64xf32>
    %c32 = arith.constant 32 : index
    %c0_114 = arith.constant 0 : index
    %174 = vector.load %arg2[%c32, %c0_114] : memref<63x64xf32, #tpu.memory_space<vmem>>, vector<1x64xf32>
    %175 = vector.broadcast %174 : vector<1x64xf32> to vector<16x64xf32>
    %176 = arith.mulf %173, %175 : vector<16x64xf32>
    %177 = arith.addf %172, %176 : vector<16x64xf32>
    %c8_115 = arith.constant 8 : index
    %c6_116 = arith.constant 6 : index
    %178 = vector.load %arg7[%c8_115, %c6_116] : memref<25x80xf32, #tpu.memory_space<vmem>>, vector<16x64xf32>
    %c33 = arith.constant 33 : index
    %c0_117 = arith.constant 0 : index
    %179 = vector.load %arg2[%c33, %c0_117] : memref<63x64xf32, #tpu.memory_space<vmem>>, vector<1x64xf32>
    %180 = vector.broadcast %179 : vector<1x64xf32> to vector<16x64xf32>
    %181 = arith.mulf %178, %180 : vector<16x64xf32>
    %182 = arith.addf %177, %181 : vector<16x64xf32>
    %c8_118 = arith.constant 8 : index
    %c5_119 = arith.constant 5 : index
    %183 = vector.load %arg7[%c8_118, %c5_119] : memref<25x80xf32, #tpu.memory_space<vmem>>, vector<16x64xf32>
    %c34 = arith.constant 34 : index
    %c0_120 = arith.constant 0 : index
    %184 = vector.load %arg2[%c34, %c0_120] : memref<63x64xf32, #tpu.memory_space<vmem>>, vector<1x64xf32>
    %185 = vector.broadcast %184 : vector<1x64xf32> to vector<16x64xf32>
    %186 = arith.mulf %183, %185 : vector<16x64xf32>
    %187 = arith.addf %182, %186 : vector<16x64xf32>
    %c8_121 = arith.constant 8 : index
    %c15_122 = arith.constant 15 : index
    %188 = vector.load %arg7[%c8_121, %c15_122] : memref<25x80xf32, #tpu.memory_space<vmem>>, vector<16x64xf32>
    %c35 = arith.constant 35 : index
    %c0_123 = arith.constant 0 : index
    %189 = vector.load %arg2[%c35, %c0_123] : memref<63x64xf32, #tpu.memory_space<vmem>>, vector<1x64xf32>
    %190 = vector.broadcast %189 : vector<1x64xf32> to vector<16x64xf32>
    %191 = arith.mulf %188, %190 : vector<16x64xf32>
    %192 = arith.addf %187, %191 : vector<16x64xf32>
    %c8_124 = arith.constant 8 : index
    %c14_125 = arith.constant 14 : index
    %193 = vector.load %arg7[%c8_124, %c14_125] : memref<25x80xf32, #tpu.memory_space<vmem>>, vector<16x64xf32>
    %c36 = arith.constant 36 : index
    %c0_126 = arith.constant 0 : index
    %194 = vector.load %arg2[%c36, %c0_126] : memref<63x64xf32, #tpu.memory_space<vmem>>, vector<1x64xf32>
    %195 = vector.broadcast %194 : vector<1x64xf32> to vector<16x64xf32>
    %196 = arith.mulf %193, %195 : vector<16x64xf32>
    %197 = arith.addf %192, %196 : vector<16x64xf32>
    %c8_127 = arith.constant 8 : index
    %c13_128 = arith.constant 13 : index
    %198 = vector.load %arg7[%c8_127, %c13_128] : memref<25x80xf32, #tpu.memory_space<vmem>>, vector<16x64xf32>
    %c37 = arith.constant 37 : index
    %c0_129 = arith.constant 0 : index
    %199 = vector.load %arg2[%c37, %c0_129] : memref<63x64xf32, #tpu.memory_space<vmem>>, vector<1x64xf32>
    %200 = vector.broadcast %199 : vector<1x64xf32> to vector<16x64xf32>
    %201 = arith.mulf %198, %200 : vector<16x64xf32>
    %202 = arith.addf %197, %201 : vector<16x64xf32>
    %c8_130 = arith.constant 8 : index
    %c12_131 = arith.constant 12 : index
    %203 = vector.load %arg7[%c8_130, %c12_131] : memref<25x80xf32, #tpu.memory_space<vmem>>, vector<16x64xf32>
    %c38 = arith.constant 38 : index
    %c0_132 = arith.constant 0 : index
    %204 = vector.load %arg2[%c38, %c0_132] : memref<63x64xf32, #tpu.memory_space<vmem>>, vector<1x64xf32>
    %205 = vector.broadcast %204 : vector<1x64xf32> to vector<16x64xf32>
    %206 = arith.mulf %203, %205 : vector<16x64xf32>
    %207 = arith.addf %202, %206 : vector<16x64xf32>
    %c8_133 = arith.constant 8 : index
    %c11_134 = arith.constant 11 : index
    %208 = vector.load %arg7[%c8_133, %c11_134] : memref<25x80xf32, #tpu.memory_space<vmem>>, vector<16x64xf32>
    %c39 = arith.constant 39 : index
    %c0_135 = arith.constant 0 : index
    %209 = vector.load %arg2[%c39, %c0_135] : memref<63x64xf32, #tpu.memory_space<vmem>>, vector<1x64xf32>
    %210 = vector.broadcast %209 : vector<1x64xf32> to vector<16x64xf32>
    %211 = arith.mulf %208, %210 : vector<16x64xf32>
    %212 = arith.addf %207, %211 : vector<16x64xf32>
    %c8_136 = arith.constant 8 : index
    %c10_137 = arith.constant 10 : index
    %213 = vector.load %arg7[%c8_136, %c10_137] : memref<25x80xf32, #tpu.memory_space<vmem>>, vector<16x64xf32>
    %c40 = arith.constant 40 : index
    %c0_138 = arith.constant 0 : index
    %214 = vector.load %arg2[%c40, %c0_138] : memref<63x64xf32, #tpu.memory_space<vmem>>, vector<1x64xf32>
    %215 = vector.broadcast %214 : vector<1x64xf32> to vector<16x64xf32>
    %216 = arith.mulf %213, %215 : vector<16x64xf32>
    %217 = arith.addf %212, %216 : vector<16x64xf32>
    %c8_139 = arith.constant 8 : index
    %c9_140 = arith.constant 9 : index
    %218 = vector.load %arg7[%c8_139, %c9_140] : memref<25x80xf32, #tpu.memory_space<vmem>>, vector<16x64xf32>
    %c41 = arith.constant 41 : index
    %c0_141 = arith.constant 0 : index
    %219 = vector.load %arg2[%c41, %c0_141] : memref<63x64xf32, #tpu.memory_space<vmem>>, vector<1x64xf32>
    %220 = vector.broadcast %219 : vector<1x64xf32> to vector<16x64xf32>
    %221 = arith.mulf %218, %220 : vector<16x64xf32>
    %222 = arith.addf %217, %221 : vector<16x64xf32>
    %c9_142 = arith.constant 9 : index
    %c7_143 = arith.constant 7 : index
    %223 = vector.load %arg7[%c9_142, %c7_143] : memref<25x80xf32, #tpu.memory_space<vmem>>, vector<16x64xf32>
    %c42 = arith.constant 42 : index
    %c0_144 = arith.constant 0 : index
    %224 = vector.load %arg2[%c42, %c0_144] : memref<63x64xf32, #tpu.memory_space<vmem>>, vector<1x64xf32>
    %225 = vector.broadcast %224 : vector<1x64xf32> to vector<16x64xf32>
    %226 = arith.mulf %223, %225 : vector<16x64xf32>
    %227 = arith.addf %222, %226 : vector<16x64xf32>
    %c9_145 = arith.constant 9 : index
    %c6_146 = arith.constant 6 : index
    %228 = vector.load %arg7[%c9_145, %c6_146] : memref<25x80xf32, #tpu.memory_space<vmem>>, vector<16x64xf32>
    %c43 = arith.constant 43 : index
    %c0_147 = arith.constant 0 : index
    %229 = vector.load %arg2[%c43, %c0_147] : memref<63x64xf32, #tpu.memory_space<vmem>>, vector<1x64xf32>
    %230 = vector.broadcast %229 : vector<1x64xf32> to vector<16x64xf32>
    %231 = arith.mulf %228, %230 : vector<16x64xf32>
    %232 = arith.addf %227, %231 : vector<16x64xf32>
    %c9_148 = arith.constant 9 : index
    %c5_149 = arith.constant 5 : index
    %233 = vector.load %arg7[%c9_148, %c5_149] : memref<25x80xf32, #tpu.memory_space<vmem>>, vector<16x64xf32>
    %c44 = arith.constant 44 : index
    %c0_150 = arith.constant 0 : index
    %234 = vector.load %arg2[%c44, %c0_150] : memref<63x64xf32, #tpu.memory_space<vmem>>, vector<1x64xf32>
    %235 = vector.broadcast %234 : vector<1x64xf32> to vector<16x64xf32>
    %236 = arith.mulf %233, %235 : vector<16x64xf32>
    %237 = arith.addf %232, %236 : vector<16x64xf32>
    %c9_151 = arith.constant 9 : index
    %c4_152 = arith.constant 4 : index
    %238 = vector.load %arg7[%c9_151, %c4_152] : memref<25x80xf32, #tpu.memory_space<vmem>>, vector<16x64xf32>
    %c45 = arith.constant 45 : index
    %c0_153 = arith.constant 0 : index
    %239 = vector.load %arg2[%c45, %c0_153] : memref<63x64xf32, #tpu.memory_space<vmem>>, vector<1x64xf32>
    %240 = vector.broadcast %239 : vector<1x64xf32> to vector<16x64xf32>
    %241 = arith.mulf %238, %240 : vector<16x64xf32>
    %242 = arith.addf %237, %241 : vector<16x64xf32>
    %c9_154 = arith.constant 9 : index
    %c3_155 = arith.constant 3 : index
    %243 = vector.load %arg7[%c9_154, %c3_155] : memref<25x80xf32, #tpu.memory_space<vmem>>, vector<16x64xf32>
    %c46 = arith.constant 46 : index
    %c0_156 = arith.constant 0 : index
    %244 = vector.load %arg2[%c46, %c0_156] : memref<63x64xf32, #tpu.memory_space<vmem>>, vector<1x64xf32>
    %245 = vector.broadcast %244 : vector<1x64xf32> to vector<16x64xf32>
    %246 = arith.mulf %243, %245 : vector<16x64xf32>
    %247 = arith.addf %242, %246 : vector<16x64xf32>
    %c9_157 = arith.constant 9 : index
    %c2_158 = arith.constant 2 : index
    %248 = vector.load %arg7[%c9_157, %c2_158] : memref<25x80xf32, #tpu.memory_space<vmem>>, vector<16x64xf32>
    %c47 = arith.constant 47 : index
    %c0_159 = arith.constant 0 : index
    %249 = vector.load %arg2[%c47, %c0_159] : memref<63x64xf32, #tpu.memory_space<vmem>>, vector<1x64xf32>
    %250 = vector.broadcast %249 : vector<1x64xf32> to vector<16x64xf32>
    %251 = arith.mulf %248, %250 : vector<16x64xf32>
    %252 = arith.addf %247, %251 : vector<16x64xf32>
    %c9_160 = arith.constant 9 : index
    %c1_161 = arith.constant 1 : index
    %253 = vector.load %arg7[%c9_160, %c1_161] : memref<25x80xf32, #tpu.memory_space<vmem>>, vector<16x64xf32>
    %c48 = arith.constant 48 : index
    %c0_162 = arith.constant 0 : index
    %254 = vector.load %arg2[%c48, %c0_162] : memref<63x64xf32, #tpu.memory_space<vmem>>, vector<1x64xf32>
    %255 = vector.broadcast %254 : vector<1x64xf32> to vector<16x64xf32>
    %256 = arith.mulf %253, %255 : vector<16x64xf32>
    %257 = arith.addf %252, %256 : vector<16x64xf32>
    %c9_163 = arith.constant 9 : index
    %c11_164 = arith.constant 11 : index
    %258 = vector.load %arg7[%c9_163, %c11_164] : memref<25x80xf32, #tpu.memory_space<vmem>>, vector<16x64xf32>
    %c49 = arith.constant 49 : index
    %c0_165 = arith.constant 0 : index
    %259 = vector.load %arg2[%c49, %c0_165] : memref<63x64xf32, #tpu.memory_space<vmem>>, vector<1x64xf32>
    %260 = vector.broadcast %259 : vector<1x64xf32> to vector<16x64xf32>
    %261 = arith.mulf %258, %260 : vector<16x64xf32>
    %262 = arith.addf %257, %261 : vector<16x64xf32>
    %c9_166 = arith.constant 9 : index
    %c10_167 = arith.constant 10 : index
    %263 = vector.load %arg7[%c9_166, %c10_167] : memref<25x80xf32, #tpu.memory_space<vmem>>, vector<16x64xf32>
    %c50 = arith.constant 50 : index
    %c0_168 = arith.constant 0 : index
    %264 = vector.load %arg2[%c50, %c0_168] : memref<63x64xf32, #tpu.memory_space<vmem>>, vector<1x64xf32>
    %265 = vector.broadcast %264 : vector<1x64xf32> to vector<16x64xf32>
    %266 = arith.mulf %263, %265 : vector<16x64xf32>
    %267 = arith.addf %262, %266 : vector<16x64xf32>
    %c9_169 = arith.constant 9 : index
    %c9_170 = arith.constant 9 : index
    %268 = vector.load %arg7[%c9_169, %c9_170] : memref<25x80xf32, #tpu.memory_space<vmem>>, vector<16x64xf32>
    %c51 = arith.constant 51 : index
    %c0_171 = arith.constant 0 : index
    %269 = vector.load %arg2[%c51, %c0_171] : memref<63x64xf32, #tpu.memory_space<vmem>>, vector<1x64xf32>
    %270 = vector.broadcast %269 : vector<1x64xf32> to vector<16x64xf32>
    %271 = arith.mulf %268, %270 : vector<16x64xf32>
    %272 = arith.addf %267, %271 : vector<16x64xf32>
    %c9_172 = arith.constant 9 : index
    %c8_173 = arith.constant 8 : index
    %273 = vector.load %arg7[%c9_172, %c8_173] : memref<25x80xf32, #tpu.memory_space<vmem>>, vector<16x64xf32>
    %c52 = arith.constant 52 : index
    %c0_174 = arith.constant 0 : index
    %274 = vector.load %arg2[%c52, %c0_174] : memref<63x64xf32, #tpu.memory_space<vmem>>, vector<1x64xf32>
    %275 = vector.broadcast %274 : vector<1x64xf32> to vector<16x64xf32>
    %276 = arith.mulf %273, %275 : vector<16x64xf32>
    %277 = arith.addf %272, %276 : vector<16x64xf32>
    %c9_175 = arith.constant 9 : index
    %c7_176 = arith.constant 7 : index
    %278 = vector.load %arg7[%c9_175, %c7_176] : memref<25x80xf32, #tpu.memory_space<vmem>>, vector<16x64xf32>
    %c53 = arith.constant 53 : index
    %c0_177 = arith.constant 0 : index
    %279 = vector.load %arg2[%c53, %c0_177] : memref<63x64xf32, #tpu.memory_space<vmem>>, vector<1x64xf32>
    %280 = vector.broadcast %279 : vector<1x64xf32> to vector<16x64xf32>
    %281 = arith.mulf %278, %280 : vector<16x64xf32>
    %282 = arith.addf %277, %281 : vector<16x64xf32>
    %c9_178 = arith.constant 9 : index
    %c6_179 = arith.constant 6 : index
    %283 = vector.load %arg7[%c9_178, %c6_179] : memref<25x80xf32, #tpu.memory_space<vmem>>, vector<16x64xf32>
    %c54 = arith.constant 54 : index
    %c0_180 = arith.constant 0 : index
    %284 = vector.load %arg2[%c54, %c0_180] : memref<63x64xf32, #tpu.memory_space<vmem>>, vector<1x64xf32>
    %285 = vector.broadcast %284 : vector<1x64xf32> to vector<16x64xf32>
    %286 = arith.mulf %283, %285 : vector<16x64xf32>
    %287 = arith.addf %282, %286 : vector<16x64xf32>
    %c9_181 = arith.constant 9 : index
    %c5_182 = arith.constant 5 : index
    %288 = vector.load %arg7[%c9_181, %c5_182] : memref<25x80xf32, #tpu.memory_space<vmem>>, vector<16x64xf32>
    %c55 = arith.constant 55 : index
    %c0_183 = arith.constant 0 : index
    %289 = vector.load %arg2[%c55, %c0_183] : memref<63x64xf32, #tpu.memory_space<vmem>>, vector<1x64xf32>
    %290 = vector.broadcast %289 : vector<1x64xf32> to vector<16x64xf32>
    %291 = arith.mulf %288, %290 : vector<16x64xf32>
    %292 = arith.addf %287, %291 : vector<16x64xf32>
    %c9_184 = arith.constant 9 : index
    %c15_185 = arith.constant 15 : index
    %293 = vector.load %arg7[%c9_184, %c15_185] : memref<25x80xf32, #tpu.memory_space<vmem>>, vector<16x64xf32>
    %c56 = arith.constant 56 : index
    %c0_186 = arith.constant 0 : index
    %294 = vector.load %arg2[%c56, %c0_186] : memref<63x64xf32, #tpu.memory_space<vmem>>, vector<1x64xf32>
    %295 = vector.broadcast %294 : vector<1x64xf32> to vector<16x64xf32>
    %296 = arith.mulf %293, %295 : vector<16x64xf32>
    %297 = arith.addf %292, %296 : vector<16x64xf32>
    %c9_187 = arith.constant 9 : index
    %c14_188 = arith.constant 14 : index
    %298 = vector.load %arg7[%c9_187, %c14_188] : memref<25x80xf32, #tpu.memory_space<vmem>>, vector<16x64xf32>
    %c57 = arith.constant 57 : index
    %c0_189 = arith.constant 0 : index
    %299 = vector.load %arg2[%c57, %c0_189] : memref<63x64xf32, #tpu.memory_space<vmem>>, vector<1x64xf32>
    %300 = vector.broadcast %299 : vector<1x64xf32> to vector<16x64xf32>
    %301 = arith.mulf %298, %300 : vector<16x64xf32>
    %302 = arith.addf %297, %301 : vector<16x64xf32>
    %c9_190 = arith.constant 9 : index
    %c13_191 = arith.constant 13 : index
    %303 = vector.load %arg7[%c9_190, %c13_191] : memref<25x80xf32, #tpu.memory_space<vmem>>, vector<16x64xf32>
    %c58 = arith.constant 58 : index
    %c0_192 = arith.constant 0 : index
    %304 = vector.load %arg2[%c58, %c0_192] : memref<63x64xf32, #tpu.memory_space<vmem>>, vector<1x64xf32>
    %305 = vector.broadcast %304 : vector<1x64xf32> to vector<16x64xf32>
    %306 = arith.mulf %303, %305 : vector<16x64xf32>
    %307 = arith.addf %302, %306 : vector<16x64xf32>
    %c9_193 = arith.constant 9 : index
    %c12_194 = arith.constant 12 : index
    %308 = vector.load %arg7[%c9_193, %c12_194] : memref<25x80xf32, #tpu.memory_space<vmem>>, vector<16x64xf32>
    %c59 = arith.constant 59 : index
    %c0_195 = arith.constant 0 : index
    %309 = vector.load %arg2[%c59, %c0_195] : memref<63x64xf32, #tpu.memory_space<vmem>>, vector<1x64xf32>
    %310 = vector.broadcast %309 : vector<1x64xf32> to vector<16x64xf32>
    %311 = arith.mulf %308, %310 : vector<16x64xf32>
    %312 = arith.addf %307, %311 : vector<16x64xf32>
    %c9_196 = arith.constant 9 : index
    %c11_197 = arith.constant 11 : index
    %313 = vector.load %arg7[%c9_196, %c11_197] : memref<25x80xf32, #tpu.memory_space<vmem>>, vector<16x64xf32>
    %c60 = arith.constant 60 : index
    %c0_198 = arith.constant 0 : index
    %314 = vector.load %arg2[%c60, %c0_198] : memref<63x64xf32, #tpu.memory_space<vmem>>, vector<1x64xf32>
    %315 = vector.broadcast %314 : vector<1x64xf32> to vector<16x64xf32>
    %316 = arith.mulf %313, %315 : vector<16x64xf32>
    %317 = arith.addf %312, %316 : vector<16x64xf32>
    %c9_199 = arith.constant 9 : index
    %c10_200 = arith.constant 10 : index
    %318 = vector.load %arg7[%c9_199, %c10_200] : memref<25x80xf32, #tpu.memory_space<vmem>>, vector<16x64xf32>
    %c61 = arith.constant 61 : index
    %c0_201 = arith.constant 0 : index
    %319 = vector.load %arg2[%c61, %c0_201] : memref<63x64xf32, #tpu.memory_space<vmem>>, vector<1x64xf32>
    %320 = vector.broadcast %319 : vector<1x64xf32> to vector<16x64xf32>
    %321 = arith.mulf %318, %320 : vector<16x64xf32>
    %322 = arith.addf %317, %321 : vector<16x64xf32>
    %c9_202 = arith.constant 9 : index
    %c9_203 = arith.constant 9 : index
    %323 = vector.load %arg7[%c9_202, %c9_203] : memref<25x80xf32, #tpu.memory_space<vmem>>, vector<16x64xf32>
    %c62 = arith.constant 62 : index
    %c0_204 = arith.constant 0 : index
    %324 = vector.load %arg2[%c62, %c0_204] : memref<63x64xf32, #tpu.memory_space<vmem>>, vector<1x64xf32>
    %325 = vector.broadcast %324 : vector<1x64xf32> to vector<16x64xf32>
    %326 = arith.mulf %323, %325 : vector<16x64xf32>
    %327 = arith.addf %322, %326 : vector<16x64xf32>
    %c8_205 = arith.constant 8 : index
    %c8_206 = arith.constant 8 : index
    %328 = vector.load %arg7[%c8_205, %c8_206] : memref<25x80xf32, #tpu.memory_space<vmem>>, vector<16x64xf32>
    %cst_207 = arith.constant 0.000000e+00 : f32
    %329 = vector.broadcast %cst_207 : f32 to vector<16x64xf32>
    %330 = arith.maximumf %327, %329 : vector<16x64xf32>
    %331 = arith.addf %328, %330 : vector<16x64xf32>
    %c8_208 = arith.constant 8 : index
    %c8_209 = arith.constant 8 : index
    %332 = vector.load %arg7[%c8_208, %c8_209] : memref<25x80xf32, #tpu.memory_space<vmem>>, vector<16x64xf32>
    tpu.vector_store %arg7[%c8_208, %c8_209], %331 {strides = array<i32>} : memref<25x80xf32, #tpu.memory_space<vmem>>, vector<16x64xf32>,
    %c8_210 = arith.constant 8 : index
    %c8_211 = arith.constant 8 : index
    %333 = vector.load %arg7[%c8_210, %c8_211] : memref<25x80xf32, #tpu.memory_space<vmem>>, vector<16x64xf32>
    %c0_212 = arith.constant 0 : index
    %c0_213 = arith.constant 0 : index
    %334 = vector.load %arg5[%c0_212, %c0_213] : memref<4x64xf32, #tpu.memory_space<vmem>>, vector<1x64xf32>
    %335 = vector.shape_cast %334 : vector<1x64xf32> to vector<1x64xf32>
    %336 = vector.broadcast %335 : vector<1x64xf32> to vector<16x64xf32>
    %c7_214 = arith.constant 7 : index
    %c4_215 = arith.constant 4 : index
    %337 = vector.load %arg7[%c7_214, %c4_215] : memref<25x80xf32, #tpu.memory_space<vmem>>, vector<16x64xf32>
    %c0_216 = arith.constant 0 : index
    %c0_217 = arith.constant 0 : index
    %338 = vector.load %arg4[%c0_216, %c0_217] : memref<36x64xf32, #tpu.memory_space<vmem>>, vector<1x64xf32>
    %339 = vector.broadcast %338 : vector<1x64xf32> to vector<16x64xf32>
    %340 = arith.mulf %337, %339 : vector<16x64xf32>
    %341 = arith.addf %336, %340 : vector<16x64xf32>
    %c7_218 = arith.constant 7 : index
    %c8_219 = arith.constant 8 : index
    %342 = vector.load %arg7[%c7_218, %c8_219] : memref<25x80xf32, #tpu.memory_space<vmem>>, vector<16x64xf32>
    %c1_220 = arith.constant 1 : index
    %c0_221 = arith.constant 0 : index
    %343 = vector.load %arg4[%c1_220, %c0_221] : memref<36x64xf32, #tpu.memory_space<vmem>>, vector<1x64xf32>
    %344 = vector.broadcast %343 : vector<1x64xf32> to vector<16x64xf32>
    %345 = arith.mulf %342, %344 : vector<16x64xf32>
    %346 = arith.addf %341, %345 : vector<16x64xf32>
    %c7_222 = arith.constant 7 : index
    %c12_223 = arith.constant 12 : index
    %347 = vector.load %arg7[%c7_222, %c12_223] : memref<25x80xf32, #tpu.memory_space<vmem>>, vector<16x64xf32>
    %c2_224 = arith.constant 2 : index
    %c0_225 = arith.constant 0 : index
    %348 = vector.load %arg4[%c2_224, %c0_225] : memref<36x64xf32, #tpu.memory_space<vmem>>, vector<1x64xf32>
    %349 = vector.broadcast %348 : vector<1x64xf32> to vector<16x64xf32>
    %350 = arith.mulf %347, %349 : vector<16x64xf32>
    %351 = arith.addf %346, %350 : vector<16x64xf32>
    %c8_226 = arith.constant 8 : index
    %c4_227 = arith.constant 4 : index
    %352 = vector.load %arg7[%c8_226, %c4_227] : memref<25x80xf32, #tpu.memory_space<vmem>>, vector<16x64xf32>
    %c3_228 = arith.constant 3 : index
    %c0_229 = arith.constant 0 : index
    %353 = vector.load %arg4[%c3_228, %c0_229] : memref<36x64xf32, #tpu.memory_space<vmem>>, vector<1x64xf32>
    %354 = vector.broadcast %353 : vector<1x64xf32> to vector<16x64xf32>
    %355 = arith.mulf %352, %354 : vector<16x64xf32>
    %356 = arith.addf %351, %355 : vector<16x64xf32>
    %c8_230 = arith.constant 8 : index
    %c8_231 = arith.constant 8 : index
    %357 = vector.load %arg7[%c8_230, %c8_231] : memref<25x80xf32, #tpu.memory_space<vmem>>, vector<16x64xf32>
    %c4_232 = arith.constant 4 : index
    %c0_233 = arith.constant 0 : index
    %358 = vector.load %arg4[%c4_232, %c0_233] : memref<36x64xf32, #tpu.memory_space<vmem>>, vector<1x64xf32>
    %359 = vector.broadcast %358 : vector<1x64xf32> to vector<16x64xf32>
    %360 = arith.mulf %357, %359 : vector<16x64xf32>
    %361 = arith.addf %356, %360 : vector<16x64xf32>
    %c8_234 = arith.constant 8 : index
    %c12_235 = arith.constant 12 : index
    %362 = vector.load %arg7[%c8_234, %c12_235] : memref<25x80xf32, #tpu.memory_space<vmem>>, vector<16x64xf32>
    %c5_236 = arith.constant 5 : index
    %c0_237 = arith.constant 0 : index
    %363 = vector.load %arg4[%c5_236, %c0_237] : memref<36x64xf32, #tpu.memory_space<vmem>>, vector<1x64xf32>
    %364 = vector.broadcast %363 : vector<1x64xf32> to vector<16x64xf32>
    %365 = arith.mulf %362, %364 : vector<16x64xf32>
    %366 = arith.addf %361, %365 : vector<16x64xf32>
    %c9_238 = arith.constant 9 : index
    %c4_239 = arith.constant 4 : index
    %367 = vector.load %arg7[%c9_238, %c4_239] : memref<25x80xf32, #tpu.memory_space<vmem>>, vector<16x64xf32>
    %c6_240 = arith.constant 6 : index
    %c0_241 = arith.constant 0 : index
    %368 = vector.load %arg4[%c6_240, %c0_241] : memref<36x64xf32, #tpu.memory_space<vmem>>, vector<1x64xf32>
    %369 = vector.broadcast %368 : vector<1x64xf32> to vector<16x64xf32>
    %370 = arith.mulf %367, %369 : vector<16x64xf32>
    %371 = arith.addf %366, %370 : vector<16x64xf32>
    %c9_242 = arith.constant 9 : index
    %c8_243 = arith.constant 8 : index
    %372 = vector.load %arg7[%c9_242, %c8_243] : memref<25x80xf32, #tpu.memory_space<vmem>>, vector<16x64xf32>
    %c7_244 = arith.constant 7 : index
    %c0_245 = arith.constant 0 : index
    %373 = vector.load %arg4[%c7_244, %c0_245] : memref<36x64xf32, #tpu.memory_space<vmem>>, vector<1x64xf32>
    %374 = vector.broadcast %373 : vector<1x64xf32> to vector<16x64xf32>
    %375 = arith.mulf %372, %374 : vector<16x64xf32>
    %376 = arith.addf %371, %375 : vector<16x64xf32>
    %c9_246 = arith.constant 9 : index
    %c12_247 = arith.constant 12 : index
    %377 = vector.load %arg7[%c9_246, %c12_247] : memref<25x80xf32, #tpu.memory_space<vmem>>, vector<16x64xf32>
    %c8_248 = arith.constant 8 : index
    %c0_249 = arith.constant 0 : index
    %378 = vector.load %arg4[%c8_248, %c0_249] : memref<36x64xf32, #tpu.memory_space<vmem>>, vector<1x64xf32>
    %379 = vector.broadcast %378 : vector<1x64xf32> to vector<16x64xf32>
    %380 = arith.mulf %377, %379 : vector<16x64xf32>
    %381 = arith.addf %376, %380 : vector<16x64xf32>
    %cst_250 = arith.constant 0.000000e+00 : f32
    %382 = vector.broadcast %cst_250 : f32 to vector<16x64xf32>
    %383 = arith.maximumf %381, %382 : vector<16x64xf32>
    %384 = arith.addf %333, %383 : vector<16x64xf32>
    %c8_251 = arith.constant 8 : index
    %c8_252 = arith.constant 8 : index
    %385 = vector.load %arg7[%c8_251, %c8_252] : memref<25x80xf32, #tpu.memory_space<vmem>>, vector<16x64xf32>
    tpu.vector_store %arg7[%c8_251, %c8_252], %384 {strides = array<i32>} : memref<25x80xf32, #tpu.memory_space<vmem>>, vector<16x64xf32>,
    %c8_253 = arith.constant 8 : index
    %c8_254 = arith.constant 8 : index
    %386 = vector.load %arg7[%c8_253, %c8_254] : memref<25x80xf32, #tpu.memory_space<vmem>>, vector<16x64xf32>
    %c1_255 = arith.constant 1 : index
    %c0_256 = arith.constant 0 : index
    %387 = vector.load %arg5[%c1_255, %c0_256] : memref<4x64xf32, #tpu.memory_space<vmem>>, vector<1x64xf32>
    %388 = vector.shape_cast %387 : vector<1x64xf32> to vector<1x64xf32>
    %389 = vector.broadcast %388 : vector<1x64xf32> to vector<16x64xf32>
    %c7_257 = arith.constant 7 : index
    %c4_258 = arith.constant 4 : index
    %390 = vector.load %arg7[%c7_257, %c4_258] : memref<25x80xf32, #tpu.memory_space<vmem>>, vector<16x64xf32>
    %c9_259 = arith.constant 9 : index
    %c0_260 = arith.constant 0 : index
    %391 = vector.load %arg4[%c9_259, %c0_260] : memref<36x64xf32, #tpu.memory_space<vmem>>, vector<1x64xf32>
    %392 = vector.broadcast %391 : vector<1x64xf32> to vector<16x64xf32>
    %393 = arith.mulf %390, %392 : vector<16x64xf32>
    %394 = arith.addf %389, %393 : vector<16x64xf32>
    %c7_261 = arith.constant 7 : index
    %c8_262 = arith.constant 8 : index
    %395 = vector.load %arg7[%c7_261, %c8_262] : memref<25x80xf32, #tpu.memory_space<vmem>>, vector<16x64xf32>
    %c10_263 = arith.constant 10 : index
    %c0_264 = arith.constant 0 : index
    %396 = vector.load %arg4[%c10_263, %c0_264] : memref<36x64xf32, #tpu.memory_space<vmem>>, vector<1x64xf32>
    %397 = vector.broadcast %396 : vector<1x64xf32> to vector<16x64xf32>
    %398 = arith.mulf %395, %397 : vector<16x64xf32>
    %399 = arith.addf %394, %398 : vector<16x64xf32>
    %c7_265 = arith.constant 7 : index
    %c12_266 = arith.constant 12 : index
    %400 = vector.load %arg7[%c7_265, %c12_266] : memref<25x80xf32, #tpu.memory_space<vmem>>, vector<16x64xf32>
    %c11_267 = arith.constant 11 : index
    %c0_268 = arith.constant 0 : index
    %401 = vector.load %arg4[%c11_267, %c0_268] : memref<36x64xf32, #tpu.memory_space<vmem>>, vector<1x64xf32>
    %402 = vector.broadcast %401 : vector<1x64xf32> to vector<16x64xf32>
    %403 = arith.mulf %400, %402 : vector<16x64xf32>
    %404 = arith.addf %399, %403 : vector<16x64xf32>
    %c8_269 = arith.constant 8 : index
    %c4_270 = arith.constant 4 : index
    %405 = vector.load %arg7[%c8_269, %c4_270] : memref<25x80xf32, #tpu.memory_space<vmem>>, vector<16x64xf32>
    %c12_271 = arith.constant 12 : index
    %c0_272 = arith.constant 0 : index
    %406 = vector.load %arg4[%c12_271, %c0_272] : memref<36x64xf32, #tpu.memory_space<vmem>>, vector<1x64xf32>
    %407 = vector.broadcast %406 : vector<1x64xf32> to vector<16x64xf32>
    %408 = arith.mulf %405, %407 : vector<16x64xf32>
    %409 = arith.addf %404, %408 : vector<16x64xf32>
    %c8_273 = arith.constant 8 : index
    %c8_274 = arith.constant 8 : index
    %410 = vector.load %arg7[%c8_273, %c8_274] : memref<25x80xf32, #tpu.memory_space<vmem>>, vector<16x64xf32>
    %c13_275 = arith.constant 13 : index
    %c0_276 = arith.constant 0 : index
    %411 = vector.load %arg4[%c13_275, %c0_276] : memref<36x64xf32, #tpu.memory_space<vmem>>, vector<1x64xf32>
    %412 = vector.broadcast %411 : vector<1x64xf32> to vector<16x64xf32>
    %413 = arith.mulf %410, %412 : vector<16x64xf32>
    %414 = arith.addf %409, %413 : vector<16x64xf32>
    %c8_277 = arith.constant 8 : index
    %c12_278 = arith.constant 12 : index
    %415 = vector.load %arg7[%c8_277, %c12_278] : memref<25x80xf32, #tpu.memory_space<vmem>>, vector<16x64xf32>
    %c14_279 = arith.constant 14 : index
    %c0_280 = arith.constant 0 : index
    %416 = vector.load %arg4[%c14_279, %c0_280] : memref<36x64xf32, #tpu.memory_space<vmem>>, vector<1x64xf32>
    %417 = vector.broadcast %416 : vector<1x64xf32> to vector<16x64xf32>
    %418 = arith.mulf %415, %417 : vector<16x64xf32>
    %419 = arith.addf %414, %418 : vector<16x64xf32>
    %c9_281 = arith.constant 9 : index
    %c4_282 = arith.constant 4 : index
    %420 = vector.load %arg7[%c9_281, %c4_282] : memref<25x80xf32, #tpu.memory_space<vmem>>, vector<16x64xf32>
    %c15_283 = arith.constant 15 : index
    %c0_284 = arith.constant 0 : index
    %421 = vector.load %arg4[%c15_283, %c0_284] : memref<36x64xf32, #tpu.memory_space<vmem>>, vector<1x64xf32>
    %422 = vector.broadcast %421 : vector<1x64xf32> to vector<16x64xf32>
    %423 = arith.mulf %420, %422 : vector<16x64xf32>
    %424 = arith.addf %419, %423 : vector<16x64xf32>
    %c9_285 = arith.constant 9 : index
    %c8_286 = arith.constant 8 : index
    %425 = vector.load %arg7[%c9_285, %c8_286] : memref<25x80xf32, #tpu.memory_space<vmem>>, vector<16x64xf32>
    %c16_287 = arith.constant 16 : index
    %c0_288 = arith.constant 0 : index
    %426 = vector.load %arg4[%c16_287, %c0_288] : memref<36x64xf32, #tpu.memory_space<vmem>>, vector<1x64xf32>
    %427 = vector.broadcast %426 : vector<1x64xf32> to vector<16x64xf32>
    %428 = arith.mulf %425, %427 : vector<16x64xf32>
    %429 = arith.addf %424, %428 : vector<16x64xf32>
    %c9_289 = arith.constant 9 : index
    %c12_290 = arith.constant 12 : index
    %430 = vector.load %arg7[%c9_289, %c12_290] : memref<25x80xf32, #tpu.memory_space<vmem>>, vector<16x64xf32>
    %c17_291 = arith.constant 17 : index
    %c0_292 = arith.constant 0 : index
    %431 = vector.load %arg4[%c17_291, %c0_292] : memref<36x64xf32, #tpu.memory_space<vmem>>, vector<1x64xf32>
    %432 = vector.broadcast %431 : vector<1x64xf32> to vector<16x64xf32>
    %433 = arith.mulf %430, %432 : vector<16x64xf32>
    %434 = arith.addf %429, %433 : vector<16x64xf32>
    %cst_293 = arith.constant 0.000000e+00 : f32
    %435 = vector.broadcast %cst_293 : f32 to vector<16x64xf32>
    %436 = arith.maximumf %434, %435 : vector<16x64xf32>
    %437 = arith.addf %386, %436 : vector<16x64xf32>
    %c8_294 = arith.constant 8 : index
    %c8_295 = arith.constant 8 : index
    %438 = vector.load %arg7[%c8_294, %c8_295] : memref<25x80xf32, #tpu.memory_space<vmem>>, vector<16x64xf32>
    tpu.vector_store %arg7[%c8_294, %c8_295], %437 {strides = array<i32>} : memref<25x80xf32, #tpu.memory_space<vmem>>, vector<16x64xf32>,
    %c8_296 = arith.constant 8 : index
    %c8_297 = arith.constant 8 : index
    %439 = vector.load %arg7[%c8_296, %c8_297] : memref<25x80xf32, #tpu.memory_space<vmem>>, vector<16x64xf32>
    %c2_298 = arith.constant 2 : index
    %c0_299 = arith.constant 0 : index
    %440 = vector.load %arg5[%c2_298, %c0_299] : memref<4x64xf32, #tpu.memory_space<vmem>>, vector<1x64xf32>
    %441 = vector.shape_cast %440 : vector<1x64xf32> to vector<1x64xf32>
    %442 = vector.broadcast %441 : vector<1x64xf32> to vector<16x64xf32>
    %c7_300 = arith.constant 7 : index
    %c4_301 = arith.constant 4 : index
    %443 = vector.load %arg7[%c7_300, %c4_301] : memref<25x80xf32, #tpu.memory_space<vmem>>, vector<16x64xf32>
    %c18_302 = arith.constant 18 : index
    %c0_303 = arith.constant 0 : index
    %444 = vector.load %arg4[%c18_302, %c0_303] : memref<36x64xf32, #tpu.memory_space<vmem>>, vector<1x64xf32>
    %445 = vector.broadcast %444 : vector<1x64xf32> to vector<16x64xf32>
    %446 = arith.mulf %443, %445 : vector<16x64xf32>
    %447 = arith.addf %442, %446 : vector<16x64xf32>
    %c7_304 = arith.constant 7 : index
    %c8_305 = arith.constant 8 : index
    %448 = vector.load %arg7[%c7_304, %c8_305] : memref<25x80xf32, #tpu.memory_space<vmem>>, vector<16x64xf32>
    %c19_306 = arith.constant 19 : index
    %c0_307 = arith.constant 0 : index
    %449 = vector.load %arg4[%c19_306, %c0_307] : memref<36x64xf32, #tpu.memory_space<vmem>>, vector<1x64xf32>
    %450 = vector.broadcast %449 : vector<1x64xf32> to vector<16x64xf32>
    %451 = arith.mulf %448, %450 : vector<16x64xf32>
    %452 = arith.addf %447, %451 : vector<16x64xf32>
    %c7_308 = arith.constant 7 : index
    %c12_309 = arith.constant 12 : index
    %453 = vector.load %arg7[%c7_308, %c12_309] : memref<25x80xf32, #tpu.memory_space<vmem>>, vector<16x64xf32>
    %c20_310 = arith.constant 20 : index
    %c0_311 = arith.constant 0 : index
    %454 = vector.load %arg4[%c20_310, %c0_311] : memref<36x64xf32, #tpu.memory_space<vmem>>, vector<1x64xf32>
    %455 = vector.broadcast %454 : vector<1x64xf32> to vector<16x64xf32>
    %456 = arith.mulf %453, %455 : vector<16x64xf32>
    %457 = arith.addf %452, %456 : vector<16x64xf32>
    %c8_312 = arith.constant 8 : index
    %c4_313 = arith.constant 4 : index
    %458 = vector.load %arg7[%c8_312, %c4_313] : memref<25x80xf32, #tpu.memory_space<vmem>>, vector<16x64xf32>
    %c21_314 = arith.constant 21 : index
    %c0_315 = arith.constant 0 : index
    %459 = vector.load %arg4[%c21_314, %c0_315] : memref<36x64xf32, #tpu.memory_space<vmem>>, vector<1x64xf32>
    %460 = vector.broadcast %459 : vector<1x64xf32> to vector<16x64xf32>
    %461 = arith.mulf %458, %460 : vector<16x64xf32>
    %462 = arith.addf %457, %461 : vector<16x64xf32>
    %c8_316 = arith.constant 8 : index
    %c8_317 = arith.constant 8 : index
    %463 = vector.load %arg7[%c8_316, %c8_317] : memref<25x80xf32, #tpu.memory_space<vmem>>, vector<16x64xf32>
    %c22_318 = arith.constant 22 : index
    %c0_319 = arith.constant 0 : index
    %464 = vector.load %arg4[%c22_318, %c0_319] : memref<36x64xf32, #tpu.memory_space<vmem>>, vector<1x64xf32>
    %465 = vector.broadcast %464 : vector<1x64xf32> to vector<16x64xf32>
    %466 = arith.mulf %463, %465 : vector<16x64xf32>
    %467 = arith.addf %462, %466 : vector<16x64xf32>
    %c8_320 = arith.constant 8 : index
    %c12_321 = arith.constant 12 : index
    %468 = vector.load %arg7[%c8_320, %c12_321] : memref<25x80xf32, #tpu.memory_space<vmem>>, vector<16x64xf32>
    %c23_322 = arith.constant 23 : index
    %c0_323 = arith.constant 0 : index
    %469 = vector.load %arg4[%c23_322, %c0_323] : memref<36x64xf32, #tpu.memory_space<vmem>>, vector<1x64xf32>
    %470 = vector.broadcast %469 : vector<1x64xf32> to vector<16x64xf32>
    %471 = arith.mulf %468, %470 : vector<16x64xf32>
    %472 = arith.addf %467, %471 : vector<16x64xf32>
    %c9_324 = arith.constant 9 : index
    %c4_325 = arith.constant 4 : index
    %473 = vector.load %arg7[%c9_324, %c4_325] : memref<25x80xf32, #tpu.memory_space<vmem>>, vector<16x64xf32>
    %c24_326 = arith.constant 24 : index
    %c0_327 = arith.constant 0 : index
    %474 = vector.load %arg4[%c24_326, %c0_327] : memref<36x64xf32, #tpu.memory_space<vmem>>, vector<1x64xf32>
    %475 = vector.broadcast %474 : vector<1x64xf32> to vector<16x64xf32>
    %476 = arith.mulf %473, %475 : vector<16x64xf32>
    %477 = arith.addf %472, %476 : vector<16x64xf32>
    %c9_328 = arith.constant 9 : index
    %c8_329 = arith.constant 8 : index
    %478 = vector.load %arg7[%c9_328, %c8_329] : memref<25x80xf32, #tpu.memory_space<vmem>>, vector<16x64xf32>
    %c25_330 = arith.constant 25 : index
    %c0_331 = arith.constant 0 : index
    %479 = vector.load %arg4[%c25_330, %c0_331] : memref<36x64xf32, #tpu.memory_space<vmem>>, vector<1x64xf32>
    %480 = vector.broadcast %479 : vector<1x64xf32> to vector<16x64xf32>
    %481 = arith.mulf %478, %480 : vector<16x64xf32>
    %482 = arith.addf %477, %481 : vector<16x64xf32>
    %c9_332 = arith.constant 9 : index
    %c12_333 = arith.constant 12 : index
    %483 = vector.load %arg7[%c9_332, %c12_333] : memref<25x80xf32, #tpu.memory_space<vmem>>, vector<16x64xf32>
    %c26_334 = arith.constant 26 : index
    %c0_335 = arith.constant 0 : index
    %484 = vector.load %arg4[%c26_334, %c0_335] : memref<36x64xf32, #tpu.memory_space<vmem>>, vector<1x64xf32>
    %485 = vector.broadcast %484 : vector<1x64xf32> to vector<16x64xf32>
    %486 = arith.mulf %483, %485 : vector<16x64xf32>
    %487 = arith.addf %482, %486 : vector<16x64xf32>
    %cst_336 = arith.constant 0.000000e+00 : f32
    %488 = vector.broadcast %cst_336 : f32 to vector<16x64xf32>
    %489 = arith.maximumf %487, %488 : vector<16x64xf32>
    %490 = arith.addf %439, %489 : vector<16x64xf32>
    %c8_337 = arith.constant 8 : index
    %c8_338 = arith.constant 8 : index
    %491 = vector.load %arg7[%c8_337, %c8_338] : memref<25x80xf32, #tpu.memory_space<vmem>>, vector<16x64xf32>
    tpu.vector_store %arg7[%c8_337, %c8_338], %490 {strides = array<i32>} : memref<25x80xf32, #tpu.memory_space<vmem>>, vector<16x64xf32>,
    %c3_339 = arith.constant 3 : index
    %c0_340 = arith.constant 0 : index
    %492 = vector.load %arg5[%c3_339, %c0_340] : memref<4x64xf32, #tpu.memory_space<vmem>>, vector<1x64xf32>
    %493 = vector.shape_cast %492 : vector<1x64xf32> to vector<1x64xf32>
    %494 = vector.broadcast %493 : vector<1x64xf32> to vector<16x64xf32>
    %c7_341 = arith.constant 7 : index
    %c4_342 = arith.constant 4 : index
    %495 = vector.load %arg7[%c7_341, %c4_342] : memref<25x80xf32, #tpu.memory_space<vmem>>, vector<16x64xf32>
    %c27_343 = arith.constant 27 : index
    %c0_344 = arith.constant 0 : index
    %496 = vector.load %arg4[%c27_343, %c0_344] : memref<36x64xf32, #tpu.memory_space<vmem>>, vector<1x64xf32>
    %497 = vector.broadcast %496 : vector<1x64xf32> to vector<16x64xf32>
    %498 = arith.mulf %495, %497 : vector<16x64xf32>
    %499 = arith.addf %494, %498 : vector<16x64xf32>
    %c7_345 = arith.constant 7 : index
    %c8_346 = arith.constant 8 : index
    %500 = vector.load %arg7[%c7_345, %c8_346] : memref<25x80xf32, #tpu.memory_space<vmem>>, vector<16x64xf32>
    %c28_347 = arith.constant 28 : index
    %c0_348 = arith.constant 0 : index
    %501 = vector.load %arg4[%c28_347, %c0_348] : memref<36x64xf32, #tpu.memory_space<vmem>>, vector<1x64xf32>
    %502 = vector.broadcast %501 : vector<1x64xf32> to vector<16x64xf32>
    %503 = arith.mulf %500, %502 : vector<16x64xf32>
    %504 = arith.addf %499, %503 : vector<16x64xf32>
    %c7_349 = arith.constant 7 : index
    %c12_350 = arith.constant 12 : index
    %505 = vector.load %arg7[%c7_349, %c12_350] : memref<25x80xf32, #tpu.memory_space<vmem>>, vector<16x64xf32>
    %c29_351 = arith.constant 29 : index
    %c0_352 = arith.constant 0 : index
    %506 = vector.load %arg4[%c29_351, %c0_352] : memref<36x64xf32, #tpu.memory_space<vmem>>, vector<1x64xf32>
    %507 = vector.broadcast %506 : vector<1x64xf32> to vector<16x64xf32>
    %508 = arith.mulf %505, %507 : vector<16x64xf32>
    %509 = arith.addf %504, %508 : vector<16x64xf32>
    %c8_353 = arith.constant 8 : index
    %c4_354 = arith.constant 4 : index
    %510 = vector.load %arg7[%c8_353, %c4_354] : memref<25x80xf32, #tpu.memory_space<vmem>>, vector<16x64xf32>
    %c30_355 = arith.constant 30 : index
    %c0_356 = arith.constant 0 : index
    %511 = vector.load %arg4[%c30_355, %c0_356] : memref<36x64xf32, #tpu.memory_space<vmem>>, vector<1x64xf32>
    %512 = vector.broadcast %511 : vector<1x64xf32> to vector<16x64xf32>
    %513 = arith.mulf %510, %512 : vector<16x64xf32>
    %514 = arith.addf %509, %513 : vector<16x64xf32>
    %c8_357 = arith.constant 8 : index
    %c8_358 = arith.constant 8 : index
    %515 = vector.load %arg7[%c8_357, %c8_358] : memref<25x80xf32, #tpu.memory_space<vmem>>, vector<16x64xf32>
    %c31_359 = arith.constant 31 : index
    %c0_360 = arith.constant 0 : index
    %516 = vector.load %arg4[%c31_359, %c0_360] : memref<36x64xf32, #tpu.memory_space<vmem>>, vector<1x64xf32>
    %517 = vector.broadcast %516 : vector<1x64xf32> to vector<16x64xf32>
    %518 = arith.mulf %515, %517 : vector<16x64xf32>
    %519 = arith.addf %514, %518 : vector<16x64xf32>
    %c8_361 = arith.constant 8 : index
    %c12_362 = arith.constant 12 : index
    %520 = vector.load %arg7[%c8_361, %c12_362] : memref<25x80xf32, #tpu.memory_space<vmem>>, vector<16x64xf32>
    %c32_363 = arith.constant 32 : index
    %c0_364 = arith.constant 0 : index
    %521 = vector.load %arg4[%c32_363, %c0_364] : memref<36x64xf32, #tpu.memory_space<vmem>>, vector<1x64xf32>
    %522 = vector.broadcast %521 : vector<1x64xf32> to vector<16x64xf32>
    %523 = arith.mulf %520, %522 : vector<16x64xf32>
    %524 = arith.addf %519, %523 : vector<16x64xf32>
    %c9_365 = arith.constant 9 : index
    %c4_366 = arith.constant 4 : index
    %525 = vector.load %arg7[%c9_365, %c4_366] : memref<25x80xf32, #tpu.memory_space<vmem>>, vector<16x64xf32>
    %c33_367 = arith.constant 33 : index
    %c0_368 = arith.constant 0 : index
    %526 = vector.load %arg4[%c33_367, %c0_368] : memref<36x64xf32, #tpu.memory_space<vmem>>, vector<1x64xf32>
    %527 = vector.broadcast %526 : vector<1x64xf32> to vector<16x64xf32>
    %528 = arith.mulf %525, %527 : vector<16x64xf32>
    %529 = arith.addf %524, %528 : vector<16x64xf32>
    %c9_369 = arith.constant 9 : index
    %c8_370 = arith.constant 8 : index
    %530 = vector.load %arg7[%c9_369, %c8_370] : memref<25x80xf32, #tpu.memory_space<vmem>>, vector<16x64xf32>
    %c34_371 = arith.constant 34 : index
    %c0_372 = arith.constant 0 : index
    %531 = vector.load %arg4[%c34_371, %c0_372] : memref<36x64xf32, #tpu.memory_space<vmem>>, vector<1x64xf32>
    %532 = vector.broadcast %531 : vector<1x64xf32> to vector<16x64xf32>
    %533 = arith.mulf %530, %532 : vector<16x64xf32>
    %534 = arith.addf %529, %533 : vector<16x64xf32>
    %c9_373 = arith.constant 9 : index
    %c12_374 = arith.constant 12 : index
    %535 = vector.load %arg7[%c9_373, %c12_374] : memref<25x80xf32, #tpu.memory_space<vmem>>, vector<16x64xf32>
    %c35_375 = arith.constant 35 : index
    %c0_376 = arith.constant 0 : index
    %536 = vector.load %arg4[%c35_375, %c0_376] : memref<36x64xf32, #tpu.memory_space<vmem>>, vector<1x64xf32>
    %537 = vector.broadcast %536 : vector<1x64xf32> to vector<16x64xf32>
    %538 = arith.mulf %535, %537 : vector<16x64xf32>
    %539 = arith.addf %534, %538 : vector<16x64xf32>
    %cst_377 = arith.constant 2.000000e-01 : f32
    %540 = vector.broadcast %cst_377 : f32 to vector<16x64xf32>
    %541 = arith.mulf %539, %540 : vector<16x64xf32>
    %542 = arith.addf %541, %8 : vector<16x64xf32>
    %c0_378 = arith.constant 0 : index
    %c0_379 = arith.constant 0 : index
    %c0_380 = arith.constant 0 : index
    %543 = vector.load %arg6[%c0_378, %c0_379, %c0_380] : memref<1x16x64xf32, #tpu.memory_space<vmem>>, vector<1x16x64xf32>
    %544 = vector.shape_cast %543 : vector<1x16x64xf32> to vector<16x64xf32>
    %545 = vector.shape_cast %542 : vector<16x64xf32> to vector<1x16x64xf32>
    tpu.vector_store %arg6[%c0_378, %c0_379, %c0_380], %545 {strides = array<i32>} : memref<1x16x64xf32, #tpu.memory_space<vmem>>, vector<1x16x64xf32>,
    return
  }
  func.func @transform_0(%arg0: i32) -> (i32, i32, i32) {
    %c0_i32 = arith.constant 0 : i32
    %c0_i32_0 = arith.constant 0 : i32
    %c0_i32_1 = arith.constant 0 : i32
    return %arg0, %c0_i32, %c0_i32_0 : i32, i32, i32
  }
  func.func @transform_1(%arg0: i32) -> (i32, i32) {
    %c0_i32 = arith.constant 0 : i32
    %c0_i32_0 = arith.constant 0 : i32
    %c0_i32_1 = arith.constant 0 : i32
    return %c0_i32, %c0_i32_0 : i32, i32
  }
  func.func @transform_2(%arg0: i32) -> (i32, i32) {
    %c0_i32 = arith.constant 0 : i32
    %c0_i32_0 = arith.constant 0 : i32
    %c0_i32_1 = arith.constant 0 : i32
    return %c0_i32, %c0_i32_0 : i32, i32
  }
  func.func @transform_3(%arg0: i32) -> (i32, i32) {
    %c0_i32 = arith.constant 0 : i32
    %c0_i32_0 = arith.constant 0 : i32
    %c0_i32_1 = arith.constant 0 : i32
    return %c0_i32, %c0_i32_0 : i32, i32
  }
  func.func @transform_4(%arg0: i32) -> (i32, i32) {
    %c0_i32 = arith.constant 0 : i32
    %c0_i32_0 = arith.constant 0 : i32
    %c0_i32_1 = arith.constant 0 : i32
    return %c0_i32, %c0_i32_0 : i32, i32
  }
  func.func @transform_5(%arg0: i32) -> (i32, i32, i32) {
    %c0_i32 = arith.constant 0 : i32
    %c0_i32_0 = arith.constant 0 : i32
    %c0_i32_1 = arith.constant 0 : i32
    return %arg0, %c0_i32, %c0_i32_0 : i32, i32, i32
  }
}

</mosaic_0001>

<bundles_post_ra>
// kernel: tpu_custom_call.1
= control target key start
LH: loop header
LB: loop body
LE: loop exit
PB: predicated region body
PF: predicated region fallthrough
CT: control target
= control target key end

     0   :  { %s4158_s0 = inlined_call_operand.hbm [shape: f32[2,16,64], index: 0, kind: input, shape index: {}]   ;;  %s4159_s1 = inlined_call_operand.hbm [shape: f32[63,64], index: 1, kind: input, shape index: {}]   ;;  %s4160_s2 = inlined_call_operand.vmem [shape: f32[1,64], index: 2, kind: input, shape index: {}]   ;;  %s4161_s3 = inlined_call_operand.hbm [shape: f32[36,64], index: 3, kind: input, shape index: {}]   ;;  %s4162_s4 = inlined_call_operand.vmem [shape: f32[4,64], index: 4, kind: input, shape index: {}]   ;;  %s4163_s5 = inlined_call_operand.hbm [shape: f32[2,16,64], index: 5, kind: output, shape index: {}]  }
   0x1   :  { %4217 = sst [smem:[#allocation27_spill]] %s4158_s0 }
   0x2   :  { %4218 = sst [smem:[#allocation28_spill]] %s4159_s1 }
   0x3   :  { %4219 = sst [smem:[#allocation29_spill]] %s4161_s3 }
   0x4   :  { %10 = vsyncpa [#allocation4], 0 }
   0x5   :  { %12 = vsyncpa [#allocation4 + $0x1], 0 }
   0x6   :  { %13 = vsyncpa [#allocation7], 0 }
   0x7   :  { %14 = vsyncpa [#allocation5], 0 }
   0x8   :  { %16 = vsyncpa [#allocation5 + $0x1], 0  ;;  %s3052_s18 = smov 0   ;;  %s3054_s19 = smov 0  }
   0x9   :  { %s3056_s20 = smov 0   ;;  %s3058_s21 = smov 0  }
   0xa LB: > { %s3073_s22 = sadd.s32 4294967295, %s2982_s21   ;;  %s2599_s23 = sadd.s32 4294967294, %s2982_s21   ;;  %s2982_s21 = sphi %s3058_s21, %s4294_s21   ;;  %s2978_s20 = sphi %s3056_s20, %s4293_s20   ;;  %s2974_s19 = sphi %s3054_s19, %s4292_s19   ;;  %s2970_s18 = sphi %s3052_s18, %s4291_s18  }
   0xb   : > { %p42_p0 = scmp.ne.s32.totalorder %s2974_s19, %s2970_s18  ;;  %p4164_p1 = scmp.eq.s32.totalorder %s3073_s22, 0 }
   0xc   : > { %p156_p3 = scmp.eq.s32.totalorder %s2599_s23, 1  ;;  %p2600_p5 = scmp.ge.s32.totalorder %s2982_s21, 1 }
   0xd   : > { %p3082_p4 = por %p4164_p1, %p42_p0  ;;  %p163_p7 = scmp.lt.s32.totalorder %s2982_s21, 3 }
   0xe   : > { %p3087_p6 = por %p156_p3, %p42_p0  ;;  %s2984_s27 = smov [#allocation6]  }
   0xf   : > { %s4220_s24 = scalar_select %p3082_p4, 1, 0 }
  0x10   : > { %s4221_s25 = scalar_select %p3087_p6, 1, 0 }
  0x11   : > { %p3092_p8 = pnand %p2600_p5, %p163_p7  ;;  %s175_s28 = sshll.u32 %s2984_s27, 4  ;;  %s3096_s28 = int_to_ptr.vmem [resolvable:$true] %s175_s28 }
  0x12   : > { %s2985_s30 = smov [#allocation8]   ;;  %s4224_s1 = sld [smem:[#allocation28_spill]] }
  0x13   : > { %p2735_p9 = pneg %p3092_p8  ;;  %s191_s6 = sshll.u32 %s2985_s30, 4  ;;  %s3107_s6 = int_to_ptr.vmem [resolvable:$true] %s191_s6 }
  0x15   : > { %p3103_p11 = pnand %p2735_p9, %p4164_p1 }
  0x17   : > { %p2828_p13 = pneg %p3103_p11 }
  0x18   : > { %s2826_s9 = scalar_lea.hbm %s4224_s1, 1024 }
  0x19   : > { %p2827_p12 = scmp.ne.s32.totalorder %s4224_s1, %s2826_s9  ;;  %p2833_p5 = scmp.lt.u32.totalorder %s2826_s9, %s4224_s1 }
  0x1b   : > { %p2829_p0 = pnand %p2828_p13, %p2827_p12 }
  0x1d   : > { %p2830_p3 = pneg %p2829_p0 }
  0x1f   : > { %p2835_p7 = pnand %p2833_p5, %p2830_p3 }
  0x21   : > { %2838 = shalt.err (!%p2835_p7)
}
  0x22   : > { %s2839_s14 = scalar_lea.vmem %s3096_s28, 1024  ;;  %p2847_p2 = scmp.lt.s32.totalorder %s3096_s28, %s3096_s28 }
  0x23   : > { %p2840_p9 = scmp.ne.s32.totalorder %s3096_s28, %s2839_s14  ;;  %p2848_p12 = scmp.lt.s32.totalorder %s2839_s14, %s2839_s14 }
  0x25   : > { %p2842_p10 = pnand %p2840_p9, %p2828_p13  ;;  %p2849_p0 = por %p2848_p12, %p2847_p2 }
  0x27   : > { %p2843_p1 = pneg %p2842_p10 }
  0x29   : > { %p2850_p6 = pnand %p2849_p0, %p2843_p1 }
  0x2b   : > { %2853 = shalt.err (!%p2850_p6)
}
  0x2c   : > { %s2986_s15 = smov 128   ;;  %s2987_s16 = smov 8  }
  0x2d   : > { %2738 = dma.hbm_to_vmem [thread:$0]  (!%p3103_p11), %s4224_s1, 1024, %s3096_s28, [#allocation7], %s2986_s15, %s2986_s15, %s2987_s16  }
  0x2e   : > { %s4225_s3 = sld [smem:[#allocation29_spill]] }
  0x34   : > { %s2854_s7 = scalar_lea.hbm %s4225_s3, 640 }
  0x35   : > { %p2855_p1 = scmp.ne.s32.totalorder %s4225_s3, %s2854_s7  ;;  %p2861_p10 = scmp.lt.u32.totalorder %s2854_s7, %s4225_s3 }
  0x37   : > { %p2857_p2 = pnand %p2855_p1, %p2828_p13 }
  0x39   : > { %p2858_p6 = pneg %p2857_p2 }
  0x3b   : > { %p2863_p3 = pnand %p2861_p10, %p2858_p6 }
  0x3d   : > { %2866 = shalt.err (!%p2863_p3)
}
  0x3e   : > { %s2867_s28 = scalar_lea.vmem %s3107_s6, 640  ;;  %p2875_p12 = scmp.lt.s32.totalorder %s3107_s6, %s3107_s6 }
  0x3f   : > { %p2868_p5 = scmp.ne.s32.totalorder %s3107_s6, %s2867_s28  ;;  %p2876_p0 = scmp.lt.s32.totalorder %s2867_s28, %s2867_s28 }
  0x41   : > { %p2870_p7 = pnand %p2868_p5, %p2828_p13  ;;  %p2877_p1 = por %p2876_p0, %p2875_p12 }
  0x43   : > { %p2871_p9 = pneg %p2870_p7 }
  0x45   : > { %p2878_p2 = pnand %p2877_p1, %p2871_p9 }
  0x47   : > { %2881 = shalt.err (!%p2878_p2)
}
  0x48   : > { %2741 = dma.hbm_to_vmem [thread:$0]  (!%p3103_p11), %s4225_s3, 640, %s3107_s6, [#allocation7], %s2986_s15, %s2986_s15, %s2987_s16  }
  0x49   : > { %s3168_s29 = sadd.s32 1, %s2982_s21   ;;  %s29_s14 = sadd.s32 1, %s2978_s20 }
  0x4a   : > { %s26_s17 = ssub.s32 %s2982_s21, %s3168_s29  ;;  %p36_p13 = scmp.ne.s32.totalorder %s2978_s20, %s2974_s19 }
  0x4b   : > { %p27_p6 = scmp.eq.s32.totalorder %s26_s17, 0  ;;  %p37_p10 = scmp.eq.s32.totalorder %s2982_s21, 0 }
  0x4c   : > { %p4226_p3 = scmp.eq.s32.totalorder %s3073_s22, 1  ;;  %p2752_p7 = scmp.lt.s32.totalorder %s2982_s21, 2 }
  0x4d   : > { %s3184_s27 = scalar_select %p27_p6, %s2978_s20, %s29_s14  }
  0x4e   : > { %p3178_p5 = por %p4226_p3, %p36_p13  ;;  %p38_p9 = por %p37_p10, %p36_p13 }
  0x4f   : > { %s208_s30 = sand.u32 1, %s2978_s20   ;;  %s2721_s6 = sshll.u32 %s2982_s21, 8 }
  0x50   : > { %s4227_s23 = scalar_select %p3178_p5, 1, 0 }
  0x51   : > { %s2604_s7 = sshll.u32 %s208_s30, 4  ;;  %s4228_s0 = sld [smem:[#allocation27_spill]] }
  0x52   : > { %s212_s11 = scalar_lea.vmem [#allocation3], %s2604_s7  ;;  %p3195_p11 = pnand %p2752_p7, %p38_p9 }
  0x53   : > { %s219_s28 = sshll.u32 %s212_s11, 4  ;;  %s3199_s13 = scalar_lea.sflag [#allocation4], %s208_s30  ;;  %s3193_s28 = int_to_ptr.vmem [resolvable:$true] %s219_s28 }
  0x54   : > { %p2884_p0 = pneg %p3195_p11 }
  0x57   : > { %s3191_s10 = scalar_lea.hbm %s4228_s0, %s2721_s6  ;;  %s2887_s6 = scalar_lea.hbm %s4228_s0, 512 }
  0x58   : > { %s2882_s14 = scalar_lea.hbm %s3191_s10, 256  ;;  %p2888_p13 = scmp.lt.u32.totalorder %s3191_s10, %s4228_s0 }
  0x59   : > { %p2883_p12 = scmp.ne.s32.totalorder %s3191_s10, %s2882_s14  ;;  %p2889_p6 = scmp.lt.u32.totalorder %s2887_s6, %s2882_s14 }
  0x5a   : > { %p2891_p3 = scmp.lt.u32.totalorder %s2882_s14, %s3191_s10 }
  0x5b   : > { %p2885_p1 = pnand %p2884_p0, %p2883_p12  ;;  %p2890_p10 = por %p2889_p6, %p2888_p13 }
  0x5d   : > { %p2886_p2 = pneg %p2885_p1  ;;  %p2892_p7 = por %p2891_p3, %p2890_p10 }
  0x5f   : > { %p2893_p9 = pnand %p2892_p7, %p2886_p2 }
  0x61   : > { %2896 = shalt.err (!%p2893_p9)
}
  0x62   : > { %s2897_s30 = scalar_lea.vmem %s3193_s28, 256  ;;  %s2988_s11 = smov [#allocation3]  }
  0x63   : > { %p2898_p12 = scmp.ne.s32.totalorder %s3193_s28, %s2897_s30  ;;  %s2902_s17 = sshll.u32 %s2988_s11, 4  ;;  %s2903_s17 = int_to_ptr.vmem [resolvable:$false] %s2902_s17 }
  0x64   : > { %s2904_s7 = scalar_lea.vmem %s2903_s17, 512  ;;  %p2905_p4 = scmp.lt.s32.totalorder %s3193_s28, %s2903_s17 }
  0x65   : > { %p2900_p1 = pnand %p2898_p12, %p2884_p0  ;;  %p2906_p13 = scmp.lt.s32.totalorder %s2904_s7, %s2897_s30 }
  0x67   : > { %p2901_p5 = pneg %p2900_p1  ;;  %p2907_p6 = por %p2906_p13, %p2905_p4 }
  0x69   : > { %p2908_p10 = pnand %p2907_p6, %p2901_p5 }
  0x6b   : > { %2911 = shalt.err (!%p2908_p10)
}
  0x6c   : > { %2745 = dma.hbm_to_vmem [thread:$0]  (!%p3195_p11), %s3191_s10, 256, %s3193_s28, %s3199_s13, %s2986_s15, %s2986_s15, %s2987_s16  }
  0x6d   : > { %231 = sbr.rel (%p3092_p8) target bundleno = 1791 (0x6ff), region = 40 }
  0x74   : > { %s3233_s14 = sand.u32 1, %s2974_s19   ;;  %p4230_p4 = scmp.ne.s32.totalorder %s4220_s24, 0 }
  0x75   : > { %s4167_s6 = sshll.u32 %s3233_s14, 4  ;;  %s234_s8 = scalar_lea.sflag [#allocation4], %s3233_s14 }
  0x76   : > { %s3239_s12 = scalar_lea.vmem [#allocation3], %s4167_s6 }
  0x77   : > { %2957 = dma.done.wait (%p4230_p4), %s234_s8, 256  }
  0x78   : > { %2959 = vsyncadd (%p4230_p4), %s234_s8, 4294967040  ;;  %p4231_p5 = scmp.eq.s32.totalorder %s3073_s22, 0 }
  0x7a   : > { %2961 = dma.done.wait (%p4231_p5), [#allocation7], 1664   ;;  %p4232_p8 = pmov %p4231_p5 }
  0x7b   : > { %vm272_vm0 = vcmask 647168   ;;  %vm275_vm1 = vcmask 64512   ;;  %vm278_vm2 = vcmask 654912   ;;  %v2989_v0 = vmov 0.0   ;;  %v2613_v1 = vld [vmem:[#allocation6] ss:$0 sm:$0xff] }
  0x7c   : > { %2963 = vsyncadd (%p4232_p8), [#allocation7], 4294965632  ;;  %273 = vst.msk [vmem:[#allocation2 + $0x7] sm:$0x1] %vm272_vm0, %v2989_v0  ;;  %v281_v2 = vld [vmem:[%s3239_s12] sm:$0xff]  ;;  %s2990_s24 = smov 7  }
  0x7d   : > { %274 = vst.msk [vmem:[#allocation2 + $0x18] sm:$0x1] %vm272_vm0, %v2989_v0  ;;  %309 = vrot.lane.b32.xlu1 %v2613_v1, %s2990_s24  ;;  %s4168_s26 = smov 8   ;;  %v2614_v3 = vld [vmem:[#allocation6 + $0x1] ss:$0 sm:$0xff]  ;;  %v282_v4 = vld [vmem:[%s3239_s12 + $0x8] sm:$0xff] }
  0x7e   : > { %276 = vst.msk [vmem:[#allocation2 + $0x8] sm:$0xff] %vm275_vm1, %v2989_v0  ;;  %277 = vst.msk [vmem:[#allocation2 + $0x10] sm:$0xff] %vm275_vm1, %v2989_v0  ;;  %285 = vrot.lane.b32.xlu0 %v281_v2, %s4168_s26  ;;  %s4194_s15 = smov 6   ;;  %v2616_v5 = vld [vmem:[#allocation6 + $0x3] ss:$0 sm:$0xff]  ;;  %s4197_s16 = smov 4  }
  0x7f   : > { %279 = vst.msk [vmem:[#allocation2 + $0x8] sm:$0xff] %vm278_vm2, %v2989_v0  ;;  %280 = vst.msk [vmem:[#allocation2 + $0x10] sm:$0xff] %vm278_vm2, %v2989_v0  ;;  %v2615_v6 = vld [vmem:[#allocation6 + $0x2] ss:$0 sm:$0xff]  ;;  %s2994_s10 = smov 5   ;;  %s2995_s28 = smov 2  }
  0x80   : > { %v2618_v7 = vld [vmem:[#allocation6 + $0x5] ss:$0 sm:$0xff]  ;;  %v2617_v8 = vld [vmem:[#allocation6 + $0x4] ss:$0 sm:$0xff]  ;;  %s2996_s13 = smov 3   ;;  %s4180_s9 = smov 11  }
  0x81   : > { %330 = vrot.lane.b32.xlu1 %v2614_v3, %s4194_s15  ;;  %v2620_v9 = vld [vmem:[#allocation6 + $0x7] ss:$0 sm:$0xff]  ;;  %v2619_v10 = vld [vmem:[#allocation6 + $0x6] ss:$0 sm:$0xff]  ;;  %s4172_s30 = smov 1   ;;  %s4176_s11 = smov 9  }
  0x82   : > { %287 = vrot.lane.b32.xlu0 %v282_v4, %s4168_s26  ;;  %v2622_v11 = vld [vmem:[#allocation6 + $0x9] ss:$0 sm:$0xff]  ;;  %v2621_v12 = vld [vmem:[#allocation6 + $0x8] ss:$0 sm:$0xff]  ;;  %s4178_s17 = smov 10   ;;  %s4174_s7 = smov 14  }
  0x83   : > { %v2624_v13 = vld [vmem:[#allocation6 + $0xb] ss:$0 sm:$0xff]  ;;  %v2623_v14 = vld [vmem:[#allocation6 + $0xa] ss:$0 sm:$0xff]  ;;  %v2626_v15 = vld [vmem:[#allocation6 + $0xd] ss:$0 sm:$0xff] }
  0x84   : > { %v2625_v16 = vld [vmem:[#allocation6 + $0xc] ss:$0 sm:$0xff]  ;;  %v2628_v17 = vld [vmem:[#allocation6 + $0xf] ss:$0 sm:$0xff]  ;;  %v2627_v18 = vld [vmem:[#allocation6 + $0xe] ss:$0 sm:$0xff] }
  0x85   : > { %372 = vrot.lane.b32.xlu1 %v2616_v5, %s4197_s16  ;;  %s4175_s8 = smov 15   ;;  %v2630_v19 = vld [vmem:[#allocation6 + $0x11] ss:$0 sm:$0xff]  ;;  %v2629_v20 = vld [vmem:[#allocation6 + $0x10] ss:$0 sm:$0xff]  ;;  %s4170_s6 = smov 12  }
  0x86   : > { %351 = vrot.lane.b32.xlu0 %v2615_v6, %s2994_s10  ;;  %v2632_v21 = vld [vmem:[#allocation6 + $0x13] ss:$0 sm:$0xff]  ;;  %v2631_v22 = vld [vmem:[#allocation6 + $0x12] ss:$0 sm:$0xff]  ;;  %v2634_v23 = vld [vmem:[#allocation6 + $0x15] ss:$0 sm:$0xff] }
  0x87   : > { %v2633_v24 = vld [vmem:[#allocation6 + $0x14] ss:$0 sm:$0xff]  ;;  %v2636_v25 = vld [vmem:[#allocation6 + $0x17] ss:$0 sm:$0xff]  ;;  %v2635_v26 = vld [vmem:[#allocation6 + $0x16] ss:$0 sm:$0xff] }
  0x88   : > { %v2638_v27 = vld [vmem:[#allocation6 + $0x19] ss:$0 sm:$0xff]  ;;  %v2637_v28 = vld [vmem:[#allocation6 + $0x18] ss:$0 sm:$0xff]  ;;  %v2640_v29 = vld [vmem:[#allocation6 + $0x1b] ss:$0 sm:$0xff] }
  0x89   : > { %414 = vrot.lane.b32.xlu1 %v2618_v7, %s2995_s28  ;;  %v2639_v30 = vld [vmem:[#allocation6 + $0x1a] ss:$0 sm:$0xff]  ;;  %v2642_v31 = vld [vmem:[#allocation6 + $0x1d] ss:$0 sm:$0xff]  ;;  %v2641_v32 = vld [vmem:[#allocation6 + $0x1c] ss:$0 sm:$0xff] }
  0x8a   : > { %393 = vrot.lane.b32.xlu0 %v2617_v8, %s2996_s13  ;;  %v2644_v33 = vld [vmem:[#allocation6 + $0x1f] ss:$0 sm:$0xff]  ;;  %v2643_v34 = vld [vmem:[#allocation6 + $0x1e] ss:$0 sm:$0xff]  ;;  %v2646_v35 = vld [vmem:[#allocation6 + $0x21] ss:$0 sm:$0xff] }
  0x8b   : > { %v2645_v36 = vld [vmem:[#allocation6 + $0x20] ss:$0 sm:$0xff]  ;;  %v2648_v37 = vld [vmem:[#allocation6 + $0x23] ss:$0 sm:$0xff]  ;;  %v2647_v38 = vld [vmem:[#allocation6 + $0x22] ss:$0 sm:$0xff] }
  0x8c   : > { %v2650_v39 = vld [vmem:[#allocation6 + $0x25] ss:$0 sm:$0xff]  ;;  %v2649_v40 = vld [vmem:[#allocation6 + $0x24] ss:$0 sm:$0xff]  ;;  %v2652_v41 = vld [vmem:[#allocation6 + $0x27] ss:$0 sm:$0xff] }
  0x8d   : > { %456 = vrot.lane.b32.xlu1 %v2620_v9, %s4180_s9  ;;  %v2651_v42 = vld [vmem:[#allocation6 + $0x26] ss:$0 sm:$0xff]  ;;  %v2654_v43 = vld [vmem:[#allocation6 + $0x29] ss:$0 sm:$0xff]  ;;  %v2653_v44 = vld [vmem:[#allocation6 + $0x28] ss:$0 sm:$0xff] }
  0x8e   : > { %435 = vrot.lane.b32.xlu0 %v2619_v10, %s4172_s30  ;;  %vm291_vm3 = vcmask 588864   ;;  %s4257_s0 = smov 116   ;;  %s4258_s1 = smov 118   ;;  %vm2490_vm4 = vcmask 523264  }
  0x8f   : > { %s4259_s3 = smov 119   ;;  %p4288_p0 = scmp.ne.s32.totalorder %s4227_s23, 0 }
  0x91   : > { %498 = vrot.lane.b32.xlu1 %v2622_v11, %s4176_s11 }
  0x92   : > { %477 = vrot.lane.b32.xlu0 %v2621_v12, %s4178_s17 }
  0x95   : > { %540 = vrot.lane.b32.xlu1 %v2624_v13, %s2990_s24 }
  0x96   : > { %519 = vrot.lane.b32.xlu0 %v2623_v14, %s4168_s26  ;;  %s4173_s26 = smov 13  }
  0x99   : > { %582 = vrot.lane.b32.xlu1 %v2626_v15, %s2994_s10 }
  0x9a   : > { %561 = vrot.lane.b32.xlu0 %v2625_v16, %s4194_s15 }
  0x9d   : > { %624 = vrot.lane.b32.xlu1 %v2628_v17, %s4174_s7 }
  0x9e   : > { %603 = vrot.lane.b32.xlu0 %v2627_v18, %s4175_s8 }
  0xa1   : > { %666 = vrot.lane.b32.xlu1 %v2630_v19, %s4170_s6  ;;  %s4233_s6 = smov 8  }
  0xa2   : > { %645 = vrot.lane.b32.xlu0 %v2629_v20, %s4173_s26 }
  0xa5   : > { %708 = vrot.lane.b32.xlu1 %v2632_v21, %s4178_s17 }
  0xa6   : > { %687 = vrot.lane.b32.xlu0 %v2631_v22, %s4180_s9 }
  0xa9   : > { %752 = vrot.lane.b32.xlu1 %v2634_v23, %s2990_s24 }
  0xaa   : > { %729 = vrot.lane.b32.xlu0 %v2633_v24, %s4176_s11 }
  0xad   : > { %794 = vrot.lane.b32.xlu1 %v2636_v25, %s2994_s10 }
  0xae   : > { %773 = vrot.lane.b32.xlu0 %v2635_v26, %s4194_s15 }
  0xb1   : > { %836 = vrot.lane.b32.xlu1 %v2638_v27, %s2996_s13 }
  0xb2   : > { %815 = vrot.lane.b32.xlu0 %v2637_v28, %s4197_s16 }
  0xb5   : > { %878 = vrot.lane.b32.xlu1 %v2640_v29, %s4172_s30  ;;  %s4234_s30 = smov 12  }
  0xb6   : > { %857 = vrot.lane.b32.xlu0 %v2639_v30, %s2995_s28 }
  0xb9   : > { %920 = vrot.lane.b32.xlu1 %v2642_v31, %s4178_s17  ;;  %v2655_v31 = vld [vmem:[#allocation6 + $0x2a] ss:$0 sm:$0xff] }
  0xba   : > { %899 = vrot.lane.b32.xlu0 %v2641_v32, %s4180_s9 }
  0xbd   : > { %962 = vrot.lane.b32.xlu1 %v2644_v33, %s4233_s6 }
  0xbe   : > { %941 = vrot.lane.b32.xlu0 %v2643_v34, %s4176_s11 }
  0xc1   : > { %1004 = vrot.lane.b32.xlu1 %v2646_v35, %s4194_s15 }
  0xc2   : > { %983 = vrot.lane.b32.xlu0 %v2645_v36, %s2990_s24 }
  0xc5   : > { %1046 = vrot.lane.b32.xlu1 %v2648_v37, %s4175_s8  ;;  %s4205_s8 = smov 123   ;;  %v2656_v37 = vld [vmem:[#allocation6 + $0x2b] ss:$0 sm:$0xff] }
  0xc6   : > { %1025 = vrot.lane.b32.xlu0 %v2647_v38, %s2994_s10 }
  0xc9   : > { %1088 = vrot.lane.b32.xlu1 %v2650_v39, %s4173_s26  ;;  %s4209_s26 = smov 121  }
  0xca   : > { %1067 = vrot.lane.b32.xlu0 %v2649_v40, %s4174_s7  ;;  %s4207_s7 = smov 122  }
  0xcd   : > { %1130 = vrot.lane.b32.xlu1 %v2652_v41, %s4180_s9  ;;  %s4186_s9 = smov 126   ;;  %v2657_v41 = vld [vmem:[#allocation6 + $0x2c] ss:$0 sm:$0xff] }
  0xce   : > { %1109 = vrot.lane.b32.xlu0 %v2651_v42, %s4234_s30 }
  0xd1   : > { %1172 = vrot.lane.b32.xlu1 %v2654_v43, %s4176_s11  ;;  %s4182_s11 = smov 124  }
  0xd2   : > { %1151 = vrot.lane.b32.xlu0 %v2653_v44, %s4178_s17  ;;  %s4184_s17 = smov 125  }
  0xef   : > { %v310_v45 = vpop.permute.xlu1 %309 }
  0xf0   : > { %v286_v46 = vpop.permute.xlu0 %285 }
  0xf1   : > { %292 = vst.msk [vmem:[#allocation2 + $0x8] sm:$0xff] %vm291_vm3, %v286_v46 }
  0xf3   : > { %v331_v48 = vpop.permute.xlu1 %330 }
  0xf4   : > { %v288_v47 = vpop.permute.xlu0 %287 }
  0xf5   : > { %293 = vst.msk [vmem:[#allocation2 + $0x10] sm:$0xff] %vm291_vm3, %v288_v47  ;;  %v2658_v47 = vld [vmem:[#allocation6 + $0x2d] ss:$0 sm:$0xff] }
  0xf7   : > { %v373_v53 = vpop.permute.xlu1 %372 }
  0xf8   : > { %v3297_v49 = vld [vmem:[#allocation2 + $0x7] sm:$0xff]  ;;  %v352_v50 = vpop.permute.xlu0 %351 }
  0xf9   : > { %v312_v51 = vmul.f32 %v310_v45, %v3297_v49  ;;  %v333_v57 = vmul.f32 %v331_v48, %v3297_v49  ;;  %v354_v58 = vmul.f32 %v352_v50, %v3297_v49  ;;  %v375_v1 = vmul.f32 %v373_v53, %v3297_v49 }
  0xfb   : > { %316 = vrot.lane.b32.xlu0 %v312_v51, %s4209_s26  ;;  %v415_v59 = vpop.permute.xlu1 %414 }
  0xfc   : > { %v3301_v52 = vld [vmem:[#allocation2 + $0xf] sm:$0xff]  ;;  %v394_v54 = vpop.permute.xlu0 %393  ;;  %v417_v7 = vmul.f32 %v415_v59, %v3297_v49 }
  0xfd   : > { %v313_v55 = vmul.f32 %v310_v45, %v3301_v52  ;;  %v334_v56 = vmul.f32 %v331_v48, %v3301_v52  ;;  %v376_v61 = vmul.f32 %v373_v53, %v3301_v52  ;;  %v355_v62 = vmul.f32 %v352_v50, %v3301_v52  ;;  %v2659_v53 = vld [vmem:[#allocation6 + $0x2e] ss:$0 sm:$0xff] }
  0xfe   : > { %v396_v2 = vmul.f32 %v394_v54, %v3297_v49  ;;  %v418_v3 = vmul.f32 %v415_v59, %v3301_v52  ;;  %v397_v4 = vmul.f32 %v394_v54, %v3301_v52  ;;  %v2660_v59 = vld [vmem:[#allocation6 + $0x2f] ss:$0 sm:$0xff] }
  0xff   : > { %318 = vrot.lane.b32.xlu1 %v313_v55, %s4209_s26  ;;  %339 = vrot.lane.b32.xlu0 %v334_v56, %s4207_s7  ;;  %v457_v63 = vpop.permute.xlu1 %456 }
 0x100   : > { %v436_v60 = vpop.permute.xlu0 %435  ;;  %v460_v11 = vmul.f32 %v457_v63, %v3301_v52  ;;  %v459_v13 = vmul.f32 %v457_v63, %v3297_v49  ;;  %v2661_v63 = vld [vmem:[#allocation6 + $0x30] ss:$0 sm:$0xff] }
 0x101   : > { %v438_v8 = vmul.f32 %v436_v60, %v3297_v49  ;;  %v439_v12 = vmul.f32 %v436_v60, %v3301_v52 }
 0x103   : > { %337 = vrot.lane.b32.xlu1 %v333_v57, %s4207_s7  ;;  %358 = vrot.lane.b32.xlu0 %v354_v58, %s4205_s8  ;;  %v499_v5 = vpop.permute.xlu1 %498 }
 0x104   : > { %v478_v0 = vpop.permute.xlu0 %477  ;;  %v502_v17 = vmul.f32 %v499_v5, %v3301_v52  ;;  %v501_v21 = vmul.f32 %v499_v5, %v3297_v49  ;;  %v2662_v5 = vld [vmem:[#allocation6 + $0x31] ss:$0 sm:$0xff] }
 0x105   : > { %v480_v14 = vmul.f32 %v478_v0, %v3297_v49  ;;  %v481_v18 = vmul.f32 %v478_v0, %v3301_v52 }
 0x107   : > { %360 = vrot.lane.b32.xlu1 %v355_v62, %s4205_s8  ;;  %381 = vrot.lane.b32.xlu0 %v376_v61, %s4182_s11  ;;  %v541_v9 = vpop.permute.xlu1 %540 }
 0x108   : > { %v520_v6 = vpop.permute.xlu0 %519  ;;  %v544_v23 = vmul.f32 %v541_v9, %v3301_v52  ;;  %v543_v27 = vmul.f32 %v541_v9, %v3297_v49  ;;  %v2663_v9 = vld [vmem:[#allocation6 + $0x32] ss:$0 sm:$0xff] }
 0x109   : > { %v522_v22 = vmul.f32 %v520_v6, %v3297_v49  ;;  %v523_v24 = vmul.f32 %v520_v6, %v3301_v52 }
 0x10b   : > { %379 = vrot.lane.b32.xlu1 %v375_v1, %s4182_s11  ;;  %400 = vrot.lane.b32.xlu0 %v396_v2, %s4184_s17  ;;  %s4188_s11 = smov 127   ;;  %v583_v15 = vpop.permute.xlu1 %582 }
 0x10c   : > { %v562_v10 = vpop.permute.xlu0 %561  ;;  %v585_v33 = vmul.f32 %v583_v15, %v3297_v49  ;;  %v586_v34 = vmul.f32 %v583_v15, %v3301_v52 }
 0x10d   : > { %v564_v28 = vmul.f32 %v562_v10, %v3297_v49  ;;  %v565_v32 = vmul.f32 %v562_v10, %v3301_v52 }
 0x10f   : > { %402 = vrot.lane.b32.xlu1 %v397_v4, %s4184_s17  ;;  %423 = vrot.lane.b32.xlu0 %v418_v3, %s4186_s9  ;;  %s4190_s17 = smov 117   ;;  %v625_v19 = vpop.permute.xlu1 %624 }
 0x110   : > { %v604_v16 = vpop.permute.xlu0 %603  ;;  %v627_v43 = vmul.f32 %v625_v19, %v3297_v49  ;;  %v628_v44 = vmul.f32 %v625_v19, %v3301_v52  ;;  %v2665_v19 = vld [vmem:[#allocation6 + $0x34] ss:$0 sm:$0xff] }
 0x111   : > { %v606_v38 = vmul.f32 %v604_v16, %v3297_v49  ;;  %v607_v42 = vmul.f32 %v604_v16, %v3301_v52 }
 0x113   : > { %421 = vrot.lane.b32.xlu1 %v417_v7, %s4186_s9  ;;  %442 = vrot.lane.b32.xlu0 %v438_v8, %s4188_s11  ;;  %s4213_s9 = smov 118   ;;  %v667_v25 = vpop.permute.xlu1 %666 }
 0x114   : > { %v646_v20 = vpop.permute.xlu0 %645  ;;  %v669_v55 = vmul.f32 %v667_v25, %v3297_v49  ;;  %v670_v56 = vmul.f32 %v667_v25, %v3301_v52  ;;  %v2666_v25 = vld [vmem:[#allocation6 + $0x35] ss:$0 sm:$0xff] }
 0x115   : > { %v648_v48 = vmul.f32 %v646_v20, %v3297_v49  ;;  %v649_v54 = vmul.f32 %v646_v20, %v3301_v52 }
 0x117   : > { %444 = vrot.lane.b32.xlu1 %v439_v12, %s4188_s11  ;;  %465 = vrot.lane.b32.xlu0 %v460_v11, %s4190_s17  ;;  %s4211_s11 = smov 119   ;;  %v709_v29 = vpop.permute.xlu1 %708  ;;  %v3430_v11 = vld [vmem:[#allocation2 + $0x8] sm:$0xff]  ;;  %v3432_v12 = vld [vmem:[#allocation2 + $0x10] sm:$0xff] }
 0x118   : > { %v688_v26 = vpop.permute.xlu0 %687  ;;  %v711_v1 = vmul.f32 %v709_v29, %v3297_v49  ;;  %v712_v2 = vmul.f32 %v709_v29, %v3301_v52  ;;  %4239 = vst [vmem:[#allocation13_spill] sm:$0xff] %v3430_v11  ;;  %4240 = vst [vmem:[#allocation14_spill] sm:$0xff] %v3432_v12  ;;  %v2667_v29 = vld [vmem:[#allocation6 + $0x36] ss:$0 sm:$0xff] }
 0x119   : > { %v690_v60 = vmul.f32 %v688_v26, %v3297_v49  ;;  %v691_v0 = vmul.f32 %v688_v26, %v3301_v52 }
 0x11b   : > { %463 = vrot.lane.b32.xlu1 %v459_v13, %s4190_s17  ;;  %484 = vrot.lane.b32.xlu0 %v480_v14, %s4213_s9  ;;  %s4192_s17 = smov 120   ;;  %v3358_v35 = vpop.permute.xlu1 %752 }
 0x11c   : > { %v3351_v30 = vpop.permute.xlu0 %729  ;;  %v756_v13 = vmul.f32 %v3358_v35, %v3432_v12 }
 0x11d   : > { %v732_v6 = vmul.f32 %v3351_v30, %v3297_v49  ;;  %v733_v10 = vmul.f32 %v3351_v30, %v3301_v52  ;;  %v755_v49 = vmul.f32 %v3358_v35, %v3430_v11  ;;  %v2664_v52 = vld [vmem:[#allocation6 + $0x33] ss:$0 sm:$0xff] }
 0x11f   : > { %486 = vrot.lane.b32.xlu1 %v481_v18, %s4213_s9  ;;  %507 = vrot.lane.b32.xlu0 %v502_v17, %s4211_s11  ;;  %v3365_v39 = vpop.permute.xlu1 %794 }
 0x120   : > { %v3360_v36 = vpop.permute.xlu0 %773 }
 0x121   : > { %v776_v16 = vmul.f32 %v3360_v36, %v3430_v11  ;;  %v777_v20 = vmul.f32 %v3360_v36, %v3432_v12 }
 0x123   : > { %505 = vrot.lane.b32.xlu1 %v501_v21, %s4211_s11  ;;  %526 = vrot.lane.b32.xlu0 %v522_v22, %s4192_s17  ;;  %v3376_v45 = vpop.permute.xlu1 %836  ;;  %v797_v22 = vmul.f32 %v3365_v39, %v3430_v11 }
 0x124   : > { %v3369_v40 = vpop.permute.xlu0 %815 }
 0x125   : > { %v818_v26 = vmul.f32 %v3369_v40, %v3430_v11  ;;  %v819_v30 = vmul.f32 %v3369_v40, %v3432_v12 }
 0x127   : > { %528 = vrot.lane.b32.xlu1 %v523_v24, %s4192_s17  ;;  %549 = vrot.lane.b32.xlu0 %v544_v23, %s4209_s26  ;;  %s4195_s17 = smov 113   ;;  %v3383_v50 = vpop.permute.xlu1 %878  ;;  %v798_v23 = vmul.f32 %v3365_v39, %v3432_v12 }
 0x128   : > { %v3378_v46 = vpop.permute.xlu0 %857 }
 0x12b   : > { %547 = vrot.lane.b32.xlu1 %v543_v27, %s4209_s26  ;;  %568 = vrot.lane.b32.xlu0 %v564_v28, %s4207_s7  ;;  %v3394_v57 = vpop.permute.xlu1 %920 }
 0x12c   : > { %v3387_v51 = vpop.permute.xlu0 %899 }
 0x12f   : > { %570 = vrot.lane.b32.xlu1 %v565_v32, %s4207_s7  ;;  %1195 = vrot.lane.b32.xlu0 %v2655_v31, %s2990_s24  ;;  %v3401_v61 = vpop.permute.xlu1 %962 }
 0x130   : > { %v3396_v58 = vpop.permute.xlu0 %941 }
 0x133   : > { %589 = vrot.lane.b32.xlu1 %v585_v33, %s4205_s8  ;;  %591 = vrot.lane.b32.xlu0 %v586_v34, %s4205_s8  ;;  %v3412_v3 = vpop.permute.xlu1 %1004  ;;  %v839_v33 = vmul.f32 %v3376_v45, %v3430_v11  ;;  %v840_v34 = vmul.f32 %v3376_v45, %v3432_v12  ;;  %v881_v45 = vmul.f32 %v3383_v50, %v3430_v11 }
 0x134   : > { %v3405_v62 = vpop.permute.xlu0 %983 }
 0x137   : > { %1216 = vrot.lane.b32.xlu1 %v2656_v37, %s4194_s15  ;;  %610 = vrot.lane.b32.xlu0 %v606_v38, %s4195_s17  ;;  %s4203_s15 = smov 114   ;;  %v3420_v7 = vpop.permute.xlu1 %1046  ;;  %v2668_v37 = vld [vmem:[#allocation6 + $0x37] ss:$0 sm:$0xff]  ;;  %v860_v38 = vmul.f32 %v3378_v46, %v3430_v11 }
 0x138   : > { %v3414_v4 = vpop.permute.xlu0 %1025 }
 0x13b   : > { %612 = vrot.lane.b32.xlu1 %v607_v42, %s4195_s17  ;;  %1237 = vrot.lane.b32.xlu0 %v2657_v41, %s2994_s10  ;;  %s4199_s17 = smov 115   ;;  %v3438_v14 = vpop.permute.xlu1 %1088  ;;  %v2669_v41 = vld [vmem:[#allocation6 + $0x38] ss:$0 sm:$0xff]  ;;  %v861_v42 = vmul.f32 %v3378_v46, %v3432_v12  ;;  %v2670_v46 = vld [vmem:[#allocation6 + $0x39] ss:$0 sm:$0xff] }
 0x13c   : > { %v3424_v8 = vpop.permute.xlu0 %1067 }
 0x13f   : > { %631 = vrot.lane.b32.xlu1 %v627_v43, %s4203_s15  ;;  %633 = vrot.lane.b32.xlu0 %v628_v44, %s4203_s15  ;;  %v3446_v17 = vpop.permute.xlu1 %1130  ;;  %s4242_s15 = smov 124  }
 0x140   : > { %v3440_v15 = vpop.permute.xlu0 %1109 }
 0x143   : > { %1258 = vrot.lane.b32.xlu1 %v2658_v47, %s4197_s16  ;;  %652 = vrot.lane.b32.xlu0 %v648_v48, %s4199_s17  ;;  %s4201_s16 = smov 116   ;;  %v3462_v24 = vpop.permute.xlu1 %1172  ;;  %v882_v47 = vmul.f32 %v3383_v50, %v3432_v12  ;;  %v2671_v50 = vld [vmem:[#allocation6 + $0x3a] ss:$0 sm:$0xff] }
 0x144   : > { %v3450_v18 = vpop.permute.xlu0 %1151 }
 0x147   : > { %654 = vrot.lane.b32.xlu1 %v649_v54, %s4199_s17  ;;  %1279 = vrot.lane.b32.xlu0 %v2659_v53, %s2996_s13  ;;  %s4235_s13 = smov 117   ;;  %s4236_s17 = smov 1   ;;  %v902_v54 = vmul.f32 %v3387_v51, %v3430_v11 }
 0x14b   : > { %673 = vrot.lane.b32.xlu1 %v669_v55, %s4201_s16  ;;  %675 = vrot.lane.b32.xlu0 %v670_v56, %s4201_s16  ;;  %s4241_s16 = smov 9  }
 0x14f   : > { %1300 = vrot.lane.b32.xlu1 %v2660_v59, %s2995_s28  ;;  %694 = vrot.lane.b32.xlu0 %v690_v60, %s4235_s13  ;;  %s4237_s28 = smov 11   ;;  %v903_v59 = vmul.f32 %v3387_v51, %v3432_v12  ;;  %v2672_v51 = vld [vmem:[#allocation6 + $0x3b] ss:$0 sm:$0xff] }
 0x153   : > { %696 = vrot.lane.b32.xlu1 %v691_v0, %s4235_s13  ;;  %1321 = vrot.lane.b32.xlu0 %v2661_v63, %s4236_s17  ;;  %s4238_s17 = smov 10   ;;  %v923_v0 = vmul.f32 %v3394_v57, %v3430_v11 }
 0x157   : > { %715 = vrot.lane.b32.xlu1 %v711_v1, %s4213_s9  ;;  %717 = vrot.lane.b32.xlu0 %v712_v2, %s4213_s9  ;;  %v924_v1 = vmul.f32 %v3394_v57, %v3432_v12  ;;  %v2673_v57 = vld [vmem:[#allocation6 + $0x3c] ss:$0 sm:$0xff] }
 0x15b   : > { %1342 = vrot.lane.b32.xlu1 %v2662_v5, %s4237_s28  ;;  %736 = vrot.lane.b32.xlu0 %v732_v6, %s4211_s11  ;;  %v944_v6 = vmul.f32 %v3396_v58, %v3430_v11 }
 0x15f   : > { %738 = vrot.lane.b32.xlu1 %v733_v10, %s4211_s11  ;;  %1363 = vrot.lane.b32.xlu0 %v2663_v9, %s4238_s17 }
 0x163   : > { %759 = vrot.lane.b32.xlu1 %v755_v49, %s4209_s26  ;;  %761 = vrot.lane.b32.xlu0 %v756_v13, %s4209_s26  ;;  %s4249_s26 = smov 13   ;;  %v945_v49 = vmul.f32 %v3396_v58, %v3432_v12  ;;  %v2674_v58 = vld [vmem:[#allocation6 + $0x3d] ss:$0 sm:$0xff] }
 0x167   : > { %1384 = vrot.lane.b32.xlu1 %v2664_v52, %s4241_s16  ;;  %780 = vrot.lane.b32.xlu0 %v776_v16, %s4207_s7  ;;  %v965_v16 = vmul.f32 %v3401_v61, %v3430_v11 }
 0x16b   : > { %782 = vrot.lane.b32.xlu1 %v777_v20, %s4207_s7  ;;  %1405 = vrot.lane.b32.xlu0 %v2665_v19, %s4233_s6  ;;  %s4246_s7 = smov 15   ;;  %v966_v19 = vmul.f32 %v3401_v61, %v3432_v12  ;;  %v2675_v61 = vld [vmem:[#allocation6 + $0x3e] ss:$0 sm:$0xff] }
 0x16d   : > { %v3456_v21 = vpop.permute.xlu0 %316 }
 0x16f   : > { %801 = vrot.lane.b32.xlu1 %v797_v22, %s4205_s8  ;;  %803 = vrot.lane.b32.xlu0 %v798_v23, %s4205_s8  ;;  %s4243_s8 = smov 6   ;;  %v986_v23 = vmul.f32 %v3405_v62, %v3430_v11 }
 0x171   : > { %v3468_v27 = vpop.permute.xlu1 %318  ;;  %v3470_v28 = vpop.permute.xlu0 %339 }
 0x173   : > { %1426 = vrot.lane.b32.xlu1 %v2666_v25, %s2990_s24  ;;  %822 = vrot.lane.b32.xlu0 %v818_v26, %s4242_s15  ;;  %s4244_s24 = smov 125  }
 0x175   : > { %v3476_v31 = vpop.permute.xlu1 %337  ;;  %v3478_v32 = vpop.permute.xlu0 %358 }
 0x177   : > { %824 = vrot.lane.b32.xlu1 %v819_v30, %s4242_s15  ;;  %1447 = vrot.lane.b32.xlu0 %v2667_v29, %s4243_s8  ;;  %s4245_s8 = smov 126   ;;  %v987_v29 = vmul.f32 %v3405_v62, %v3432_v12  ;;  %v1028_v62 = vmul.f32 %v3414_v4, %v3430_v11 }
 0x179   : > { %v3486_v35 = vpop.permute.xlu1 %360  ;;  %v3488_v36 = vpop.permute.xlu0 %381 }
 0x17b   : > { %843 = vrot.lane.b32.xlu1 %v839_v33, %s4244_s24  ;;  %845 = vrot.lane.b32.xlu0 %v840_v34, %s4244_s24  ;;  %v1007_v34 = vmul.f32 %v3412_v3, %v3430_v11 }
 0x17d   : > { %v3494_v39 = vpop.permute.xlu1 %379  ;;  %v3496_v40 = vpop.permute.xlu0 %400 }
 0x17f   : > { %1468 = vrot.lane.b32.xlu1 %v2668_v37, %s2994_s10  ;;  %864 = vrot.lane.b32.xlu0 %v860_v38, %s4245_s8  ;;  %s4247_s10 = smov 127   ;;  %v1008_v37 = vmul.f32 %v3412_v3, %v3432_v12  ;;  %v1049_v3 = vmul.f32 %v3420_v7, %v3430_v11 }
 0x181   : > { %v3502_v43 = vpop.permute.xlu1 %402  ;;  %v3504_v44 = vpop.permute.xlu0 %423 }
 0x183   : > { %866 = vrot.lane.b32.xlu1 %v861_v42, %s4245_s8  ;;  %1489 = vrot.lane.b32.xlu0 %v2669_v41, %s4246_s7  ;;  %s4248_s7 = smov 14   ;;  %v1029_v42 = vmul.f32 %v3414_v4, %v3432_v12  ;;  %v1070_v4 = vmul.f32 %v3424_v8, %v3430_v11 }
 0x185   : > { %v3512_v48 = vpop.permute.xlu1 %421  ;;  %v3514_v53 = vpop.permute.xlu0 %442 }
 0x187   : > { %885 = vrot.lane.b32.xlu1 %v881_v45, %s4247_s10  ;;  %887 = vrot.lane.b32.xlu0 %v882_v47, %s4247_s10 }
 0x189   : > { %v3520_v55 = vpop.permute.xlu1 %444  ;;  %v3522_v56 = vpop.permute.xlu0 %465 }
 0x18b   : > { %1510 = vrot.lane.b32.xlu1 %v2670_v46, %s4248_s7  ;;  %906 = vrot.lane.b32.xlu0 %v902_v54, %s4235_s13  ;;  %v1050_v46 = vmul.f32 %v3420_v7, %v3432_v12  ;;  %s4254_s7 = smov 113   ;;  %v1091_v7 = vmul.f32 %v3438_v14, %v3430_v11 }
 0x18d   : > { %v3528_v60 = vpop.permute.xlu1 %463  ;;  %v3530_v63 = vpop.permute.xlu0 %484 }
 0x18f   : > { %908 = vrot.lane.b32.xlu1 %v903_v59, %s4235_s13  ;;  %1531 = vrot.lane.b32.xlu0 %v2671_v50, %s4249_s26  ;;  %s4250_s26 = smov 120   ;;  %v1071_v59 = vmul.f32 %v3424_v8, %v3432_v12  ;;  %v1112_v8 = vmul.f32 %v3440_v15, %v3430_v11 }
 0x191   : > { %v3538_v2 = vpop.permute.xlu1 %486  ;;  %v3540_v5 = vpop.permute.xlu0 %507 }
 0x193   : > { %927 = vrot.lane.b32.xlu1 %v923_v0, %s4213_s9  ;;  %929 = vrot.lane.b32.xlu0 %v924_v1, %s4213_s9  ;;  %s4256_s9 = smov 115  }
 0x195   : > { %v3546_v9 = vpop.permute.xlu1 %505  ;;  %v3548_v10 = vpop.permute.xlu0 %526 }
 0x197   : > { %1552 = vrot.lane.b32.xlu1 %v2672_v51, %s4234_s30  ;;  %948 = vrot.lane.b32.xlu0 %v944_v6, %s4211_s11  ;;  %v1092_v51 = vmul.f32 %v3438_v14, %v3432_v12  ;;  %v1133_v14 = vmul.f32 %v3446_v17, %v3430_v11 }
 0x199   : > { %v3554_v13 = vpop.permute.xlu1 %528  ;;  %v3556_v52 = vpop.permute.xlu0 %549 }
 0x19b   : > { %950 = vrot.lane.b32.xlu1 %v945_v49, %s4211_s11  ;;  %1573 = vrot.lane.b32.xlu0 %v2673_v57, %s4237_s28  ;;  %s4251_s28 = smov 121   ;;  %s4255_s11 = smov 114   ;;  %v1113_v49 = vmul.f32 %v3440_v15, %v3432_v12  ;;  %v1154_v15 = vmul.f32 %v3450_v18, %v3430_v11 }
 0x19d   : > { %v3564_v20 = vpop.permute.xlu1 %547  ;;  %v3566_v22 = vpop.permute.xlu0 %568 }
 0x19f   : > { %969 = vrot.lane.b32.xlu1 %v965_v16, %s4250_s26  ;;  %971 = vrot.lane.b32.xlu0 %v966_v19, %s4250_s26 }
 0x1a1   : > { %v3572_v25 = vpop.permute.xlu1 %570  ;;  %v3574_v26 = vpop.permute.xlu0 %1195 }
 0x1a3   : > { %1594 = vrot.lane.b32.xlu1 %v2674_v58, %s4238_s17  ;;  %990 = vrot.lane.b32.xlu0 %v986_v23, %s4251_s28  ;;  %s4252_s17 = smov 122   ;;  %v1134_v58 = vmul.f32 %v3446_v17, %v3432_v12  ;;  %v1175_v17 = vmul.f32 %v3462_v24, %v3430_v11 }
 0x1a5   : > { %v3580_v30 = vpop.permute.xlu1 %589  ;;  %v3582_v33 = vpop.permute.xlu0 %591 }
 0x1a7   : > { %992 = vrot.lane.b32.xlu1 %v987_v29, %s4251_s28  ;;  %1615 = vrot.lane.b32.xlu0 %v2675_v61, %s4241_s16  ;;  %s4253_s16 = smov 123   ;;  %v1155_v29 = vmul.f32 %v3450_v18, %v3432_v12  ;;  %v3664_v18 = vld [vmem:[#allocation2 + $0x9] sm:$0xff] }
 0x1a9   : > { %v1217_v38 = vpop.permute.xlu1 %1216  ;;  %v3590_v41 = vpop.permute.xlu0 %610 }
 0x1ab   : > { %1011 = vrot.lane.b32.xlu1 %v1007_v34, %s4252_s17  ;;  %1013 = vrot.lane.b32.xlu0 %v1008_v37, %s4252_s17 }
 0x1ad   : > { %v3598_v45 = vpop.permute.xlu1 %612  ;;  %v1238_v47 = vpop.permute.xlu0 %1237 }
 0x1af   : > { %1032 = vrot.lane.b32.xlu1 %v1028_v62, %s4253_s16  ;;  %1034 = vrot.lane.b32.xlu0 %v1029_v42, %s4253_s16  ;;  %v1176_v62 = vmul.f32 %v3462_v24, %v3432_v12 }
 0x1b1   : > { %v3606_v54 = vpop.permute.xlu1 %631  ;;  %v3608_v50 = vpop.permute.xlu0 %633 }
 0x1b3   : > { %1053 = vrot.lane.b32.xlu1 %v1049_v3, %s4254_s7  ;;  %1055 = vrot.lane.b32.xlu0 %v1050_v46, %s4254_s7  ;;  %v3666_v46 = vld [vmem:[#allocation2 + $0x11] sm:$0xff] }
 0x1b5   : > { %v1259_v0 = vpop.permute.xlu1 %1258  ;;  %v3616_v1 = vpop.permute.xlu0 %652 }
 0x1b7   : > { %1074 = vrot.lane.b32.xlu1 %v1070_v4, %s4255_s11  ;;  %1076 = vrot.lane.b32.xlu0 %v1071_v59, %s4255_s11  ;;  %v1198_v4 = vmul.f32 %v3574_v26, %v3664_v18  ;;  %v1199_v59 = vmul.f32 %v3574_v26, %v3666_v46  ;;  %v1240_v26 = vmul.f32 %v1238_v47, %v3664_v18 }
 0x1b9   : > { %v3624_v6 = vpop.permute.xlu1 %654  ;;  %v1280_v57 = vpop.permute.xlu0 %1279 }
 0x1bb   : > { %1095 = vrot.lane.b32.xlu1 %v1091_v7, %s4256_s9  ;;  %1097 = vrot.lane.b32.xlu0 %v1092_v51, %s4256_s9  ;;  %v1219_v51 = vmul.f32 %v1217_v38, %v3664_v18 }
 0x1bd   : > { %v3632_v16 = vpop.permute.xlu1 %673  ;;  %v3634_v19 = vpop.permute.xlu0 %675 }
 0x1bf   : > { %1116 = vrot.lane.b32.xlu1 %v1112_v8, %s4257_s0  ;;  %1118 = vrot.lane.b32.xlu0 %v1113_v49, %s4257_s0  ;;  %v1220_v8 = vmul.f32 %v1217_v38, %v3666_v46  ;;  %v1261_v38 = vmul.f32 %v1259_v0, %v3664_v18 }
 0x1c1   : > { %v1301_v23 = vpop.permute.xlu1 %1300  ;;  %v3642_v61 = vpop.permute.xlu0 %694 }
 0x1c3   : > { %1137 = vrot.lane.b32.xlu1 %v1133_v14, %s4235_s13  ;;  %1139 = vrot.lane.b32.xlu0 %v1134_v58, %s4235_s13  ;;  %v1241_v58 = vmul.f32 %v1238_v47, %v3666_v46  ;;  %v1282_v47 = vmul.f32 %v1280_v57, %v3664_v18 }
 0x1c5   : > { %v3650_v34 = vpop.permute.xlu1 %696  ;;  %v1322_v37 = vpop.permute.xlu0 %1321 }
 0x1c7   : > { %1158 = vrot.lane.b32.xlu1 %v1154_v15, %s4258_s1  ;;  %1160 = vrot.lane.b32.xlu0 %v1155_v29, %s4258_s1 }
 0x1c9   : > { %v3658_v42 = vpop.permute.xlu1 %715  ;;  %v3660_v3 = vpop.permute.xlu0 %717 }
 0x1cb   : > { %1179 = vrot.lane.b32.xlu1 %v1175_v17, %s4259_s3  ;;  %1181 = vrot.lane.b32.xlu0 %v1176_v62, %s4259_s3  ;;  %v1262_v17 = vmul.f32 %v1259_v0, %v3666_v46  ;;  %v1303_v0 = vmul.f32 %v1301_v23, %v3664_v18 }
 0x1cd   : > { %v1343_v7 = vpop.permute.xlu1 %1342  ;;  %v3672_v24 = vpop.permute.xlu0 %736 }
 0x1cf   : > { %1204 = vrot.lane.b32.xlu0 %v1199_v59, %s4251_s28  ;;  %1202 = vrot.lane.b32.xlu1 %v1198_v4, %s4251_s28  ;;  %v1283_v59 = vmul.f32 %v1280_v57, %v3666_v46  ;;  %v1324_v57 = vmul.f32 %v1322_v37, %v3664_v18 }
 0x1d1   : > { %v3678_v49 = vpop.permute.xlu1 %738  ;;  %v1364_v14 = vpop.permute.xlu0 %1363 }
 0x1d3   : > { %1225 = vrot.lane.b32.xlu0 %v1220_v8, %s4252_s17  ;;  %1223 = vrot.lane.b32.xlu1 %v1219_v51, %s4252_s17 }
 0x1d5   : > { %v3684_v15 = vpop.permute.xlu1 %759  ;;  %v3686_v29 = vpop.permute.xlu0 %761 }
 0x1d7   : > { %1246 = vrot.lane.b32.xlu0 %v1241_v58, %s4253_s16  ;;  %1244 = vrot.lane.b32.xlu1 %v1240_v26, %s4253_s16  ;;  %v1304_v26 = vmul.f32 %v1301_v23, %v3666_v46  ;;  %v1345_v23 = vmul.f32 %v1343_v7, %v3664_v18 }
 0x1d9   : > { %v1385_v62 = vpop.permute.xlu1 %1384  ;;  %v3692_v4 = vpop.permute.xlu0 %780 }
 0x1db   : > { %1267 = vrot.lane.b32.xlu0 %v1262_v17, %s4242_s15  ;;  %1265 = vrot.lane.b32.xlu1 %v1261_v38, %s4242_s15  ;;  %v1325_v38 = vmul.f32 %v1322_v37, %v3666_v46  ;;  %v1366_v37 = vmul.f32 %v1364_v14, %v3664_v18 }
 0x1dd   : > { %v3698_v51 = vpop.permute.xlu1 %782  ;;  %v1406_v8 = vpop.permute.xlu0 %1405 }
 0x1df   : > { %1288 = vrot.lane.b32.xlu0 %v1283_v59, %s4244_s24  ;;  %1286 = vrot.lane.b32.xlu1 %v1282_v47, %s4244_s24  ;;  %v1346_v47 = vmul.f32 %v1343_v7, %v3666_v46  ;;  %v1387_v7 = vmul.f32 %v1385_v62, %v3664_v18 }
 0x1e1   : > { %v3704_v58 = vpop.permute.xlu1 %801  ;;  %v3706_v17 = vpop.permute.xlu0 %803 }
 0x1e3   : > { %1309 = vrot.lane.b32.xlu0 %v1304_v26, %s4245_s8  ;;  %1307 = vrot.lane.b32.xlu1 %v1303_v0, %s4245_s8  ;;  %v1367_v0 = vmul.f32 %v1364_v14, %v3666_v46  ;;  %v1408_v14 = vmul.f32 %v1406_v8, %v3664_v18 }
 0x1e5   : > { %v1427_v12 = vpop.permute.xlu1 %1426  ;;  %v3712_v59 = vpop.permute.xlu0 %822 }
 0x1e6   : > { %4260 = vst [vmem:[#allocation15_spill] sm:$0xff] %v3712_v59 }
 0x1e7   : > { %1330 = vrot.lane.b32.xlu0 %v1325_v38, %s4247_s10  ;;  %1328 = vrot.lane.b32.xlu1 %v1324_v57, %s4247_s10  ;;  %v1388_v57 = vmul.f32 %v1385_v62, %v3666_v46  ;;  %v1429_v62 = vmul.f32 %v1427_v12, %v3664_v18 }
 0x1e9   : > { %v3718_v11 = vpop.permute.xlu1 %824  ;;  %v1448_v26 = vpop.permute.xlu0 %1447 }
 0x1ea   : > { %4261 = vst [vmem:[#allocation16_spill] sm:$0xff] %v3718_v11 }
 0x1eb   : > { %1351 = vrot.lane.b32.xlu0 %v1346_v47, %s4235_s13  ;;  %1349 = vrot.lane.b32.xlu1 %v1345_v23, %s4235_s13  ;;  %v1409_v23 = vmul.f32 %v1406_v8, %v3666_v46  ;;  %v1450_v8 = vmul.f32 %v1448_v26, %v3664_v18 }
 0x1ed   : > { %v3724_v59 = vpop.permute.xlu1 %843  ;;  %v3726_v38 = vpop.permute.xlu0 %845 }
 0x1ee   : > { %4262 = vst [vmem:[#allocation17_spill] sm:$0xff] %v3724_v59  ;;  %4263 = vst [vmem:[#allocation18_spill] sm:$0xff] %v3726_v38 }
 0x1ef   : > { %1372 = vrot.lane.b32.xlu0 %v1367_v0, %s4258_s1  ;;  %1370 = vrot.lane.b32.xlu1 %v1366_v37, %s4258_s1  ;;  %v1430_v37 = vmul.f32 %v1427_v12, %v3666_v46 }
 0x1f1   : > { %v1469_v11 = vpop.permute.xlu1 %1468  ;;  %v3732_v47 = vpop.permute.xlu0 %864 }
 0x1f2   : > { %4264 = vst [vmem:[#allocation19_spill] sm:$0xff] %v3732_v47  ;;  %v1471_v12 = vmul.f32 %v1469_v11, %v3664_v18 }
 0x1f3   : > { %1393 = vrot.lane.b32.xlu0 %v1388_v57, %s4259_s3  ;;  %1391 = vrot.lane.b32.xlu1 %v1387_v7, %s4259_s3  ;;  %v1451_v7 = vmul.f32 %v1448_v26, %v3666_v46 }
 0x1f5   : > { %v3738_v38 = vpop.permute.xlu1 %866  ;;  %v1490_v0 = vpop.permute.xlu0 %1489 }
 0x1f6   : > { %4265 = vst [vmem:[#allocation20_spill] sm:$0xff] %v3738_v38  ;;  %v1492_v26 = vmul.f32 %v1490_v0, %v3664_v18 }
 0x1f7   : > { %1414 = vrot.lane.b32.xlu0 %v1409_v23, %s4250_s26  ;;  %1412 = vrot.lane.b32.xlu1 %v1408_v14, %s4250_s26  ;;  %v1472_v14 = vmul.f32 %v1469_v11, %v3666_v46 }
 0x1f9   : > { %v3744_v47 = vpop.permute.xlu1 %885  ;;  %v3746_v57 = vpop.permute.xlu0 %887 }
 0x1fa   : > { %4266 = vst [vmem:[#allocation21_spill] sm:$0xff] %v3744_v47  ;;  %4267 = vst [vmem:[#allocation22_spill] sm:$0xff] %v3746_v57 }
 0x1fb   : > { %1435 = vrot.lane.b32.xlu0 %v1430_v37, %s4251_s28  ;;  %1433 = vrot.lane.b32.xlu1 %v1429_v62, %s4251_s28  ;;  %v1493_v62 = vmul.f32 %v1490_v0, %v3666_v46 }
 0x1fd   : > { %v1511_v38 = vpop.permute.xlu1 %1510  ;;  %v3752_v23 = vpop.permute.xlu0 %906 }
 0x1fe   : > { %4268 = vst [vmem:[#allocation23_spill] sm:$0xff] %v3752_v23  ;;  %v1513_v11 = vmul.f32 %v1511_v38, %v3664_v18 }
 0x1ff   : > { %1456 = vrot.lane.b32.xlu0 %v1451_v7, %s4252_s17  ;;  %1454 = vrot.lane.b32.xlu1 %v1450_v8, %s4252_s17  ;;  %v2612_v8 = vld [vmem:[%s4160_s2] ss:$0 sm:$0xff] }
 0x200   : > { %v322_v0 = vadd.f32 %v2612_v8, %v3456_v21 }
 0x201   : > { %v3758_v57 = vpop.permute.xlu1 %908  ;;  %v1532_v37 = vpop.permute.xlu0 %1531 }
 0x202   : > { %4269 = vst [vmem:[#allocation24_spill] sm:$0xff] %v3758_v57 }
 0x203   : > { %1477 = vrot.lane.b32.xlu0 %v1472_v14, %s4253_s16  ;;  %1475 = vrot.lane.b32.xlu1 %v1471_v12, %s4253_s16  ;;  %v1514_v12 = vmul.f32 %v1511_v38, %v3666_v46 }
 0x205   : > { %v3764_v23 = vpop.permute.xlu1 %927  ;;  %v3766_v7 = vpop.permute.xlu0 %929 }
 0x206   : > { %4270 = vst [vmem:[#allocation25_spill] sm:$0xff] %v3764_v23  ;;  %4271 = vst [vmem:[#allocation26_spill] sm:$0xff] %v3766_v7  ;;  %v323_v23 = vadd.f32 %v2612_v8, %v3468_v27  ;;  %v343_v7 = vadd.f32 %v3476_v31, %v322_v0 }
 0x207   : > { %1498 = vrot.lane.b32.xlu0 %v1493_v62, %s4254_s7  ;;  %1496 = vrot.lane.b32.xlu1 %v1492_v26, %s4254_s7  ;;  %v1534_v62 = vmul.f32 %v1532_v37, %v3664_v18  ;;  %v1535_v26 = vmul.f32 %v1532_v37, %v3666_v46 }
 0x208   : > { %v344_v59 = vadd.f32 %v3470_v28, %v323_v23  ;;  %v364_v21 = vadd.f32 %v3478_v32, %v343_v7 }
 0x209   : > { %v1553_v14 = vpop.permute.xlu1 %1552  ;;  %v3775_v57 = vpop.permute.xlu0 %948 }
 0x20a   : > { %v365_v27 = vadd.f32 %v3486_v35, %v344_v59  ;;  %v1555_v8 = vmul.f32 %v1553_v14, %v3664_v18  ;;  %v1556_v31 = vmul.f32 %v1553_v14, %v3666_v46 }
 0x20b   : > { %1519 = vrot.lane.b32.xlu0 %v1514_v12, %s4255_s11  ;;  %1517 = vrot.lane.b32.xlu1 %v1513_v11, %s4255_s11  ;;  %v385_v12 = vadd.f32 %v3494_v39, %v364_v21 }
 0x20c   : > { %v386_v28 = vadd.f32 %v3488_v36, %v365_v27 }
 0x20d   : > { %v3784_v47 = vpop.permute.xlu1 %950  ;;  %v1574_v38 = vpop.permute.xlu0 %1573  ;;  %v406_v7 = vadd.f32 %v3496_v40, %v385_v12 }
 0x20e   : > { %v1576_v32 = vmul.f32 %v1574_v38, %v3664_v18  ;;  %v1577_v35 = vmul.f32 %v1574_v38, %v3666_v46  ;;  %v407_v14 = vadd.f32 %v3502_v43, %v386_v28 }
 0x20f   : > { %1540 = vrot.lane.b32.xlu0 %v1535_v26, %s4256_s9  ;;  %1538 = vrot.lane.b32.xlu1 %v1534_v62, %s4256_s9  ;;  %v427_v39 = vadd.f32 %v3512_v48, %v406_v7 }
 0x210   : > { %v428_v38 = vadd.f32 %v3504_v44, %v407_v14 }
 0x211   : > { %v3793_v11 = vpop.permute.xlu1 %969  ;;  %v3795_v37 = vpop.permute.xlu0 %971  ;;  %v448_v40 = vadd.f32 %v3514_v53, %v427_v39 }
 0x212   : > { %v449_v43 = vadd.f32 %v3520_v55, %v428_v38 }
 0x213   : > { %1561 = vrot.lane.b32.xlu0 %v1556_v31, %s4257_s0  ;;  %1559 = vrot.lane.b32.xlu1 %v1555_v8, %s4257_s0  ;;  %v469_v31 = vadd.f32 %v3528_v60, %v448_v40 }
 0x214   : > { %v470_v44 = vadd.f32 %v3522_v56, %v449_v43 }
 0x215   : > { %v1595_v59 = vpop.permute.xlu1 %1594  ;;  %v3803_v23 = vpop.permute.xlu0 %990  ;;  %v490_v55 = vadd.f32 %v3530_v63, %v469_v31 }
 0x216   : > { %v1597_v0 = vmul.f32 %v1595_v59, %v3664_v18  ;;  %v1598_v36 = vmul.f32 %v1595_v59, %v3666_v46 }
 0x217   : > { %1582 = vrot.lane.b32.xlu0 %v1577_v35, %s4235_s13  ;;  %1580 = vrot.lane.b32.xlu1 %v1576_v32, %s4235_s13 }
 0x219   : > { %v3812_v62 = vpop.permute.xlu1 %992  ;;  %v1616_v26 = vpop.permute.xlu0 %1615 }
 0x21a   : > { %v1618_v21 = vmul.f32 %v1616_v26, %v3664_v18  ;;  %v1619_v48 = vmul.f32 %v1616_v26, %v3666_v46  ;;  %v491_v18 = vadd.f32 %v3538_v2, %v470_v44  ;;  %v511_v46 = vadd.f32 %v3546_v9, %v490_v55 }
 0x21b   : > { %1603 = vrot.lane.b32.xlu0 %v1598_v36, %s4258_s1  ;;  %1601 = vrot.lane.b32.xlu1 %v1597_v0, %s4258_s1  ;;  %s4284_s1 = smov 4  }
 0x21c   : > { %v512_v60 = vadd.f32 %v3540_v5, %v491_v18  ;;  %v532_v35 = vadd.f32 %v3548_v10, %v511_v46 }
 0x21d   : > { %v3821_v27 = vpop.permute.xlu1 %1011  ;;  %v3823_v8 = vpop.permute.xlu0 %1013 }
 0x21e   : > { %v533_v56 = vadd.f32 %v3554_v13, %v512_v60  ;;  %v553_v63 = vadd.f32 %v3564_v20, %v532_v35  ;;  %v4272_v35 = vld [vmem:[#allocation15_spill] sm:$0xff] }
 0x21f   : > { %1624 = vrot.lane.b32.xlu0 %v1619_v48, %s4259_s3  ;;  %1622 = vrot.lane.b32.xlu1 %v1618_v21, %s4259_s3  ;;  %s3020_s3 = smov [#allocation9]  }
 0x220   : > { %v554_v2 = vadd.f32 %v3556_v52, %v533_v56  ;;  %v574_v39 = vadd.f32 %v3566_v22, %v553_v63  ;;  %v4273_v56 = vld [vmem:[#allocation16_spill] sm:$0xff]  ;;  %v4274_v63 = vld [vmem:[#allocation17_spill] sm:$0xff]  ;;  %s2916_s9 = sshll.u32 %s3020_s3, 4  ;;  %s2917_s9 = int_to_ptr.vmem [resolvable:$false] %s2916_s9 }
 0x221   : > { %v3829_v12 = vpop.permute.xlu1 %1032  ;;  %v3831_v53 = vpop.permute.xlu0 %1034  ;;  %s2918_s11 = scalar_lea.vmem %s2917_s9, 512 }
 0x222   : > { %v575_v5 = vadd.f32 %v3572_v25, %v554_v2  ;;  %v595_v10 = vadd.f32 %v3580_v30, %v574_v39  ;;  %v4275_v2 = vld [vmem:[#allocation18_spill] sm:$0xff] }
 0x224   : > { %v596_v13 = vadd.f32 %v3582_v33, %v575_v5  ;;  %v616_v20 = vadd.f32 %v3590_v41, %v595_v10  ;;  %v4276_v10 = vld [vmem:[#allocation19_spill] sm:$0xff] }
 0x225   : > { %v3836_v28 = vpop.permute.xlu1 %1053  ;;  %v3838_v32 = vpop.permute.xlu0 %1055 }
 0x226   : > { %v617_v52 = vadd.f32 %v3598_v45, %v596_v13  ;;  %v637_v26 = vadd.f32 %v3606_v54, %v616_v20  ;;  %v4277_v13 = vld [vmem:[#allocation20_spill] sm:$0xff]  ;;  %v4278_v20 = vld [vmem:[#allocation21_spill] sm:$0xff] }
 0x228   : > { %v638_v38 = vadd.f32 %v3608_v50, %v617_v52  ;;  %v658_v25 = vadd.f32 %v3616_v1, %v637_v26  ;;  %v4279_v52 = vld [vmem:[#allocation22_spill] sm:$0xff] }
 0x229   : > { %v3843_v59 = vpop.permute.xlu1 %1074  ;;  %v3845_v7 = vpop.permute.xlu0 %1076 }
 0x22a   : > { %v659_v30 = vadd.f32 %v3624_v6, %v638_v38  ;;  %v679_v33 = vadd.f32 %v3632_v16, %v658_v25  ;;  %v4280_v25 = vld [vmem:[#allocation23_spill] sm:$0xff] }
 0x22c   : > { %v680_v43 = vadd.f32 %v3634_v19, %v659_v30  ;;  %v700_v45 = vadd.f32 %v3642_v61, %v679_v33  ;;  %v4281_v33 = vld [vmem:[#allocation24_spill] sm:$0xff] }
 0x22d   : > { %v3849_v14 = vpop.permute.xlu1 %1095  ;;  %v3851_v9 = vpop.permute.xlu0 %1097 }
 0x22e   : > { %v701_v54 = vadd.f32 %v3650_v34, %v680_v43  ;;  %v721_v50 = vadd.f32 %v3658_v42, %v700_v45  ;;  %v4282_v45 = vld [vmem:[#allocation25_spill] sm:$0xff] }
 0x230   : > { %v722_v48 = vadd.f32 %v3660_v3, %v701_v54  ;;  %v742_v6 = vadd.f32 %v3672_v24, %v721_v50  ;;  %v4283_v50 = vld [vmem:[#allocation26_spill] sm:$0xff] }
 0x231   : > { %v3857_v0 = vpop.permute.xlu1 %1116  ;;  %v3859_v36 = vpop.permute.xlu0 %1118 }
 0x232   : > { %v743_v16 = vadd.f32 %v3678_v49, %v722_v48  ;;  %v765_v19 = vadd.f32 %v3684_v15, %v742_v6 }
 0x234   : > { %v766_v44 = vadd.f32 %v3686_v29, %v743_v16  ;;  %v786_v34 = vadd.f32 %v3692_v4, %v765_v19 }
 0x235   : > { %v3865_v40 = vpop.permute.xlu1 %1137  ;;  %v3867_v22 = vpop.permute.xlu0 %1139 }
 0x236   : > { %v787_v42 = vadd.f32 %v3698_v51, %v766_v44  ;;  %v807_v3 = vadd.f32 %v3704_v58, %v786_v34 }
 0x238   : > { %v808_v18 = vadd.f32 %v3706_v17, %v787_v42  ;;  %v828_v24 = vadd.f32 %v4272_v35, %v807_v3 }
 0x239   : > { %v3873_v21 = vpop.permute.xlu1 %1158  ;;  %v3875_v41 = vpop.permute.xlu0 %1160 }
 0x23a   : > { %v829_v49 = vadd.f32 %v4273_v56, %v808_v18  ;;  %v849_v15 = vadd.f32 %v4274_v63, %v828_v24 }
 0x23c   : > { %v850_v29 = vadd.f32 %v4275_v2, %v829_v49  ;;  %v870_v4 = vadd.f32 %v4276_v10, %v849_v15 }
 0x23d   : > { %v3881_v31 = vpop.permute.xlu1 %1179  ;;  %v3883_v1 = vpop.permute.xlu0 %1181 }
 0x23e   : > { %v871_v51 = vadd.f32 %v4277_v13, %v850_v29  ;;  %v891_v58 = vadd.f32 %v4278_v20, %v870_v4 }
 0x240   : > { %v892_v17 = vadd.f32 %v4279_v52, %v871_v51  ;;  %v912_v30 = vadd.f32 %v4280_v25, %v891_v58 }
 0x241   : > { %v1203_v55 = vpop.permute.xlu1 %1202  ;;  %v1205_v61 = vpop.permute.xlu0 %1204 }
 0x242   : > { %v913_v43 = vadd.f32 %v4281_v33, %v892_v17  ;;  %v933_v54 = vadd.f32 %v4282_v45, %v912_v30 }
 0x244   : > { %v934_v48 = vadd.f32 %v4283_v50, %v913_v43  ;;  %v954_v19 = vadd.f32 %v3775_v57, %v933_v54 }
 0x245   : > { %v1224_v46 = vpop.permute.xlu1 %1223  ;;  %v1226_v60 = vpop.permute.xlu0 %1225 }
 0x246   : > { %v955_v44 = vadd.f32 %v3784_v47, %v934_v48  ;;  %v975_v34 = vadd.f32 %v3793_v11, %v954_v19 }
 0x248   : > { %v976_v42 = vadd.f32 %v3795_v37, %v955_v44  ;;  %v996_v35 = vadd.f32 %v3803_v23, %v975_v34 }
 0x249   : > { %v1245_v39 = vpop.permute.xlu1 %1244  ;;  %v1247_v5 = vpop.permute.xlu0 %1246 }
 0x24a   : > { %v997_v24 = vadd.f32 %v3812_v62, %v976_v42  ;;  %v1017_v56 = vadd.f32 %v3821_v27, %v996_v35 }
 0x24c   : > { %v1018_v49 = vadd.f32 %v3823_v8, %v997_v24  ;;  %v1038_v57 = vadd.f32 %v3829_v12, %v1017_v56 }
 0x24d   : > { %v1266_v26 = vpop.permute.xlu1 %1265  ;;  %v1268_v38 = vpop.permute.xlu0 %1267 }
 0x24e   : > { %v1039_v47 = vadd.f32 %v3831_v53, %v1018_v49  ;;  %v1059_v11 = vadd.f32 %v3836_v28, %v1038_v57 }
 0x250   : > { %v1060_v37 = vadd.f32 %v3838_v32, %v1039_v47  ;;  %v1080_v23 = vadd.f32 %v3843_v59, %v1059_v11 }
 0x251   : > { %v1287_v6 = vpop.permute.xlu1 %1286  ;;  %v1289_v16 = vpop.permute.xlu0 %1288 }
 0x252   : > { %v1081_v62 = vadd.f32 %v3845_v7, %v1060_v37  ;;  %v1101_v27 = vadd.f32 %v3849_v14, %v1080_v23 }
 0x254   : > { %v1102_v8 = vadd.f32 %v3851_v9, %v1081_v62  ;;  %v1122_v12 = vadd.f32 %v3857_v0, %v1101_v27 }
 0x255   : > { %v1308_v3 = vpop.permute.xlu1 %1307  ;;  %v1310_v18 = vpop.permute.xlu0 %1309 }
 0x256   : > { %v1123_v53 = vadd.f32 %v3859_v36, %v1102_v8  ;;  %v1143_v28 = vadd.f32 %v3865_v40, %v1122_v12 }
 0x258   : > { %v1144_v32 = vadd.f32 %v3867_v22, %v1123_v53  ;;  %v1164_v59 = vadd.f32 %v3873_v21, %v1143_v28 }
 0x259   : > { %v1329_v63 = vpop.permute.xlu1 %1328  ;;  %v1331_v15 = vpop.permute.xlu0 %1330 }
 0x25a   : > { %v1165_v7 = vadd.f32 %v3875_v41, %v1144_v32  ;;  %v1185_v14 = vadd.f32 %v3881_v31, %v1164_v59 }
 0x25c   : > { %v1186_v9 = vadd.f32 %v3883_v1, %v1165_v7  ;;  %v1208_v52 = vadd.f32 %v1203_v55, %v1185_v14 }
 0x25d   : > { %v1350_v2 = vpop.permute.xlu1 %1349  ;;  %v1352_v29 = vpop.permute.xlu0 %1351 }
 0x25e   : > { %v1209_v0 = vadd.f32 %v1205_v61, %v1186_v9  ;;  %v1229_v17 = vadd.f32 %v1224_v46, %v1208_v52  ;;  %v2677_v52 = vld [vmem:[#allocation8] ss:$0 sm:$0xff] }
 0x260   : > { %v1230_v36 = vadd.f32 %v1226_v60, %v1209_v0  ;;  %v1250_v30 = vadd.f32 %v1245_v39, %v1229_v17  ;;  %v2678_v0 = vld [vmem:[#allocation8 + $0x1] ss:$0 sm:$0xff]  ;;  %v2679_v17 = vld [vmem:[#allocation8 + $0x2] ss:$0 sm:$0xff] }
 0x261   : > { %v1371_v10 = vpop.permute.xlu1 %1370  ;;  %v1373_v4 = vpop.permute.xlu0 %1372 }
 0x262   : > { %v1251_v22 = vadd.f32 %v1247_v5, %v1230_v36  ;;  %v1271_v33 = vadd.f32 %v1266_v26, %v1250_v30  ;;  %v2680_v36 = vld [vmem:[#allocation8 + $0x3] ss:$0 sm:$0xff]  ;;  %v2683_v30 = vld [vmem:[#allocation8 + $0x6] ss:$0 sm:$0xff] }
 0x264   : > { %v1272_v43 = vadd.f32 %v1268_v38, %v1251_v22  ;;  %v1292_v54 = vadd.f32 %v1287_v6, %v1271_v33  ;;  %v2684_v22 = vld [vmem:[#allocation8 + $0x7] ss:$0 sm:$0xff]  ;;  %v2685_v33 = vld [vmem:[#allocation8 + $0x8] ss:$0 sm:$0xff] }
 0x265   : > { %v1392_v13 = vpop.permute.xlu1 %1391  ;;  %v1394_v51 = vpop.permute.xlu0 %1393 }
 0x266   : > { %v1293_v41 = vadd.f32 %v1289_v16, %v1272_v43  ;;  %v1313_v50 = vadd.f32 %v1308_v3, %v1292_v54 }
 0x268   : > { %v1314_v31 = vadd.f32 %v1310_v18, %v1293_v41  ;;  %v1334_v19 = vadd.f32 %v1329_v63, %v1313_v50  ;;  %v4286_v41 = vld [vmem:[#allocation14_spill] sm:$0xff] }
 0x269   : > { %v1413_v20 = vpop.permute.xlu1 %1412  ;;  %v1415_v58 = vpop.permute.xlu0 %1414 }
 0x26a   : > { %v1335_v44 = vadd.f32 %v1331_v15, %v1314_v31  ;;  %v1355_v55 = vadd.f32 %v1350_v2, %v1334_v19 }
 0x26c   : > { %v1356_v61 = vadd.f32 %v1352_v29, %v1335_v44  ;;  %v1376_v34 = vadd.f32 %v1371_v10, %v1355_v55 }
 0x26d   : > { %v1434_v25 = vpop.permute.xlu1 %1433  ;;  %v1436_v40 = vpop.permute.xlu0 %1435 }
 0x26e   : > { %v1377_v42 = vadd.f32 %v1373_v4, %v1356_v61  ;;  %v1397_v39 = vadd.f32 %v1392_v13, %v1376_v34 }
 0x270   : > { %v1398_v5 = vadd.f32 %v1394_v51, %v1377_v42  ;;  %v1418_v35 = vadd.f32 %v1413_v20, %v1397_v39 }
 0x271   : > { %v1455_v45 = vpop.permute.xlu1 %1454  ;;  %v1457_v21 = vpop.permute.xlu0 %1456 }
 0x272   : > { %v1419_v24 = vadd.f32 %v1415_v58, %v1398_v5  ;;  %v1439_v6 = vadd.f32 %v1434_v25, %v1418_v35  ;;  %v2681_v25 = vld [vmem:[#allocation8 + $0x4] ss:$0 sm:$0xff] }
 0x274   : > { %v1440_v16 = vadd.f32 %v1436_v40, %v1419_v24  ;;  %v1460_v56 = vadd.f32 %v1455_v45, %v1439_v6  ;;  %v2682_v40 = vld [vmem:[#allocation8 + $0x5] ss:$0 sm:$0xff] }
 0x275   : > { %v1476_v48 = vpop.permute.xlu1 %1475  ;;  %v1478_v1 = vpop.permute.xlu0 %1477 }
 0x276   : > { %v1461_v49 = vadd.f32 %v1457_v21, %v1440_v16  ;;  %v1481_v63 = vadd.f32 %v1476_v48, %v1460_v56  ;;  %v4285_v21 = vld [vmem:[#allocation13_spill] sm:$0xff] }
 0x278   : > { %v1482_v15 = vadd.f32 %v1478_v1, %v1461_v49 }
 0x279   : > { %v1497_v46 = vpop.permute.xlu1 %1496  ;;  %v1499_v60 = vpop.permute.xlu0 %1498 }
 0x27a   : > { %v1502_v11 = vadd.f32 %v1497_v46, %v1481_v63  ;;  %v1503_v37 = vadd.f32 %v1499_v60, %v1482_v15 }
 0x27d   : > { %v1518_v26 = vpop.permute.xlu1 %1517  ;;  %v1520_v38 = vpop.permute.xlu0 %1519 }
 0x27e   : > { %v1523_v2 = vadd.f32 %v1518_v26, %v1502_v11  ;;  %v1524_v29 = vadd.f32 %v1520_v38, %v1503_v37 }
 0x281   : > { %v1539_v3 = vpop.permute.xlu1 %1538  ;;  %v1541_v18 = vpop.permute.xlu0 %1540 }
 0x282   : > { %v1544_v27 = vadd.f32 %v1539_v3, %v1523_v2  ;;  %v1545_v8 = vadd.f32 %v1541_v18, %v1524_v29 }
 0x285   : > { %v1560_v57 = vpop.permute.xlu1 %1559  ;;  %v1562_v47 = vpop.permute.xlu0 %1561 }
 0x286   : > { %v1565_v10 = vadd.f32 %v1560_v57, %v1544_v27  ;;  %v1566_v4 = vadd.f32 %v1562_v47, %v1545_v8 }
 0x289   : > { %v1581_v23 = vpop.permute.xlu1 %1580  ;;  %v1583_v62 = vpop.permute.xlu0 %1582 }
 0x28a   : > { %v1586_v28 = vadd.f32 %v1581_v23, %v1565_v10  ;;  %v1587_v32 = vadd.f32 %v1583_v62, %v1566_v4 }
 0x28d   : > { %v1602_v12 = vpop.permute.xlu1 %1601  ;;  %v1604_v53 = vpop.permute.xlu0 %1603 }
 0x28e   : > { %v1607_v13 = vadd.f32 %v1602_v12, %v1586_v28  ;;  %v1608_v51 = vadd.f32 %v1604_v53, %v1587_v32 }
 0x291   : > { %v1623_v59 = vpop.permute.xlu1 %1622  ;;  %v1625_v7 = vpop.permute.xlu0 %1624 }
 0x292   : > { %v1628_v14 = vadd.f32 %v1623_v59, %v1607_v13  ;;  %v1629_v9 = vadd.f32 %v1625_v7, %v1608_v51  ;;  %v2676_v13 = vld [vmem:[%s4162_s4] ss:$0 sm:$0xff] }
 0x294   : > { %v1630_v20 = vmax.f32 %v1628_v14, 0.0  ;;  %v1631_v58 = vmax.f32 %v1629_v9, 0.0 }
 0x296   : > { %1634 = vrot.lane.b32.xlu1 %v1630_v20, %s4233_s6  ;;  %1636 = vrot.lane.b32.xlu0 %v1631_v58, %s4233_s6 }
 0x29a   : > { %1659 = vrot.lane.b32.xlu1 %v2677_v52, %s4284_s1  ;;  %1680 = vrot.lane.b32.xlu0 %v2678_v0, %s4233_s6 }
 0x29e   : > { %1701 = vrot.lane.b32.xlu1 %v2679_v17, %s4234_s30  ;;  %1722 = vrot.lane.b32.xlu0 %v2680_v36, %s4284_s1 }
 0x2a2   : > { %1743 = vrot.lane.b32.xlu1 %v2681_v25, %s4233_s6  ;;  %1764 = vrot.lane.b32.xlu0 %v2682_v40, %s4234_s30 }
 0x2a6   : > { %1787 = vrot.lane.b32.xlu1 %v2683_v30, %s4284_s1  ;;  %1808 = vrot.lane.b32.xlu0 %v2684_v22, %s4233_s6 }
 0x2aa   : > { %1829 = vrot.lane.b32.xlu1 %v2685_v33, %s4234_s30 }
 0x308   : > { %v1635_v43 = vpop.permute.xlu1 %1634  ;;  %v1637_v45 = vpop.permute.xlu0 %1636 }
 0x309   : > { %v1640_v54 = vadd.f32 %v1635_v43, %v4285_v21  ;;  %v1641_v50 = vadd.f32 %v1637_v45, %v4286_v41 }
 0x30b   : > { %1642 = vst.msk [vmem:[#allocation2 + $0x8] sm:$0xff] %vm291_vm3, %v1640_v54  ;;  %1643 = vst.msk [vmem:[#allocation2 + $0x10] sm:$0xff] %vm291_vm3, %v1641_v50 }
 0x30c   : > { %v1660_v48 = vpop.permute.xlu1 %1659  ;;  %v1681_v55 = vpop.permute.xlu0 %1680 }
 0x310   : > { %v1702_v60 = vpop.permute.xlu1 %1701  ;;  %v1723_v26 = vpop.permute.xlu0 %1722 }
 0x312   : > { %v1651_v31 = vld [vmem:[#allocation2 + $0x7] sm:$0xff]  ;;  %v1652_v1 = vld [vmem:[#allocation2 + $0xf] sm:$0xff] }
 0x313   : > { %v1662_v19 = vmul.f32 %v1660_v48, %v1651_v31  ;;  %v1663_v44 = vmul.f32 %v1660_v48, %v1652_v1  ;;  %v1683_v61 = vmul.f32 %v1681_v55, %v1651_v31  ;;  %v1684_v46 = vmul.f32 %v1681_v55, %v1652_v1  ;;  %v3948_v39 = vld [vmem:[#allocation2 + $0x8] sm:$0xff]  ;;  %v3950_v5 = vld [vmem:[#allocation2 + $0x10] sm:$0xff] }
 0x314   : > { %v1704_v34 = vmul.f32 %v1702_v60, %v1651_v31  ;;  %v1705_v42 = vmul.f32 %v1702_v60, %v1652_v1  ;;  %v1725_v38 = vmul.f32 %v1723_v26, %v3948_v39  ;;  %v1726_v35 = vmul.f32 %v1723_v26, %v3950_v5  ;;  %v1744_v24 = vpop.permute.xlu1 %1743  ;;  %v1765_v3 = vpop.permute.xlu0 %1764  ;;  %v1779_v63 = vld [vmem:[#allocation2 + $0x9] sm:$0xff]  ;;  %v1780_v15 = vld [vmem:[#allocation2 + $0x11] sm:$0xff] }
 0x315   : > { %1666 = vrot.lane.b32.xlu0 %v1662_v19, %s4242_s15  ;;  %1668 = vrot.lane.b32.xlu1 %v1663_v44, %s4242_s15  ;;  %v1746_v6 = vmul.f32 %v1744_v24, %v3948_v39  ;;  %v1747_v16 = vmul.f32 %v1744_v24, %v3950_v5  ;;  %v1767_v18 = vmul.f32 %v1765_v3, %v3948_v39  ;;  %v2687_v60 = vld [vmem:[#allocation8 + $0x9] ss:$0 sm:$0xff]  ;;  %v2690_v26 = vld [vmem:[#allocation8 + $0xc] ss:$0 sm:$0xff]  ;;  %v2693_v24 = vld [vmem:[#allocation8 + $0xf] ss:$0 sm:$0xff] }
 0x316   : > { %v1768_v56 = vmul.f32 %v1765_v3, %v3950_v5 }
 0x318   : > { %v1788_v49 = vpop.permute.xlu1 %1787  ;;  %v1809_v11 = vpop.permute.xlu0 %1808 }
 0x319   : > { %1687 = vrot.lane.b32.xlu0 %v1683_v61, %s4250_s26  ;;  %1689 = vrot.lane.b32.xlu1 %v1684_v46, %s4250_s26  ;;  %v1790_v57 = vmul.f32 %v1788_v49, %v1779_v63  ;;  %v1791_v47 = vmul.f32 %v1788_v49, %v1780_v15  ;;  %v1811_v37 = vmul.f32 %v1809_v11, %v1779_v63 }
 0x31a   : > { %v1812_v2 = vmul.f32 %v1809_v11, %v1780_v15 }
 0x31c   : > { %v1830_v29 = vpop.permute.xlu1 %1829 }
 0x31d   : > { %1708 = vrot.lane.b32.xlu0 %v1704_v34, %s4257_s0  ;;  %1710 = vrot.lane.b32.xlu1 %v1705_v42, %s4257_s0  ;;  %v1832_v23 = vmul.f32 %v1830_v29, %v1779_v63  ;;  %v1833_v62 = vmul.f32 %v1830_v29, %v1780_v15  ;;  %v2688_v34 = vld [vmem:[#allocation8 + $0xa] ss:$0 sm:$0xff]  ;;  %v2689_v42 = vld [vmem:[#allocation8 + $0xb] ss:$0 sm:$0xff] }
 0x321   : > { %1729 = vrot.lane.b32.xlu0 %v1725_v38, %s4242_s15  ;;  %1731 = vrot.lane.b32.xlu1 %v1726_v35, %s4242_s15  ;;  %v2691_v38 = vld [vmem:[#allocation8 + $0xd] ss:$0 sm:$0xff]  ;;  %v2692_v35 = vld [vmem:[#allocation8 + $0xe] ss:$0 sm:$0xff] }
 0x325   : > { %1750 = vrot.lane.b32.xlu0 %v1746_v6, %s4250_s26  ;;  %1752 = vrot.lane.b32.xlu1 %v1747_v16, %s4250_s26  ;;  %v2694_v6 = vld [vmem:[#allocation8 + $0x10] ss:$0 sm:$0xff]  ;;  %v2695_v16 = vld [vmem:[#allocation8 + $0x11] ss:$0 sm:$0xff] }
 0x329   : > { %1771 = vrot.lane.b32.xlu0 %v1767_v18, %s4257_s0  ;;  %1773 = vrot.lane.b32.xlu1 %v1768_v56, %s4257_s0 }
 0x32d   : > { %1794 = vrot.lane.b32.xlu0 %v1790_v57, %s4242_s15  ;;  %1796 = vrot.lane.b32.xlu1 %v1791_v47, %s4242_s15 }
 0x331   : > { %1815 = vrot.lane.b32.xlu0 %v1811_v37, %s4250_s26  ;;  %1817 = vrot.lane.b32.xlu1 %v1812_v2, %s4250_s26 }
 0x335   : > { %1836 = vrot.lane.b32.xlu0 %v1832_v23, %s4257_s0  ;;  %1838 = vrot.lane.b32.xlu1 %v1833_v62, %s4257_s0 }
 0x387   : > { %v1667_v27 = vpop.permute.xlu0 %1666  ;;  %v1669_v8 = vpop.permute.xlu1 %1668 }
 0x388   : > { %v1672_v59 = vadd.f32 %v2676_v13, %v1667_v27  ;;  %v1673_v14 = vadd.f32 %v2676_v13, %v1669_v8 }
 0x38b   : > { %v1688_v10 = vpop.permute.xlu0 %1687  ;;  %v1690_v4 = vpop.permute.xlu1 %1689 }
 0x38c   : > { %v1693_v9 = vadd.f32 %v1688_v10, %v1672_v59  ;;  %v1694_v20 = vadd.f32 %v1690_v4, %v1673_v14 }
 0x38f   : > { %v1709_v12 = vpop.permute.xlu0 %1708  ;;  %v1711_v53 = vpop.permute.xlu1 %1710 }
 0x390   : > { %v1714_v52 = vadd.f32 %v1709_v12, %v1693_v9  ;;  %v1715_v17 = vadd.f32 %v1711_v53, %v1694_v20 }
 0x393   : > { %v1730_v28 = vpop.permute.xlu0 %1729  ;;  %v1732_v32 = vpop.permute.xlu1 %1731 }
 0x394   : > { %v1735_v36 = vadd.f32 %v1730_v28, %v1714_v52  ;;  %v1736_v25 = vadd.f32 %v1732_v32, %v1715_v17 }
 0x397   : > { %v1751_v51 = vpop.permute.xlu0 %1750  ;;  %v1753_v7 = vpop.permute.xlu1 %1752 }
 0x398   : > { %v1756_v30 = vadd.f32 %v1751_v51, %v1735_v36  ;;  %v1757_v33 = vadd.f32 %v1753_v7, %v1736_v25 }
 0x39b   : > { %v1772_v58 = vpop.permute.xlu0 %1771  ;;  %v1774_v0 = vpop.permute.xlu1 %1773 }
 0x39c   : > { %v1777_v43 = vadd.f32 %v1772_v58, %v1756_v30  ;;  %v1778_v45 = vadd.f32 %v1774_v0, %v1757_v33 }
 0x39f   : > { %v1795_v40 = vpop.permute.xlu0 %1794  ;;  %v1797_v22 = vpop.permute.xlu1 %1796 }
 0x3a0   : > { %v1800_v54 = vadd.f32 %v1795_v40, %v1777_v43  ;;  %v1801_v50 = vadd.f32 %v1797_v22, %v1778_v45 }
 0x3a3   : > { %v1816_v21 = vpop.permute.xlu0 %1815  ;;  %v1818_v41 = vpop.permute.xlu1 %1817 }
 0x3a4   : > { %v1821_v31 = vadd.f32 %v1816_v21, %v1800_v54  ;;  %v1822_v48 = vadd.f32 %v1818_v41, %v1801_v50  ;;  %v2686_v41 = vld [vmem:[%s4162_s4 + $0x1] ss:$0 sm:$0xff] }
 0x3a7   : > { %v1837_v1 = vpop.permute.xlu0 %1836  ;;  %v1839_v19 = vpop.permute.xlu1 %1838 }
 0x3a8   : > { %v1842_v44 = vadd.f32 %v1837_v1, %v1821_v31  ;;  %v1843_v55 = vadd.f32 %v1839_v19, %v1822_v48 }
 0x3aa   : > { %v1844_v61 = vmax.f32 %v1842_v44, 0.0  ;;  %v1845_v46 = vmax.f32 %v1843_v55, 0.0 }
 0x3ac   : > { %1848 = vrot.lane.b32.xlu0 %v1844_v61, %s4233_s6  ;;  %1850 = vrot.lane.b32.xlu1 %v1845_v46, %s4233_s6 }
 0x3b0   : > { %1873 = vrot.lane.b32.xlu0 %v2687_v60, %s4284_s1  ;;  %1894 = vrot.lane.b32.xlu1 %v2688_v34, %s4233_s6 }
 0x3b4   : > { %1915 = vrot.lane.b32.xlu0 %v2689_v42, %s4234_s30  ;;  %1936 = vrot.lane.b32.xlu1 %v2690_v26, %s4284_s1 }
 0x3b8   : > { %1957 = vrot.lane.b32.xlu0 %v2691_v38, %s4233_s6  ;;  %1978 = vrot.lane.b32.xlu1 %v2692_v35, %s4234_s30 }
 0x3bc   : > { %2001 = vrot.lane.b32.xlu0 %v2693_v24, %s4284_s1  ;;  %2022 = vrot.lane.b32.xlu1 %v2694_v6, %s4233_s6 }
 0x3c0   : > { %2043 = vrot.lane.b32.xlu0 %v2695_v16, %s4234_s30 }
 0x41e   : > { %v1849_v3 = vpop.permute.xlu0 %1848  ;;  %v1851_v18 = vpop.permute.xlu1 %1850 }
 0x41f   : > { %v1854_v56 = vadd.f32 %v1849_v3, %v3948_v39  ;;  %v1855_v49 = vadd.f32 %v1851_v18, %v3950_v5 }
 0x421   : > { %1856 = vst.msk [vmem:[#allocation2 + $0x8] sm:$0xff] %vm291_vm3, %v1854_v56  ;;  %1857 = vst.msk [vmem:[#allocation2 + $0x10] sm:$0xff] %vm291_vm3, %v1855_v49 }
 0x422   : > { %v1874_v15 = vpop.permute.xlu0 %1873  ;;  %v1895_v37 = vpop.permute.xlu1 %1894 }
 0x426   : > { %v1916_v39 = vpop.permute.xlu0 %1915  ;;  %v1937_v8 = vpop.permute.xlu1 %1936 }
 0x428   : > { %v1865_v63 = vld [vmem:[#allocation2 + $0x7] sm:$0xff]  ;;  %v1866_v57 = vld [vmem:[#allocation2 + $0xf] sm:$0xff] }
 0x429   : > { %v1876_v47 = vmul.f32 %v1874_v15, %v1865_v63  ;;  %v1877_v11 = vmul.f32 %v1874_v15, %v1866_v57  ;;  %v1897_v2 = vmul.f32 %v1895_v37, %v1865_v63  ;;  %v1898_v29 = vmul.f32 %v1895_v37, %v1866_v57  ;;  %v3994_v23 = vld [vmem:[#allocation2 + $0x8] sm:$0xff]  ;;  %v3996_v27 = vld [vmem:[#allocation2 + $0x10] sm:$0xff] }
 0x42a   : > { %v1918_v5 = vmul.f32 %v1916_v39, %v1865_v63  ;;  %v1919_v62 = vmul.f32 %v1916_v39, %v1866_v57  ;;  %v1939_v10 = vmul.f32 %v1937_v8, %v3994_v23  ;;  %v1940_v4 = vmul.f32 %v1937_v8, %v3996_v27  ;;  %v1958_v12 = vpop.permute.xlu0 %1957  ;;  %v1979_v28 = vpop.permute.xlu1 %1978  ;;  %v1993_v7 = vld [vmem:[#allocation2 + $0x9] sm:$0xff]  ;;  %v1994_v14 = vld [vmem:[#allocation2 + $0x11] sm:$0xff] }
 0x42b   : > { %1880 = vrot.lane.b32.xlu1 %v1876_v47, %s4242_s15  ;;  %1882 = vrot.lane.b32.xlu0 %v1877_v11, %s4242_s15  ;;  %v1960_v53 = vmul.f32 %v1958_v12, %v3994_v23  ;;  %v1961_v32 = vmul.f32 %v1958_v12, %v3996_v27  ;;  %v1981_v13 = vmul.f32 %v1979_v28, %v3994_v23  ;;  %v2697_v39 = vld [vmem:[#allocation8 + $0x12] ss:$0 sm:$0xff]  ;;  %v2700_v8 = vld [vmem:[#allocation8 + $0x15] ss:$0 sm:$0xff]  ;;  %v2703_v12 = vld [vmem:[#allocation8 + $0x18] ss:$0 sm:$0xff] }
 0x42c   : > { %v1982_v51 = vmul.f32 %v1979_v28, %v3996_v27  ;;  %v2705_v28 = vld [vmem:[#allocation8 + $0x1a] ss:$0 sm:$0xff] }
 0x42e   : > { %v2002_v59 = vpop.permute.xlu0 %2001  ;;  %v2023_v20 = vpop.permute.xlu1 %2022 }
 0x42f   : > { %1901 = vrot.lane.b32.xlu1 %v1897_v2, %s4250_s26  ;;  %1903 = vrot.lane.b32.xlu0 %v1898_v29, %s4250_s26  ;;  %v2004_v9 = vmul.f32 %v2002_v59, %v1993_v7  ;;  %v2005_v58 = vmul.f32 %v2002_v59, %v1994_v14  ;;  %v2025_v52 = vmul.f32 %v2023_v20, %v1993_v7 }
 0x430   : > { %v2026_v0 = vmul.f32 %v2023_v20, %v1994_v14 }
 0x432   : > { %v2044_v17 = vpop.permute.xlu0 %2043 }
 0x433   : > { %1922 = vrot.lane.b32.xlu1 %v1918_v5, %s4257_s0  ;;  %1924 = vrot.lane.b32.xlu0 %v1919_v62, %s4257_s0  ;;  %v2046_v36 = vmul.f32 %v2044_v17, %v1993_v7  ;;  %v2047_v25 = vmul.f32 %v2044_v17, %v1994_v14  ;;  %v2698_v5 = vld [vmem:[#allocation8 + $0x13] ss:$0 sm:$0xff]  ;;  %v2699_v62 = vld [vmem:[#allocation8 + $0x14] ss:$0 sm:$0xff] }
 0x437   : > { %1943 = vrot.lane.b32.xlu1 %v1939_v10, %s4242_s15  ;;  %1945 = vrot.lane.b32.xlu0 %v1940_v4, %s4242_s15  ;;  %v2701_v10 = vld [vmem:[#allocation8 + $0x16] ss:$0 sm:$0xff]  ;;  %v2702_v4 = vld [vmem:[#allocation8 + $0x17] ss:$0 sm:$0xff] }
 0x43b   : > { %1964 = vrot.lane.b32.xlu1 %v1960_v53, %s4250_s26  ;;  %1966 = vrot.lane.b32.xlu0 %v1961_v32, %s4250_s26  ;;  %v2704_v53 = vld [vmem:[#allocation8 + $0x19] ss:$0 sm:$0xff] }
 0x43f   : > { %1985 = vrot.lane.b32.xlu1 %v1981_v13, %s4257_s0  ;;  %1987 = vrot.lane.b32.xlu0 %v1982_v51, %s4257_s0 }
 0x443   : > { %2008 = vrot.lane.b32.xlu1 %v2004_v9, %s4242_s15  ;;  %2010 = vrot.lane.b32.xlu0 %v2005_v58, %s4242_s15 }
 0x447   : > { %2029 = vrot.lane.b32.xlu1 %v2025_v52, %s4250_s26  ;;  %2031 = vrot.lane.b32.xlu0 %v2026_v0, %s4250_s26 }
 0x44b   : > { %2050 = vrot.lane.b32.xlu1 %v2046_v36, %s4257_s0  ;;  %2052 = vrot.lane.b32.xlu0 %v2047_v25, %s4257_s0 }
 0x49d   : > { %v1881_v40 = vpop.permute.xlu1 %1880  ;;  %v1883_v30 = vpop.permute.xlu0 %1882 }
 0x49e   : > { %v1886_v31 = vadd.f32 %v2686_v41, %v1881_v40  ;;  %v1887_v1 = vadd.f32 %v2686_v41, %v1883_v30 }
 0x4a1   : > { %v1902_v22 = vpop.permute.xlu1 %1901  ;;  %v1904_v33 = vpop.permute.xlu0 %1903 }
 0x4a2   : > { %v1907_v19 = vadd.f32 %v1902_v22, %v1886_v31  ;;  %v1908_v44 = vadd.f32 %v1904_v33, %v1887_v1 }
 0x4a5   : > { %v1923_v43 = vpop.permute.xlu1 %1922  ;;  %v1925_v45 = vpop.permute.xlu0 %1924 }
 0x4a6   : > { %v1928_v61 = vadd.f32 %v1923_v43, %v1907_v19  ;;  %v1929_v60 = vadd.f32 %v1925_v45, %v1908_v44 }
 0x4a9   : > { %v1944_v21 = vpop.permute.xlu1 %1943  ;;  %v1946_v54 = vpop.permute.xlu0 %1945 }
 0x4aa   : > { %v1949_v34 = vadd.f32 %v1944_v21, %v1928_v61  ;;  %v1950_v42 = vadd.f32 %v1946_v54, %v1929_v60 }
 0x4ad   : > { %v1965_v50 = vpop.permute.xlu1 %1964  ;;  %v1967_v48 = vpop.permute.xlu0 %1966 }
 0x4ae   : > { %v1970_v38 = vadd.f32 %v1965_v50, %v1949_v34  ;;  %v1971_v24 = vadd.f32 %v1967_v48, %v1950_v42 }
 0x4b1   : > { %v1986_v55 = vpop.permute.xlu1 %1985  ;;  %v1988_v46 = vpop.permute.xlu0 %1987 }
 0x4b2   : > { %v1991_v6 = vadd.f32 %v1986_v55, %v1970_v38  ;;  %v1992_v16 = vadd.f32 %v1988_v46, %v1971_v24 }
 0x4b5   : > { %v2009_v26 = vpop.permute.xlu1 %2008  ;;  %v2011_v35 = vpop.permute.xlu0 %2010 }
 0x4b6   : > { %v2014_v18 = vadd.f32 %v2009_v26, %v1991_v6  ;;  %v2015_v49 = vadd.f32 %v2011_v35, %v1992_v16 }
 0x4b9   : > { %v2030_v3 = vpop.permute.xlu1 %2029  ;;  %v2032_v56 = vpop.permute.xlu0 %2031 }
 0x4ba   : > { %v2035_v63 = vadd.f32 %v2030_v3, %v2014_v18  ;;  %v2036_v15 = vadd.f32 %v2032_v56, %v2015_v49  ;;  %v2696_v56 = vld [vmem:[%s4162_s4 + $0x2] ss:$0 sm:$0xff] }
 0x4bd   : > { %v2051_v57 = vpop.permute.xlu1 %2050  ;;  %v2053_v11 = vpop.permute.xlu0 %2052 }
 0x4be   : > { %v2056_v47 = vadd.f32 %v2051_v57, %v2035_v63  ;;  %v2057_v37 = vadd.f32 %v2053_v11, %v2036_v15 }
 0x4c0   : > { %v2058_v2 = vmax.f32 %v2056_v47, 0.0  ;;  %v2059_v29 = vmax.f32 %v2057_v37, 0.0 }
 0x4c2   : > { %2062 = vrot.lane.b32.xlu1 %v2058_v2, %s4233_s6  ;;  %2064 = vrot.lane.b32.xlu0 %v2059_v29, %s4233_s6 }
 0x4c6   : > { %2087 = vrot.lane.b32.xlu1 %v2697_v39, %s4284_s1  ;;  %2108 = vrot.lane.b32.xlu0 %v2698_v5, %s4233_s6 }
 0x4ca   : > { %2129 = vrot.lane.b32.xlu1 %v2699_v62, %s4234_s30  ;;  %2150 = vrot.lane.b32.xlu0 %v2700_v8, %s4284_s1 }
 0x4ce   : > { %2171 = vrot.lane.b32.xlu1 %v2701_v10, %s4233_s6  ;;  %2192 = vrot.lane.b32.xlu0 %v2702_v4, %s4234_s30 }
 0x4d2   : > { %2215 = vrot.lane.b32.xlu1 %v2703_v12, %s4284_s1  ;;  %2236 = vrot.lane.b32.xlu0 %v2704_v53, %s4233_s6 }
 0x4d6   : > { %2257 = vrot.lane.b32.xlu1 %v2705_v28, %s4234_s30 }
 0x534   : > { %v2063_v32 = vpop.permute.xlu1 %2062  ;;  %v2065_v51 = vpop.permute.xlu0 %2064 }
 0x535   : > { %v2068_v13 = vadd.f32 %v2063_v32, %v3994_v23  ;;  %v2069_v59 = vadd.f32 %v2065_v51, %v3996_v27 }
 0x537   : > { %2070 = vst.msk [vmem:[#allocation2 + $0x8] sm:$0xff] %vm291_vm3, %v2068_v13  ;;  %2071 = vst.msk [vmem:[#allocation2 + $0x10] sm:$0xff] %vm291_vm3, %v2069_v59 }
 0x538   : > { %v2088_v14 = vpop.permute.xlu1 %2087  ;;  %v2109_v52 = vpop.permute.xlu0 %2108 }
 0x53c   : > { %v2130_v23 = vpop.permute.xlu1 %2129  ;;  %v2151_v30 = vpop.permute.xlu0 %2150 }
 0x53e   : > { %v2079_v7 = vld [vmem:[#allocation2 + $0x7] sm:$0xff]  ;;  %v2080_v9 = vld [vmem:[#allocation2 + $0xf] sm:$0xff] }
 0x53f   : > { %v2090_v20 = vmul.f32 %v2088_v14, %v2079_v7  ;;  %v2091_v58 = vmul.f32 %v2088_v14, %v2080_v9  ;;  %v2111_v0 = vmul.f32 %v2109_v52, %v2079_v7  ;;  %v2112_v17 = vmul.f32 %v2109_v52, %v2080_v9  ;;  %v4040_v25 = vld [vmem:[#allocation2 + $0x8] sm:$0xff]  ;;  %v4042_v40 = vld [vmem:[#allocation2 + $0x10] sm:$0xff] }
 0x540   : > { %v2132_v27 = vmul.f32 %v2130_v23, %v2079_v7  ;;  %v2133_v36 = vmul.f32 %v2130_v23, %v2080_v9  ;;  %v2153_v22 = vmul.f32 %v2151_v30, %v4040_v25  ;;  %v2154_v33 = vmul.f32 %v2151_v30, %v4042_v40  ;;  %v2172_v43 = vpop.permute.xlu1 %2171  ;;  %v2193_v54 = vpop.permute.xlu0 %2192  ;;  %v2207_v48 = vld [vmem:[#allocation2 + $0x9] sm:$0xff]  ;;  %v2208_v1 = vld [vmem:[#allocation2 + $0x11] sm:$0xff]  ;;  %v2707_v23 = vld [vmem:[#allocation8 + $0x1b] ss:$0 sm:$0xff] }
 0x541   : > { %2094 = vrot.lane.b32.xlu0 %v2090_v20, %s4242_s15  ;;  %2096 = vrot.lane.b32.xlu1 %v2091_v58, %s4242_s15  ;;  %v2174_v45 = vmul.f32 %v2172_v43, %v4040_v25  ;;  %v2175_v21 = vmul.f32 %v2172_v43, %v4042_v40  ;;  %v2195_v41 = vmul.f32 %v2193_v54, %v4040_v25  ;;  %v2710_v30 = vld [vmem:[#allocation8 + $0x1e] ss:$0 sm:$0xff]  ;;  %v2713_v43 = vld [vmem:[#allocation8 + $0x21] ss:$0 sm:$0xff] }
 0x542   : > { %v2196_v50 = vmul.f32 %v2193_v54, %v4042_v40 }
 0x544   : > { %v2216_v31 = vpop.permute.xlu1 %2215  ;;  %v2237_v55 = vpop.permute.xlu0 %2236 }
 0x545   : > { %2115 = vrot.lane.b32.xlu0 %v2111_v0, %s4250_s26  ;;  %2117 = vrot.lane.b32.xlu1 %v2112_v17, %s4250_s26  ;;  %v2218_v19 = vmul.f32 %v2216_v31, %v2207_v48  ;;  %v2219_v44 = vmul.f32 %v2216_v31, %v2208_v1  ;;  %v2239_v61 = vmul.f32 %v2237_v55, %v2207_v48 }
 0x546   : > { %v2240_v46 = vmul.f32 %v2237_v55, %v2208_v1 }
 0x548   : > { %v2258_v60 = vpop.permute.xlu1 %2257 }
 0x549   : > { %2136 = vrot.lane.b32.xlu0 %v2132_v27, %s4257_s0  ;;  %2138 = vrot.lane.b32.xlu1 %v2133_v36, %s4257_s0  ;;  %v2260_v34 = vmul.f32 %v2258_v60, %v2207_v48  ;;  %v2261_v42 = vmul.f32 %v2258_v60, %v2208_v1  ;;  %v2708_v27 = vld [vmem:[#allocation8 + $0x1c] ss:$0 sm:$0xff]  ;;  %v2709_v36 = vld [vmem:[#allocation8 + $0x1d] ss:$0 sm:$0xff] }
 0x54d   : > { %2157 = vrot.lane.b32.xlu0 %v2153_v22, %s4242_s15  ;;  %2159 = vrot.lane.b32.xlu1 %v2154_v33, %s4242_s15  ;;  %v2711_v22 = vld [vmem:[#allocation8 + $0x1f] ss:$0 sm:$0xff]  ;;  %v2712_v33 = vld [vmem:[#allocation8 + $0x20] ss:$0 sm:$0xff] }
 0x551   : > { %2178 = vrot.lane.b32.xlu0 %v2174_v45, %s4250_s26  ;;  %2180 = vrot.lane.b32.xlu1 %v2175_v21, %s4250_s26  ;;  %v2714_v45 = vld [vmem:[#allocation8 + $0x22] ss:$0 sm:$0xff]  ;;  %v2715_v21 = vld [vmem:[#allocation8 + $0x23] ss:$0 sm:$0xff] }
 0x555   : > { %2199 = vrot.lane.b32.xlu0 %v2195_v41, %s4257_s0  ;;  %2201 = vrot.lane.b32.xlu1 %v2196_v50, %s4257_s0 }
 0x559   : > { %2222 = vrot.lane.b32.xlu0 %v2218_v19, %s4242_s15  ;;  %2224 = vrot.lane.b32.xlu1 %v2219_v44, %s4242_s15 }
 0x55d   : > { %2243 = vrot.lane.b32.xlu0 %v2239_v61, %s4250_s26  ;;  %2245 = vrot.lane.b32.xlu1 %v2240_v46, %s4250_s26 }
 0x561   : > { %2264 = vrot.lane.b32.xlu0 %v2260_v34, %s4257_s0  ;;  %2266 = vrot.lane.b32.xlu1 %v2261_v42, %s4257_s0 }
 0x5b3   : > { %v2095_v26 = vpop.permute.xlu0 %2094  ;;  %v2097_v38 = vpop.permute.xlu1 %2096 }
 0x5b4   : > { %v2100_v63 = vadd.f32 %v2696_v56, %v2095_v26  ;;  %v2101_v57 = vadd.f32 %v2696_v56, %v2097_v38 }
 0x5b7   : > { %v2116_v35 = vpop.permute.xlu0 %2115  ;;  %v2118_v24 = vpop.permute.xlu1 %2117 }
 0x5b8   : > { %v2121_v47 = vadd.f32 %v2116_v35, %v2100_v63  ;;  %v2122_v11 = vadd.f32 %v2118_v24, %v2101_v57 }
 0x5bb   : > { %v2137_v6 = vpop.permute.xlu0 %2136  ;;  %v2139_v16 = vpop.permute.xlu1 %2138 }
 0x5bc   : > { %v2142_v2 = vadd.f32 %v2137_v6, %v2121_v47  ;;  %v2143_v39 = vadd.f32 %v2139_v16, %v2122_v11 }
 0x5bf   : > { %v2158_v3 = vpop.permute.xlu0 %2157  ;;  %v2160_v18 = vpop.permute.xlu1 %2159 }
 0x5c0   : > { %v2163_v5 = vadd.f32 %v2158_v3, %v2142_v2  ;;  %v2164_v62 = vadd.f32 %v2160_v18, %v2143_v39 }
 0x5c3   : > { %v2179_v49 = vpop.permute.xlu0 %2178  ;;  %v2181_v15 = vpop.permute.xlu1 %2180 }
 0x5c4   : > { %v2184_v10 = vadd.f32 %v2179_v49, %v2163_v5  ;;  %v2185_v12 = vadd.f32 %v2181_v15, %v2164_v62 }
 0x5c7   : > { %v2200_v37 = vpop.permute.xlu0 %2199  ;;  %v2202_v29 = vpop.permute.xlu1 %2201 }
 0x5c8   : > { %v2205_v53 = vadd.f32 %v2200_v37, %v2184_v10  ;;  %v2206_v28 = vadd.f32 %v2202_v29, %v2185_v12 }
 0x5cb   : > { %v2223_v8 = vpop.permute.xlu0 %2222  ;;  %v2225_v4 = vpop.permute.xlu1 %2224 }
 0x5cc   : > { %v2228_v13 = vadd.f32 %v2223_v8, %v2205_v53  ;;  %v2229_v59 = vadd.f32 %v2225_v4, %v2206_v28 }
 0x5cf   : > { %v2244_v32 = vpop.permute.xlu0 %2243  ;;  %v2246_v51 = vpop.permute.xlu1 %2245 }
 0x5d0   : > { %v2249_v7 = vadd.f32 %v2244_v32, %v2228_v13  ;;  %v2250_v14 = vadd.f32 %v2246_v51, %v2229_v59  ;;  %v2706_v51 = vld [vmem:[%s4162_s4 + $0x3] ss:$0 sm:$0xff] }
 0x5d3   : > { %v2265_v9 = vpop.permute.xlu0 %2264  ;;  %v2267_v20 = vpop.permute.xlu1 %2266 }
 0x5d4   : > { %v2270_v58 = vadd.f32 %v2265_v9, %v2249_v7  ;;  %v2271_v52 = vadd.f32 %v2267_v20, %v2250_v14 }
 0x5d6   : > { %v2272_v0 = vmax.f32 %v2270_v58, 0.0  ;;  %v2273_v17 = vmax.f32 %v2271_v52, 0.0 }
 0x5d8   : > { %2276 = vrot.lane.b32.xlu0 %v2272_v0, %s4233_s6  ;;  %2278 = vrot.lane.b32.xlu1 %v2273_v17, %s4233_s6 }
 0x5dc   : > { %2299 = vrot.lane.b32.xlu0 %v2707_v23, %s4284_s1  ;;  %2320 = vrot.lane.b32.xlu1 %v2708_v27, %s4233_s6 }
 0x5e0   : > { %2341 = vrot.lane.b32.xlu0 %v2709_v36, %s4234_s30  ;;  %2364 = vrot.lane.b32.xlu1 %v2710_v30, %s4284_s1 }
 0x5e4   : > { %2385 = vrot.lane.b32.xlu0 %v2711_v22, %s4233_s6  ;;  %2406 = vrot.lane.b32.xlu1 %v2712_v33, %s4234_s30 }
 0x5e8   : > { %2429 = vrot.lane.b32.xlu0 %v2713_v43, %s4284_s1  ;;  %2450 = vrot.lane.b32.xlu1 %v2714_v45, %s4233_s6 }
 0x5ec   : > { %2471 = vrot.lane.b32.xlu0 %v2715_v21, %s4234_s30 }
 0x64a   : > { %v2277_v54 = vpop.permute.xlu0 %2276  ;;  %v2279_v41 = vpop.permute.xlu1 %2278 }
 0x64b   : > { %v2282_v50 = vadd.f32 %v2277_v54, %v4040_v25  ;;  %v2283_v31 = vadd.f32 %v2279_v41, %v4042_v40 }
 0x64d   : > { %2284 = vst.msk [vmem:[#allocation2 + $0x8] sm:$0xff] %vm291_vm3, %v2282_v50  ;;  %2285 = vst.msk [vmem:[#allocation2 + $0x10] sm:$0xff] %vm291_vm3, %v2283_v31 }
 0x64e   : > { %v2300_v1 = vpop.permute.xlu0 %2299  ;;  %v2321_v61 = vpop.permute.xlu1 %2320 }
 0x652   : > { %v2342_v25 = vpop.permute.xlu0 %2341  ;;  %v2365_v38 = vpop.permute.xlu1 %2364 }
 0x654   : > { %v2291_v48 = vld [vmem:[#allocation2 + $0x7] sm:$0xff]  ;;  %v2292_v19 = vld [vmem:[#allocation2 + $0xf] sm:$0xff] }
 0x655   : > { %v2302_v44 = vmul.f32 %v2300_v1, %v2291_v48  ;;  %v2303_v55 = vmul.f32 %v2300_v1, %v2292_v19  ;;  %v2323_v46 = vmul.f32 %v2321_v61, %v2291_v48  ;;  %v2324_v60 = vmul.f32 %v2321_v61, %v2292_v19  ;;  %v2356_v34 = vld [vmem:[#allocation2 + $0x8] sm:$0xff]  ;;  %v2357_v26 = vld [vmem:[#allocation2 + $0x10] sm:$0xff] }
 0x656   : > { %v2344_v40 = vmul.f32 %v2342_v25, %v2291_v48  ;;  %v2345_v42 = vmul.f32 %v2342_v25, %v2292_v19  ;;  %v2367_v35 = vmul.f32 %v2365_v38, %v2356_v34  ;;  %v2368_v24 = vmul.f32 %v2365_v38, %v2357_v26  ;;  %v2386_v6 = vpop.permute.xlu0 %2385  ;;  %v2407_v3 = vpop.permute.xlu1 %2406  ;;  %v2421_v15 = vld [vmem:[#allocation2 + $0x9] sm:$0xff]  ;;  %v2422_v57 = vld [vmem:[#allocation2 + $0x11] sm:$0xff] }
 0x657   : > { %2306 = vrot.lane.b32.xlu1 %v2302_v44, %s4242_s15  ;;  %2308 = vrot.lane.b32.xlu0 %v2303_v55, %s4242_s15  ;;  %v2388_v16 = vmul.f32 %v2386_v6, %v2356_v34  ;;  %v2389_v18 = vmul.f32 %v2386_v6, %v2357_v26  ;;  %v2409_v56 = vmul.f32 %v2407_v3, %v2356_v34  ;;  %v2824_v25 = vld [vmem:[%s3239_s12] sm:$0xff]  ;;  %v2825_v34 = vld [vmem:[%s3239_s12 + $0x8] sm:$0xff] }
 0x658   : > { %v2410_v49 = vmul.f32 %v2407_v3, %v2357_v26 }
 0x65a   : > { %v2430_v63 = vpop.permute.xlu0 %2429  ;;  %v2451_v11 = vpop.permute.xlu1 %2450 }
 0x65b   : > { %2327 = vrot.lane.b32.xlu1 %v2323_v46, %s4250_s26  ;;  %2329 = vrot.lane.b32.xlu0 %v2324_v60, %s4250_s26  ;;  %v2432_v47 = vmul.f32 %v2430_v63, %v2421_v15  ;;  %v2433_v37 = vmul.f32 %v2430_v63, %v2422_v57  ;;  %v2453_v2 = vmul.f32 %v2451_v11, %v2421_v15 }
 0x65c   : > { %v2454_v29 = vmul.f32 %v2451_v11, %v2422_v57 }
 0x65e   : > { %v2472_v39 = vpop.permute.xlu0 %2471 }
 0x65f   : > { %2348 = vrot.lane.b32.xlu1 %v2344_v40, %s4257_s0  ;;  %2350 = vrot.lane.b32.xlu0 %v2345_v42, %s4257_s0  ;;  %v2474_v5 = vmul.f32 %v2472_v39, %v2421_v15  ;;  %v2475_v62 = vmul.f32 %v2472_v39, %v2422_v57 }
 0x663   : > { %2371 = vrot.lane.b32.xlu1 %v2367_v35, %s4242_s15  ;;  %2373 = vrot.lane.b32.xlu0 %v2368_v24, %s4242_s15 }
 0x667   : > { %2392 = vrot.lane.b32.xlu1 %v2388_v16, %s4250_s26  ;;  %2394 = vrot.lane.b32.xlu0 %v2389_v18, %s4250_s26 }
 0x66b   : > { %2413 = vrot.lane.b32.xlu1 %v2409_v56, %s4257_s0  ;;  %2415 = vrot.lane.b32.xlu0 %v2410_v49, %s4257_s0 }
 0x66f   : > { %2436 = vrot.lane.b32.xlu1 %v2432_v47, %s4242_s15  ;;  %2438 = vrot.lane.b32.xlu0 %v2433_v37, %s4242_s15 }
 0x673   : > { %2457 = vrot.lane.b32.xlu1 %v2453_v2, %s4250_s26  ;;  %2459 = vrot.lane.b32.xlu0 %v2454_v29, %s4250_s26  ;;  %s4287_s26 = sshll.u32 %s3233_s14, 4 }
 0x674   : > { %s271_s17 = scalar_lea.vmem [#allocation9], %s4287_s26 }
 0x675   : > { %s2507_s16 = sshll.u32 %s271_s17, 4  ;;  %s4113_s16 = int_to_ptr.vmem [resolvable:$true] %s2507_s16 }
 0x676   : > { %s2912_s1 = scalar_lea.vmem %s4113_s16, 256  ;;  %p2919_p7 = scmp.lt.s32.totalorder %s4113_s16, %s2917_s9 }
 0x677   : > { %2478 = vrot.lane.b32.xlu1 %v2474_v5, %s4257_s0  ;;  %2480 = vrot.lane.b32.xlu0 %v2475_v62, %s4257_s0  ;;  %s2722_s0 = sshll.u32 %s3073_s22, 8  ;;  %s2494_s22 = scalar_lea.sflag [#allocation5], %s3233_s14 }
 0x678   : > { %s4110_s8 = scalar_lea.hbm %s4163_s5, %s2722_s0  ;;  %p2913_p11 = scmp.ne.s32.totalorder %s4113_s16, %s2912_s1 }
 0x679   : > { %p2920_p9 = scmp.lt.s32.totalorder %s2918_s11, %s2912_s1 }
 0x67a   : > { %p2914_p2 = pnand %p2913_p11, %p4288_p0 }
 0x67b   : > { %p2921_p12 = por %p2920_p9, %p2919_p7 }
 0x67c   : > { %p2915_p3 = pneg %p2914_p2 }
 0x67e   : > { %p2922_p1 = pnand %p2921_p12, %p2915_p3 }
 0x6c9   : > { %v2307_v8 = vpop.permute.xlu1 %2306  ;;  %v2309_v10 = vpop.permute.xlu0 %2308 }
 0x6ca   : > { %v2312_v7 = vadd.f32 %v2706_v51, %v2307_v8  ;;  %v2313_v9 = vadd.f32 %v2706_v51, %v2309_v10 }
 0x6cd   : > { %v2328_v4 = vpop.permute.xlu1 %2327  ;;  %v2330_v12 = vpop.permute.xlu0 %2329 }
 0x6ce   : > { %v2333_v20 = vadd.f32 %v2328_v4, %v2312_v7  ;;  %v2334_v58 = vadd.f32 %v2330_v12, %v2313_v9 }
 0x6d1   : > { %v2349_v53 = vpop.permute.xlu1 %2348  ;;  %v2351_v28 = vpop.permute.xlu0 %2350 }
 0x6d2   : > { %v2354_v0 = vadd.f32 %v2349_v53, %v2333_v20  ;;  %v2355_v23 = vadd.f32 %v2351_v28, %v2334_v58 }
 0x6d5   : > { %v2372_v32 = vpop.permute.xlu1 %2371  ;;  %v2374_v13 = vpop.permute.xlu0 %2373 }
 0x6d6   : > { %v2377_v27 = vadd.f32 %v2372_v32, %v2354_v0  ;;  %v2378_v36 = vadd.f32 %v2374_v13, %v2355_v23 }
 0x6d9   : > { %v2393_v59 = vpop.permute.xlu1 %2392  ;;  %v2395_v14 = vpop.permute.xlu0 %2394 }
 0x6da   : > { %v2398_v22 = vadd.f32 %v2393_v59, %v2377_v27  ;;  %v2399_v43 = vadd.f32 %v2395_v14, %v2378_v36 }
 0x6dd   : > { %v2414_v52 = vpop.permute.xlu1 %2413  ;;  %v2416_v17 = vpop.permute.xlu0 %2415 }
 0x6de   : > { %v2419_v45 = vadd.f32 %v2414_v52, %v2398_v22  ;;  %v2420_v21 = vadd.f32 %v2416_v17, %v2399_v43 }
 0x6e1   : > { %v2437_v30 = vpop.permute.xlu1 %2436  ;;  %v2439_v33 = vpop.permute.xlu0 %2438 }
 0x6e2   : > { %v2442_v41 = vadd.f32 %v2437_v30, %v2419_v45  ;;  %v2443_v31 = vadd.f32 %v2439_v33, %v2420_v21 }
 0x6e5   : > { %v2458_v54 = vpop.permute.xlu1 %2457  ;;  %v2460_v50 = vpop.permute.xlu0 %2459 }
 0x6e6   : > { %v2463_v48 = vadd.f32 %v2458_v54, %v2442_v41  ;;  %v2464_v1 = vadd.f32 %v2460_v50, %v2443_v31 }
 0x6e9   : > { %v2479_v19 = vpop.permute.xlu1 %2478  ;;  %v2481_v55 = vpop.permute.xlu0 %2480 }
 0x6ea   : > { %v2484_v44 = vadd.f32 %v2479_v19, %v2463_v48  ;;  %v2485_v61 = vadd.f32 %v2481_v55, %v2464_v1 }
 0x6ec   : > { %v2486_v46 = vmul.f32 0.2, %v2484_v44  ;;  %v2487_v60 = vmul.f32 0.2, %v2485_v61 }
 0x6ee   : > { %v2488_v40 = vadd.f32 %v2824_v25, %v2486_v46  ;;  %v2489_v42 = vadd.f32 %v2825_v34, %v2487_v60 }
 0x6f0   : > { %2491 = vst.msk [vmem:[%s271_s17] sm:$0xff] %vm2490_vm4, %v2488_v40  ;;  %2492 = vst.msk [vmem:[%s271_s17 + $0x8] sm:$0xff] %vm2490_vm4, %v2489_v42 }
 0x6f1   : > { %2925 = shalt.err (!%p2922_p1)
}
 0x6f2   : > { %s2926_s12 = scalar_lea.hbm %s4110_s8, 256  ;;  %s2930_s28 = scalar_lea.hbm %s4163_s5, 512 }
 0x6f3   : > { %p2927_p13 = scmp.ne.s32.totalorder %s4110_s8, %s2926_s12  ;;  %p2931_p4 = scmp.lt.u32.totalorder %s4110_s8, %s4163_s5 }
 0x6f4   : > { %p2932_p5 = scmp.lt.u32.totalorder %s2930_s28, %s2926_s12  ;;  %p2934_p11 = scmp.lt.u32.totalorder %s2926_s12, %s4110_s8 }
 0x6f5   : > { %p2928_p6 = pnand %p2927_p13, %p4288_p0 }
 0x6f6   : > { %p2933_p8 = por %p2932_p5, %p2931_p4 }
 0x6f7   : > { %p2929_p10 = pneg %p2928_p6 }
 0x6f8   : > { %p2935_p2 = por %p2934_p11, %p2933_p8 }
 0x6fa   : > { %p2936_p3 = pnand %p2935_p2, %p2929_p10 }
 0x6fc   : > { %2939 = shalt.err (!%p2936_p3)
}
 0x6fd   : > { %s3021_s0 = smov 128  }
 0x6fe   : > { %2733 = dma.vmem_to_hbm [thread:$0]  (%p4288_p0), %s4113_s16, 256, %s4110_s8, %s2494_s22, %s3021_s0, %s3021_s0, %s4233_s6  }
 0x6ff PF: > { %s2522_s26 = sand.u32 1, %s2970_s18   ;;  %p4289_p7 = scmp.ne.s32.totalorder %s4221_s25, 0 }
 0x700   : > { %p4290_p9 = scmp.ge.s32.totalorder %s2982_s21, 2  ;;  %s2523_s17 = scalar_lea.sflag [#allocation5], %s2522_s26 }
 0x702   : > { %p2747_p12 = pnand %p4290_p9, %p4289_p7 }
 0x704   : > { %2965 = dma.done.wait (!%p2747_p12), %s2523_s17, 256  }
 0x705   : > { %2967 = vsyncadd (!%p2747_p12), %s2523_s17, 4294967040  ;;  %p19_p1 = scmp.ge.s32.totalorder %s3168_s29, 4   ;;  %s4291_s18 = smov %s2974_s19 }
 0x706   : > { %s4292_s19 = smov %s2978_s20  ;;  %s4293_s20 = smov %s3184_s27 }
 0x707   : > { %s4294_s21 = smov %s3168_s29  ;;  %21 = sbr.rel (!%p19_p1) target bundleno = 10 (0xa), region = 93 }
 0x70e   :  { %2528 = vsyncpa [#allocation4], 1 }
 0x70f   :  { %2530 = vsyncpa [#allocation4 + $0x1], 1 }
 0x710   :  { %2531 = vsyncpa [#allocation7], 1 }
 0x711   :  { %2532 = vsyncpa [#allocation5], 1 }
 0x712   :  { %2534 = vsyncpa [#allocation5 + $0x1], 1 }

</bundles_post_ra>
